<compile_context>
chip_gen: v5e
topology: v5e:2x2
jax: 0.10.0
libtpu: 0.0.40
codegen_flags: <defaults>
</compile_context>

<pallas_src>
import functools

import jax
import jax.numpy as jnp
from jax.experimental import pallas as pl
from jax.experimental.pallas import tpu as pltpu


_MAX_TILE_M = 2048        # lane-axis tile (multiple of 128); fits all generations
_MAX_TILE_K = 1024        # reduction tile (multiple of 128 when multi-tile)
_VMEM_BUDGET = 48 << 20   # stay well under v7x's 64 MiB physical VMEM

# bf16 x bf16 -> f32 is the native MXU path on TPU; the XLA:CPU executor used by
# the Pallas interpret runner rejects that dot, so fall back to f32 compute there.
_MXU_DTYPE = jnp.bfloat16 if jax.default_backend() == "tpu" else jnp.float32


def _round_up(x, m):
    return ((x + m - 1) // m) * m


def _conv_matmul_kernel(xT_ref, wT_ref, b_ref, *rest, activation, fused_head,
                        mxu_dtype):
    """One (Cout, TK) @ (TK, TILE_M) MXU step of the K reduction.

    Patches stream lane-dense; weights/bias stay VMEM resident (constant index
    maps).  f32 accumulator scratch is resident across the K grid axis; bias is
    folded into the kk==0 init and the activation epilogue (plus the optional
    fused 1x1x1 head conv + sigmoid) runs in f32 on the last K step.
    """
    if fused_head:
        hwT_ref, hb_ref, o_ref, acc_ref = rest
    else:
        o_ref, acc_ref = rest

    kk = pl.program_id(1)

    @pl.when(kk == 0)
    def _init():
        # Bias folded into the accumulator init (K/Cout zero-padding keeps it exact).
        acc_ref[...] = jnp.broadcast_to(b_ref[...], acc_ref.shape)

    acc_ref[...] += jnp.dot(wT_ref[...].astype(mxu_dtype),
                            xT_ref[...].astype(mxu_dtype),
                            preferred_element_type=jnp.float32)

    @pl.when(kk == pl.num_programs(1) - 1)
    def _finalize():
        def _sigmoid(v):                       # stable form, already in [0, 1]
            e = jnp.exp(-jnp.abs(v))
            inv = 1.0 / (1.0 + e)
            return jnp.where(v >= 0.0, inv, e * inv)

        z = acc_ref[...]
        if activation == "leaky_relu":
            z = jnp.where(z >= 0.0, z, 0.02 * z)
        elif activation == "sigmoid":
            z = _sigmoid(z)
        if fused_head:                         # fused 1x1x1 conv + sigmoid
            z = jnp.dot(hwT_ref[...], z,
                        preferred_element_type=jnp.float32) + hb_ref[...]
            z = _sigmoid(z)
        o_ref[...] = z.astype(o_ref.dtype)


def _conv3d_pallas(x, w, b, *, stride, activation, head=None,
                   out_dtype=jnp.bfloat16):
    """Valid-padding Conv3d + bias + activation in channel-major layout.

    x: (Cin, N, D, H, W) bf16 (channel-major between layers -> no transposes)
    w: (kd, kh, kw, Cin, Cout) f32   (= torch weight (Cout,Cin,kd,kh,kw) permuted)
    b: (Cout,) f32
    head: optional (w6 (1,1,1,Cout,Z), b6 (Z,)) fused 1x1x1 conv + sigmoid
    returns: (Cout_or_Z, N, Do, Ho, Wo) in out_dtype, channel-major.
    """
    C, N, D, H, W = x.shape
    k = w.shape[0]
    Cout = w.shape[-1]
    Do = (D - k) // stride + 1
    Ho = (H - k) // stride + 1
    Wo = (W - k) // stride + 1
    M = N * Do * Ho * Wo
    K_total = k * k * k * C

    # ---- im2col glue (XLA).  Channel-major activations make every tap slice a
    # contiguous (C, M) reshape: no per-tap transpose, no re-cast.
    # TODO(synk): replace with an in-kernel halo-DMA tap gather (see header).
    cols = []
    for i in range(k):
        for j in range(k):
            for l in range(k):
                sl = jax.lax.slice(
                    x, (0, 0, i, j, l),
                    (C, N,
                     i + stride * (Do - 1) + 1,
                     j + stride * (Ho - 1) + 1,
                     l + stride * (Wo - 1) + 1),
                    (1, 1, stride, stride, stride))        # (C, N, Do, Ho, Wo)
                cols.append(sl.reshape(C, M))
    patches_T = cols[0] if len(cols) == 1 else jnp.concatenate(cols, axis=0)

    cout_pad = _round_up(Cout, 8)                 # sublane tidy-up (early layers)
    wT = jnp.transpose(w.reshape(K_total, Cout)).astype(_MXU_DTYPE)   # (Cout, K)
    wT = jnp.pad(wT, ((0, cout_pad - Cout), (0, 0)))
    b2 = jnp.pad(b.astype(jnp.float32), (0, cout_pad - Cout)).reshape(cout_pad, 1)

    if head is not None:
        hw, hb = head
        Z = hw.shape[-1]
        out_ch = Z
        out_rows = _round_up(Z, 8)
        hwT = jnp.transpose(hw.reshape(Cout, Z)).astype(jnp.float32)  # (Z, Cout)
        hwT = jnp.pad(hwT, ((0, out_rows - Z), (0, cout_pad - Cout)))
        hb2 = jnp.pad(hb.astype(jnp.float32), (0, out_rows - Z)).reshape(out_rows, 1)
    else:
        out_ch = Cout
        out_rows = cout_pad

    # ---- tiling: lane-dense M tiles ("parallel", >=2 tiles when M >= 256 so
    # both v7x TensorCores get work), K reduction axis last ("arbitrary").
    m128 = _round_up(M, 128)
    if m128 >= 256:
        tile_m = min(_MAX_TILE_M, max(128, (m128 // 2) // 128 * 128))
    else:
        tile_m = m128
    tile_k = _round_up(K_total, 8) if K_total <= _MAX_TILE_K else _MAX_TILE_K

    out_bytes = jnp.dtype(out_dtype).itemsize
    x_bytes = jnp.dtype(patches_T.dtype).itemsize
    w_bytes = jnp.dtype(_MXU_DTYPE).itemsize

    def vmem_est(tm):
        est = 2 * tile_k * tm * x_bytes               # double-buffered patch tiles
        est += tile_k * tm * 4                        # worst-case f32 cast temp
        est += 2 * cout_pad * tile_k * w_bytes        # weight tile (x2 buffers)
        est += cout_pad * tm * 4                      # f32 accumulator scratch
        est += 2 * out_rows * tm * out_bytes          # double-buffered output tiles
        est += 4 * cout_pad                           # bias
        if head is not None:
            est += 2 * (out_rows * cout_pad + out_rows) * 4
        return est

    while vmem_est(tile_m) > _VMEM_BUDGET and tile_m > 128:
        tile_m = max(128, (tile_m // 2) // 128 * 128)

    k_pad = _round_up(K_total, tile_k)
    m_pad = _round_up(M, tile_m)
    num_m = m_pad // tile_m
    num_k = k_pad // tile_k

    patches_T = jnp.pad(patches_T, ((0, k_pad - K_total), (0, m_pad - M)))
    wT = jnp.pad(wT, ((0, 0), (0, k_pad - K_total)))

    in_specs = [
        pl.BlockSpec((tile_k, tile_m), lambda m, kk: (kk, m)),      # patches
        pl.BlockSpec((cout_pad, tile_k), lambda m, kk: (0, kk)),    # weights
        pl.BlockSpec((cout_pad, 1), lambda m, kk: (0, 0)),          # bias
    ]
    inputs = [patches_T, wT, b2]
    if head is not None:
        in_specs += [
            pl.BlockSpec((out_rows, cout_pad), lambda m, kk: (0, 0)),   # head W
            pl.BlockSpec((out_rows, 1), lambda m, kk: (0, 0)),          # head b
        ]
        inputs += [hwT, hb2]

    kernel = functools.partial(_conv_matmul_kernel, activation=activation,
                               fused_head=head is not None, mxu_dtype=_MXU_DTYPE)

    out = pl.pallas_call(
        kernel,
        out_shape=jax.ShapeDtypeStruct((out_rows, m_pad), out_dtype),
        grid_spec=pltpu.PrefetchScalarGridSpec(
            num_scalar_prefetch=0,
            grid=(num_m, num_k),
            in_specs=in_specs,
            out_specs=pl.BlockSpec((out_rows, tile_m), lambda m, kk: (0, m)),
            scratch_shapes=[pltpu.VMEM((cout_pad, tile_m), jnp.float32)],
        ),
        compiler_params=pltpu.CompilerParams(
            dimension_semantics=("parallel", "arbitrary"),
            vmem_limit_bytes=int(min(_VMEM_BUDGET,
                                     max(2 * vmem_est(tile_m), 16 << 20))),
        ),
    )(*inputs)

    # Crop K/M/Cout padding; stay channel-major for the next layer (no transpose).
    return out[:out_ch, :M].reshape(out_ch, N, Do, Ho, Wo)


def _layer_cfg(d_dim, z_dim):
    # (kernel, stride, Cin, Cout) per layer — matches the nn.Conv3d stack.
    return [
        (4, 1, 1,          d_dim),
        (3, 2, d_dim,      d_dim * 2),
        (3, 1, d_dim * 2,  d_dim * 4),
        (3, 1, d_dim * 4,  d_dim * 8),
        (3, 1, d_dim * 8,  d_dim * 16),
        (1, 1, d_dim * 16, z_dim),
    ]


def init_discriminator_params(key, d_dim, z_dim):
    """Deterministic synthetic params; shapes match nn.Conv3d in the module."""
    params = []
    strides = []
    for (k, s, cin, cout) in _layer_cfg(d_dim, z_dim):
        key, wk, bk = jax.random.split(key, 3)
        w = 0.05 * jax.random.normal(wk, (k, k, k, cin, cout), dtype=jnp.float32)
        b = 0.01 * jax.random.normal(bk, (cout,), dtype=jnp.float32)
        params.append((w, b))
        strides.append(s)
    return params, tuple(strides)


def discriminator_forward(voxels, params, strides):
    """voxels: (N, 1, D, H, W) f32 -> (N, z_dim, Do, Ho, Wo) f32 (NCDHW like PyTorch)."""
    # Single cheap boundary transpose to channel-major bf16; layers 1-4 then
    # exchange bf16 (C, N, D, H, W) activations with no further transposes.
    x = jnp.transpose(voxels, (1, 0, 2, 3, 4)).astype(jnp.bfloat16)
    for li in range(4):                               # conv_1..conv_4 + leaky_relu
        w, b = params[li]
        x = _conv3d_pallas(x, w, b, stride=strides[li],
                           activation="leaky_relu", out_dtype=jnp.bfloat16)
    # conv_5 + leaky_relu fused with conv_6 (1x1x1) + sigmoid in one kernel.
    w5, b5 = params[4]
    w6, b6 = params[5]
    x = _conv3d_pallas(x, w5, b5, stride=strides[4], activation="leaky_relu",
                       head=(w6, b6), out_dtype=jnp.float32)
    return jnp.transpose(x, (1, 0, 2, 3, 4))          # back to NCDHW


def _reference_forward(voxels, params, strides):
    """Pure-XLA f32 reference (lax.conv_general_dilated) for correctness check."""
    x = voxels.astype(jnp.float32)
    acts = ("leaky_relu",) * 5 + ("sigmoid",)
    for (w, b), s, a in zip(params, strides, acts):
        wt = jnp.transpose(w, (4, 3, 0, 1, 2))         # (Cout, Cin, kd, kh, kw)
        x = jax.lax.conv_general_dilated(
            x, wt, window_strides=(s, s, s), padding="VALID",
            dimension_numbers=("NCDHW", "OIDHW", "NCDHW"))
        x = x + b.reshape(1, -1, 1, 1, 1)
        if a == "leaky_relu":
            x = jnp.where(x >= 0.0, x, 0.02 * x)
        else:
            x = jax.nn.sigmoid(x)
    return x


if __name__ == "__main__":
    d_dim = 4
    z_dim = 8
    batch = 2
    vox = 18   # smallest spatial size that survives the 6 valid convs -> 1x1x1

    key = jax.random.PRNGKey(0)
    key, pkey, xkey = jax.random.split(key, 3)
    params, strides = init_discriminator_params(pkey, d_dim, z_dim)
    voxels = jax.random.uniform(xkey, (batch, 1, vox, vox, vox), dtype=jnp.float32)

    fwd = jax.jit(discriminator_forward, static_argnums=(2,))
    out = jax.block_until_ready(fwd(voxels, params, strides))

    assert out.shape == (batch, z_dim, 1, 1, 1), out.shape
    assert bool(jnp.all((out >= 0.0) & (out <= 1.0)))          # sigmoid range

    ref = _reference_forward(voxels, params, strides)
    max_err = float(jnp.max(jnp.abs(out - ref)))
    assert max_err < 5e-2, f"max abs err vs XLA conv reference: {max_err}"

    print("KERNEL_OK")
</pallas_src>

<mosaic_0001>
module attributes {stable_mosaic.version = 11 : i64} {
  func.func @_conv_matmul_kernel(%arg0: i32, %arg1: i32, %arg2: memref<64x2048xbf16, #tpu.memory_space<vmem>>, %arg3: memref<8x64xf32, #tpu.memory_space<vmem>>, %arg4: memref<8x1xf32, #tpu.memory_space<vmem>>, %arg5: memref<8x2048xbf16, #tpu.memory_space<vmem>>, %arg6: memref<8x2048xf32, #tpu.memory_space<vmem>>) attributes {dimension_semantics = [#tpu.dimension_semantics<parallel>, #tpu.dimension_semantics<arbitrary>], iteration_bounds = array<i64: 4, 1>, scalar_prefetch = 0 : i64, scratch_operands = 1 : i64, tpu.core_type = #tpu.core_type<tc>, window_params = [{transform_indices = @transform_0, window_bounds = array<i64: 64, 2048>}, {transform_indices = @transform_1, window_bounds = array<i64: 8, 64>}, {pipeline_mode = #tpu.pipeline_mode<synchronous>, transform_indices = @transform_2, window_bounds = array<i64: 8, 1>}, {transform_indices = @transform_3, window_bounds = array<i64: 8, 2048>}]} {
    %c0_i32 = arith.constant 0 : i32
    %0 = arith.cmpi eq, %arg1, %c0_i32 : i32
    %1 = arith.extui %0 : i1 to i32
    %c0_i32_0 = arith.constant 0 : i32
    %2 = arith.cmpi ne, %1, %c0_i32_0 : i32
    scf.if %2 {
      %c0_10 = arith.constant 0 : index
      %c0_11 = arith.constant 0 : index
      %13 = vector.load %arg4[%c0_10, %c0_11] : memref<8x1xf32, #tpu.memory_space<vmem>>, vector<8x1xf32>
      %14 = vector.shape_cast %13 : vector<8x1xf32> to vector<8x1xf32>
      %15 = vector.broadcast %14 : vector<8x1xf32> to vector<8x2048xf32>
      %c0_12 = arith.constant 0 : index
      %c0_13 = arith.constant 0 : index
      %16 = vector.load %arg6[%c0_12, %c0_13] : memref<8x2048xf32, #tpu.memory_space<vmem>>, vector<8x2048xf32>
      tpu.vector_store %arg6[%c0_12, %c0_13], %15 {strides = array<i32>} : memref<8x2048xf32, #tpu.memory_space<vmem>>, vector<8x2048xf32>,
    } else {
    }
    %c0 = arith.constant 0 : index
    %c0_1 = arith.constant 0 : index
    %3 = vector.load %arg6[%c0, %c0_1] : memref<8x2048xf32, #tpu.memory_space<vmem>>, vector<8x2048xf32>
    %c0_2 = arith.constant 0 : index
    %c0_3 = arith.constant 0 : index
    %4 = vector.load %arg3[%c0_2, %c0_3] : memref<8x64xf32, #tpu.memory_space<vmem>>, vector<8x64xf32>
    %c0_4 = arith.constant 0 : index
    %c0_5 = arith.constant 0 : index
    %5 = vector.load %arg2[%c0_4, %c0_5] : memref<64x2048xbf16, #tpu.memory_space<vmem>>, vector<64x2048xbf16>
    %6 = arith.extf %5 : vector<64x2048xbf16> to vector<64x2048xf32>
    %cst = arith.constant dense<0.000000e+00> : vector<8x2048xf32>
    %7 = tpu.matmul %4, %6, %cst {dimension_numbers = #tpu.dot_dimension_numbers<[1], [0], [0], [1], [0, 0, 1, 1], [], []>} : vector<8x64xf32>, vector<64x2048xf32>, vector<8x2048xf32> -> vector<8x2048xf32>
    %8 = arith.addf %3, %7 : vector<8x2048xf32>
    %c0_6 = arith.constant 0 : index
    %c0_7 = arith.constant 0 : index
    %9 = vector.load %arg6[%c0_6, %c0_7] : memref<8x2048xf32, #tpu.memory_space<vmem>>, vector<8x2048xf32>
    tpu.vector_store %arg6[%c0_6, %c0_7], %8 {strides = array<i32>} : memref<8x2048xf32, #tpu.memory_space<vmem>>, vector<8x2048xf32>,
    %c0_i32_8 = arith.constant 0 : i32
    %10 = arith.cmpi eq, %arg1, %c0_i32_8 : i32
    %11 = arith.extui %10 : i1 to i32
    %c0_i32_9 = arith.constant 0 : i32
    %12 = arith.cmpi ne, %11, %c0_i32_9 : i32
    scf.if %12 {
      %c0_10 = arith.constant 0 : index
      %c0_11 = arith.constant 0 : index
      %13 = vector.load %arg6[%c0_10, %c0_11] : memref<8x2048xf32, #tpu.memory_space<vmem>>, vector<8x2048xf32>
      %cst_12 = arith.constant 0.000000e+00 : f32
      %14 = vector.broadcast %cst_12 : f32 to vector<8x2048xf32>
      %15 = arith.cmpf oge, %13, %14 : vector<8x2048xf32>
      %cst_13 = arith.constant 2.000000e-02 : f32
      %16 = vector.broadcast %cst_13 : f32 to vector<8x2048xf32>
      %17 = arith.mulf %16, %13 : vector<8x2048xf32>
      %18 = arith.select %15, %13, %17 : vector<8x2048xi1>, vector<8x2048xf32>
      %19 = arith.truncf %18 : vector<8x2048xf32> to vector<8x2048xbf16>
      %c0_14 = arith.constant 0 : index
      %c0_15 = arith.constant 0 : index
      %20 = vector.load %arg5[%c0_14, %c0_15] : memref<8x2048xbf16, #tpu.memory_space<vmem>>, vector<8x2048xbf16>
      tpu.vector_store %arg5[%c0_14, %c0_15], %19 {strides = array<i32>} : memref<8x2048xbf16, #tpu.memory_space<vmem>>, vector<8x2048xbf16>,
    } else {
    }
    return
  }
  func.func @transform_0(%arg0: i32, %arg1: i32) -> (i32, i32) {
    %c0_i32 = arith.constant 0 : i32
    return %arg1, %arg0 : i32, i32
  }
  func.func @transform_1(%arg0: i32, %arg1: i32) -> (i32, i32) {
    %c0_i32 = arith.constant 0 : i32
    %c0_i32_0 = arith.constant 0 : i32
    return %c0_i32, %arg1 : i32, i32
  }
  func.func @transform_2(%arg0: i32, %arg1: i32) -> (i32, i32) {
    %c0_i32 = arith.constant 0 : i32
    %c0_i32_0 = arith.constant 0 : i32
    %c0_i32_1 = arith.constant 0 : i32
    return %c0_i32, %c0_i32_0 : i32, i32
  }
  func.func @transform_3(%arg0: i32, %arg1: i32) -> (i32, i32) {
    %c0_i32 = arith.constant 0 : i32
    %c0_i32_0 = arith.constant 0 : i32
    return %c0_i32, %arg0 : i32, i32
  }
}

module attributes {stable_mosaic.version = 11 : i64} {
  func.func @_conv_matmul_kernel(%arg0: i32, %arg1: i32, %arg2: memref<112x384xbf16, #tpu.memory_space<vmem>>, %arg3: memref<8x112xf32, #tpu.memory_space<vmem>>, %arg4: memref<8x1xf32, #tpu.memory_space<vmem>>, %arg5: memref<8x384xbf16, #tpu.memory_space<vmem>>, %arg6: memref<8x384xf32, #tpu.memory_space<vmem>>) attributes {dimension_semantics = [#tpu.dimension_semantics<parallel>, #tpu.dimension_semantics<arbitrary>], iteration_bounds = array<i64: 2, 1>, scalar_prefetch = 0 : i64, scratch_operands = 1 : i64, tpu.core_type = #tpu.core_type<tc>, window_params = [{transform_indices = @transform_0, window_bounds = array<i64: 112, 384>}, {transform_indices = @transform_1, window_bounds = array<i64: 8, 112>}, {pipeline_mode = #tpu.pipeline_mode<synchronous>, transform_indices = @transform_2, window_bounds = array<i64: 8, 1>}, {transform_indices = @transform_3, window_bounds = array<i64: 8, 384>}]} {
    %c0_i32 = arith.constant 0 : i32
    %0 = arith.cmpi eq, %arg1, %c0_i32 : i32
    %1 = arith.extui %0 : i1 to i32
    %c0_i32_0 = arith.constant 0 : i32
    %2 = arith.cmpi ne, %1, %c0_i32_0 : i32
    scf.if %2 {
      %c0_10 = arith.constant 0 : index
      %c0_11 = arith.constant 0 : index
      %13 = vector.load %arg4[%c0_10, %c0_11] : memref<8x1xf32, #tpu.memory_space<vmem>>, vector<8x1xf32>
      %14 = vector.shape_cast %13 : vector<8x1xf32> to vector<8x1xf32>
      %15 = vector.broadcast %14 : vector<8x1xf32> to vector<8x384xf32>
      %c0_12 = arith.constant 0 : index
      %c0_13 = arith.constant 0 : index
      %16 = vector.load %arg6[%c0_12, %c0_13] : memref<8x384xf32, #tpu.memory_space<vmem>>, vector<8x384xf32>
      tpu.vector_store %arg6[%c0_12, %c0_13], %15 {strides = array<i32>} : memref<8x384xf32, #tpu.memory_space<vmem>>, vector<8x384xf32>,
    } else {
    }
    %c0 = arith.constant 0 : index
    %c0_1 = arith.constant 0 : index
    %3 = vector.load %arg6[%c0, %c0_1] : memref<8x384xf32, #tpu.memory_space<vmem>>, vector<8x384xf32>
    %c0_2 = arith.constant 0 : index
    %c0_3 = arith.constant 0 : index
    %4 = vector.load %arg3[%c0_2, %c0_3] : memref<8x112xf32, #tpu.memory_space<vmem>>, vector<8x112xf32>
    %c0_4 = arith.constant 0 : index
    %c0_5 = arith.constant 0 : index
    %5 = vector.load %arg2[%c0_4, %c0_5] : memref<112x384xbf16, #tpu.memory_space<vmem>>, vector<112x384xbf16>
    %6 = arith.extf %5 : vector<112x384xbf16> to vector<112x384xf32>
    %cst = arith.constant dense<0.000000e+00> : vector<8x384xf32>
    %7 = tpu.matmul %4, %6, %cst {dimension_numbers = #tpu.dot_dimension_numbers<[1], [0], [0], [1], [0, 0, 1, 1], [], []>} : vector<8x112xf32>, vector<112x384xf32>, vector<8x384xf32> -> vector<8x384xf32>
    %8 = arith.addf %3, %7 : vector<8x384xf32>
    %c0_6 = arith.constant 0 : index
    %c0_7 = arith.constant 0 : index
    %9 = vector.load %arg6[%c0_6, %c0_7] : memref<8x384xf32, #tpu.memory_space<vmem>>, vector<8x384xf32>
    tpu.vector_store %arg6[%c0_6, %c0_7], %8 {strides = array<i32>} : memref<8x384xf32, #tpu.memory_space<vmem>>, vector<8x384xf32>,
    %c0_i32_8 = arith.constant 0 : i32
    %10 = arith.cmpi eq, %arg1, %c0_i32_8 : i32
    %11 = arith.extui %10 : i1 to i32
    %c0_i32_9 = arith.constant 0 : i32
    %12 = arith.cmpi ne, %11, %c0_i32_9 : i32
    scf.if %12 {
      %c0_10 = arith.constant 0 : index
      %c0_11 = arith.constant 0 : index
      %13 = vector.load %arg6[%c0_10, %c0_11] : memref<8x384xf32, #tpu.memory_space<vmem>>, vector<8x384xf32>
      %cst_12 = arith.constant 0.000000e+00 : f32
      %14 = vector.broadcast %cst_12 : f32 to vector<8x384xf32>
      %15 = arith.cmpf oge, %13, %14 : vector<8x384xf32>
      %cst_13 = arith.constant 2.000000e-02 : f32
      %16 = vector.broadcast %cst_13 : f32 to vector<8x384xf32>
      %17 = arith.mulf %16, %13 : vector<8x384xf32>
      %18 = arith.select %15, %13, %17 : vector<8x384xi1>, vector<8x384xf32>
      %19 = arith.truncf %18 : vector<8x384xf32> to vector<8x384xbf16>
      %c0_14 = arith.constant 0 : index
      %c0_15 = arith.constant 0 : index
      %20 = vector.load %arg5[%c0_14, %c0_15] : memref<8x384xbf16, #tpu.memory_space<vmem>>, vector<8x384xbf16>
      tpu.vector_store %arg5[%c0_14, %c0_15], %19 {strides = array<i32>} : memref<8x384xbf16, #tpu.memory_space<vmem>>, vector<8x384xbf16>,
    } else {
    }
    return
  }
  func.func @transform_0(%arg0: i32, %arg1: i32) -> (i32, i32) {
    %c0_i32 = arith.constant 0 : i32
    return %arg1, %arg0 : i32, i32
  }
  func.func @transform_1(%arg0: i32, %arg1: i32) -> (i32, i32) {
    %c0_i32 = arith.constant 0 : i32
    %c0_i32_0 = arith.constant 0 : i32
    return %c0_i32, %arg1 : i32, i32
  }
  func.func @transform_2(%arg0: i32, %arg1: i32) -> (i32, i32) {
    %c0_i32 = arith.constant 0 : i32
    %c0_i32_0 = arith.constant 0 : i32
    %c0_i32_1 = arith.constant 0 : i32
    return %c0_i32, %c0_i32_0 : i32, i32
  }
  func.func @transform_3(%arg0: i32, %arg1: i32) -> (i32, i32) {
    %c0_i32 = arith.constant 0 : i32
    %c0_i32_0 = arith.constant 0 : i32
    return %c0_i32, %arg0 : i32, i32
  }
}

module attributes {stable_mosaic.version = 11 : i64} {
  func.func @_conv_matmul_kernel(%arg0: i32, %arg1: i32, %arg2: memref<216x128xbf16, #tpu.memory_space<vmem>>, %arg3: memref<16x216xf32, #tpu.memory_space<vmem>>, %arg4: memref<16x1xf32, #tpu.memory_space<vmem>>, %arg5: memref<16x128xbf16, #tpu.memory_space<vmem>>, %arg6: memref<16x128xf32, #tpu.memory_space<vmem>>) attributes {dimension_semantics = [#tpu.dimension_semantics<parallel>, #tpu.dimension_semantics<arbitrary>], iteration_bounds = array<i64: 2, 1>, scalar_prefetch = 0 : i64, scratch_operands = 1 : i64, tpu.core_type = #tpu.core_type<tc>, window_params = [{transform_indices = @transform_0, window_bounds = array<i64: 216, 128>}, {transform_indices = @transform_1, window_bounds = array<i64: 16, 216>}, {pipeline_mode = #tpu.pipeline_mode<synchronous>, transform_indices = @transform_2, window_bounds = array<i64: 16, 1>}, {transform_indices = @transform_3, window_bounds = array<i64: 16, 128>}]} {
    %c0_i32 = arith.constant 0 : i32
    %0 = arith.cmpi eq, %arg1, %c0_i32 : i32
    %1 = arith.extui %0 : i1 to i32
    %c0_i32_0 = arith.constant 0 : i32
    %2 = arith.cmpi ne, %1, %c0_i32_0 : i32
    scf.if %2 {
      %c0_10 = arith.constant 0 : index
      %c0_11 = arith.constant 0 : index
      %13 = vector.load %arg4[%c0_10, %c0_11] : memref<16x1xf32, #tpu.memory_space<vmem>>, vector<16x1xf32>
      %14 = vector.shape_cast %13 : vector<16x1xf32> to vector<16x1xf32>
      %15 = vector.broadcast %14 : vector<16x1xf32> to vector<16x128xf32>
      %c0_12 = arith.constant 0 : index
      %c0_13 = arith.constant 0 : index
      %16 = vector.load %arg6[%c0_12, %c0_13] : memref<16x128xf32, #tpu.memory_space<vmem>>, vector<16x128xf32>
      tpu.vector_store %arg6[%c0_12, %c0_13], %15 {strides = array<i32>} : memref<16x128xf32, #tpu.memory_space<vmem>>, vector<16x128xf32>,
    } else {
    }
    %c0 = arith.constant 0 : index
    %c0_1 = arith.constant 0 : index
    %3 = vector.load %arg6[%c0, %c0_1] : memref<16x128xf32, #tpu.memory_space<vmem>>, vector<16x128xf32>
    %c0_2 = arith.constant 0 : index
    %c0_3 = arith.constant 0 : index
    %4 = vector.load %arg3[%c0_2, %c0_3] : memref<16x216xf32, #tpu.memory_space<vmem>>, vector<16x216xf32>
    %c0_4 = arith.constant 0 : index
    %c0_5 = arith.constant 0 : index
    %5 = vector.load %arg2[%c0_4, %c0_5] : memref<216x128xbf16, #tpu.memory_space<vmem>>, vector<216x128xbf16>
    %6 = arith.extf %5 : vector<216x128xbf16> to vector<216x128xf32>
    %cst = arith.constant dense<0.000000e+00> : vector<16x128xf32>
    %7 = tpu.matmul %4, %6, %cst {dimension_numbers = #tpu.dot_dimension_numbers<[1], [0], [0], [1], [0, 0, 1, 1], [], []>} : vector<16x216xf32>, vector<216x128xf32>, vector<16x128xf32> -> vector<16x128xf32>
    %8 = arith.addf %3, %7 : vector<16x128xf32>
    %c0_6 = arith.constant 0 : index
    %c0_7 = arith.constant 0 : index
    %9 = vector.load %arg6[%c0_6, %c0_7] : memref<16x128xf32, #tpu.memory_space<vmem>>, vector<16x128xf32>
    tpu.vector_store %arg6[%c0_6, %c0_7], %8 {strides = array<i32>} : memref<16x128xf32, #tpu.memory_space<vmem>>, vector<16x128xf32>,
    %c0_i32_8 = arith.constant 0 : i32
    %10 = arith.cmpi eq, %arg1, %c0_i32_8 : i32
    %11 = arith.extui %10 : i1 to i32
    %c0_i32_9 = arith.constant 0 : i32
    %12 = arith.cmpi ne, %11, %c0_i32_9 : i32
    scf.if %12 {
      %c0_10 = arith.constant 0 : index
      %c0_11 = arith.constant 0 : index
      %13 = vector.load %arg6[%c0_10, %c0_11] : memref<16x128xf32, #tpu.memory_space<vmem>>, vector<16x128xf32>
      %cst_12 = arith.constant 0.000000e+00 : f32
      %14 = vector.broadcast %cst_12 : f32 to vector<16x128xf32>
      %15 = arith.cmpf oge, %13, %14 : vector<16x128xf32>
      %cst_13 = arith.constant 2.000000e-02 : f32
      %16 = vector.broadcast %cst_13 : f32 to vector<16x128xf32>
      %17 = arith.mulf %16, %13 : vector<16x128xf32>
      %18 = arith.select %15, %13, %17 : vector<16x128xi1>, vector<16x128xf32>
      %19 = arith.truncf %18 : vector<16x128xf32> to vector<16x128xbf16>
      %c0_14 = arith.constant 0 : index
      %c0_15 = arith.constant 0 : index
      %20 = vector.load %arg5[%c0_14, %c0_15] : memref<16x128xbf16, #tpu.memory_space<vmem>>, vector<16x128xbf16>
      tpu.vector_store %arg5[%c0_14, %c0_15], %19 {strides = array<i32>} : memref<16x128xbf16, #tpu.memory_space<vmem>>, vector<16x128xbf16>,
    } else {
    }
    return
  }
  func.func @transform_0(%arg0: i32, %arg1: i32) -> (i32, i32) {
    %c0_i32 = arith.constant 0 : i32
    return %arg1, %arg0 : i32, i32
  }
  func.func @transform_1(%arg0: i32, %arg1: i32) -> (i32, i32) {
    %c0_i32 = arith.constant 0 : i32
    %c0_i32_0 = arith.constant 0 : i32
    return %c0_i32, %arg1 : i32, i32
  }
  func.func @transform_2(%arg0: i32, %arg1: i32) -> (i32, i32) {
    %c0_i32 = arith.constant 0 : i32
    %c0_i32_0 = arith.constant 0 : i32
    %c0_i32_1 = arith.constant 0 : i32
    return %c0_i32, %c0_i32_0 : i32, i32
  }
  func.func @transform_3(%arg0: i32, %arg1: i32) -> (i32, i32) {
    %c0_i32 = arith.constant 0 : i32
    %c0_i32_0 = arith.constant 0 : i32
    return %c0_i32, %arg0 : i32, i32
  }
}

module attributes {stable_mosaic.version = 11 : i64} {
  func.func @_conv_matmul_kernel(%arg0: i32, %arg1: i32, %arg2: memref<432x128xbf16, #tpu.memory_space<vmem>>, %arg3: memref<32x432xf32, #tpu.memory_space<vmem>>, %arg4: memref<32x1xf32, #tpu.memory_space<vmem>>, %arg5: memref<32x128xbf16, #tpu.memory_space<vmem>>, %arg6: memref<32x128xf32, #tpu.memory_space<vmem>>) attributes {dimension_semantics = [#tpu.dimension_semantics<parallel>, #tpu.dimension_semantics<arbitrary>], iteration_bounds = array<i64: 1, 1>, scalar_prefetch = 0 : i64, scratch_operands = 1 : i64, tpu.core_type = #tpu.core_type<tc>, window_params = [{transform_indices = @transform_0, window_bounds = array<i64: 432, 128>}, {transform_indices = @transform_1, window_bounds = array<i64: 32, 432>}, {pipeline_mode = #tpu.pipeline_mode<synchronous>, transform_indices = @transform_2, window_bounds = array<i64: 32, 1>}, {transform_indices = @transform_3, window_bounds = array<i64: 32, 128>}]} {
    %c0_i32 = arith.constant 0 : i32
    %0 = arith.cmpi eq, %arg1, %c0_i32 : i32
    %1 = arith.extui %0 : i1 to i32
    %c0_i32_0 = arith.constant 0 : i32
    %2 = arith.cmpi ne, %1, %c0_i32_0 : i32
    scf.if %2 {
      %c0_10 = arith.constant 0 : index
      %c0_11 = arith.constant 0 : index
      %13 = vector.load %arg4[%c0_10, %c0_11] : memref<32x1xf32, #tpu.memory_space<vmem>>, vector<32x1xf32>
      %14 = vector.shape_cast %13 : vector<32x1xf32> to vector<32x1xf32>
      %15 = vector.broadcast %14 : vector<32x1xf32> to vector<32x128xf32>
      %c0_12 = arith.constant 0 : index
      %c0_13 = arith.constant 0 : index
      %16 = vector.load %arg6[%c0_12, %c0_13] : memref<32x128xf32, #tpu.memory_space<vmem>>, vector<32x128xf32>
      tpu.vector_store %arg6[%c0_12, %c0_13], %15 {strides = array<i32>} : memref<32x128xf32, #tpu.memory_space<vmem>>, vector<32x128xf32>,
    } else {
    }
    %c0 = arith.constant 0 : index
    %c0_1 = arith.constant 0 : index
    %3 = vector.load %arg6[%c0, %c0_1] : memref<32x128xf32, #tpu.memory_space<vmem>>, vector<32x128xf32>
    %c0_2 = arith.constant 0 : index
    %c0_3 = arith.constant 0 : index
    %4 = vector.load %arg3[%c0_2, %c0_3] : memref<32x432xf32, #tpu.memory_space<vmem>>, vector<32x432xf32>
    %c0_4 = arith.constant 0 : index
    %c0_5 = arith.constant 0 : index
    %5 = vector.load %arg2[%c0_4, %c0_5] : memref<432x128xbf16, #tpu.memory_space<vmem>>, vector<432x128xbf16>
    %6 = arith.extf %5 : vector<432x128xbf16> to vector<432x128xf32>
    %cst = arith.constant dense<0.000000e+00> : vector<32x128xf32>
    %7 = tpu.matmul %4, %6, %cst {dimension_numbers = #tpu.dot_dimension_numbers<[1], [0], [0], [1], [0, 0, 1, 1], [], []>} : vector<32x432xf32>, vector<432x128xf32>, vector<32x128xf32> -> vector<32x128xf32>
    %8 = arith.addf %3, %7 : vector<32x128xf32>
    %c0_6 = arith.constant 0 : index
    %c0_7 = arith.constant 0 : index
    %9 = vector.load %arg6[%c0_6, %c0_7] : memref<32x128xf32, #tpu.memory_space<vmem>>, vector<32x128xf32>
    tpu.vector_store %arg6[%c0_6, %c0_7], %8 {strides = array<i32>} : memref<32x128xf32, #tpu.memory_space<vmem>>, vector<32x128xf32>,
    %c0_i32_8 = arith.constant 0 : i32
    %10 = arith.cmpi eq, %arg1, %c0_i32_8 : i32
    %11 = arith.extui %10 : i1 to i32
    %c0_i32_9 = arith.constant 0 : i32
    %12 = arith.cmpi ne, %11, %c0_i32_9 : i32
    scf.if %12 {
      %c0_10 = arith.constant 0 : index
      %c0_11 = arith.constant 0 : index
      %13 = vector.load %arg6[%c0_10, %c0_11] : memref<32x128xf32, #tpu.memory_space<vmem>>, vector<32x128xf32>
      %cst_12 = arith.constant 0.000000e+00 : f32
      %14 = vector.broadcast %cst_12 : f32 to vector<32x128xf32>
      %15 = arith.cmpf oge, %13, %14 : vector<32x128xf32>
      %cst_13 = arith.constant 2.000000e-02 : f32
      %16 = vector.broadcast %cst_13 : f32 to vector<32x128xf32>
      %17 = arith.mulf %16, %13 : vector<32x128xf32>
      %18 = arith.select %15, %13, %17 : vector<32x128xi1>, vector<32x128xf32>
      %19 = arith.truncf %18 : vector<32x128xf32> to vector<32x128xbf16>
      %c0_14 = arith.constant 0 : index
      %c0_15 = arith.constant 0 : index
      %20 = vector.load %arg5[%c0_14, %c0_15] : memref<32x128xbf16, #tpu.memory_space<vmem>>, vector<32x128xbf16>
      tpu.vector_store %arg5[%c0_14, %c0_15], %19 {strides = array<i32>} : memref<32x128xbf16, #tpu.memory_space<vmem>>, vector<32x128xbf16>,
    } else {
    }
    return
  }
  func.func @transform_0(%arg0: i32, %arg1: i32) -> (i32, i32) {
    %c0_i32 = arith.constant 0 : i32
    return %arg1, %arg0 : i32, i32
  }
  func.func @transform_1(%arg0: i32, %arg1: i32) -> (i32, i32) {
    %c0_i32 = arith.constant 0 : i32
    %c0_i32_0 = arith.constant 0 : i32
    return %c0_i32, %arg1 : i32, i32
  }
  func.func @transform_2(%arg0: i32, %arg1: i32) -> (i32, i32) {
    %c0_i32 = arith.constant 0 : i32
    %c0_i32_0 = arith.constant 0 : i32
    %c0_i32_1 = arith.constant 0 : i32
    return %c0_i32, %c0_i32_0 : i32, i32
  }
  func.func @transform_3(%arg0: i32, %arg1: i32) -> (i32, i32) {
    %c0_i32 = arith.constant 0 : i32
    %c0_i32_0 = arith.constant 0 : i32
    return %c0_i32, %arg0 : i32, i32
  }
}

module attributes {stable_mosaic.version = 11 : i64} {
  func.func @_conv_matmul_kernel(%arg0: i32, %arg1: i32, %arg2: memref<864x128xbf16, #tpu.memory_space<vmem>>, %arg3: memref<64x864xf32, #tpu.memory_space<vmem>>, %arg4: memref<64x1xf32, #tpu.memory_space<vmem>>, %arg5: memref<8x64xf32, #tpu.memory_space<vmem>>, %arg6: memref<8x1xf32, #tpu.memory_space<vmem>>, %arg7: memref<8x128xf32, #tpu.memory_space<vmem>>, %arg8: memref<64x128xf32, #tpu.memory_space<vmem>>) attributes {dimension_semantics = [#tpu.dimension_semantics<parallel>, #tpu.dimension_semantics<arbitrary>], iteration_bounds = array<i64: 1, 1>, scalar_prefetch = 0 : i64, scratch_operands = 1 : i64, tpu.core_type = #tpu.core_type<tc>, window_params = [{transform_indices = @transform_0, window_bounds = array<i64: 864, 128>}, {transform_indices = @transform_1, window_bounds = array<i64: 64, 864>}, {pipeline_mode = #tpu.pipeline_mode<synchronous>, transform_indices = @transform_2, window_bounds = array<i64: 64, 1>}, {pipeline_mode = #tpu.pipeline_mode<synchronous>, transform_indices = @transform_3, window_bounds = array<i64: 8, 64>}, {pipeline_mode = #tpu.pipeline_mode<synchronous>, transform_indices = @transform_4, window_bounds = array<i64: 8, 1>}, {transform_indices = @transform_5, window_bounds = array<i64: 8, 128>}]} {
    %c0_i32 = arith.constant 0 : i32
    %0 = arith.cmpi eq, %arg1, %c0_i32 : i32
    %1 = arith.extui %0 : i1 to i32
    %c0_i32_0 = arith.constant 0 : i32
    %2 = arith.cmpi ne, %1, %c0_i32_0 : i32
    scf.if %2 {
      %c0_10 = arith.constant 0 : index
      %c0_11 = arith.constant 0 : index
      %13 = vector.load %arg4[%c0_10, %c0_11] : memref<64x1xf32, #tpu.memory_space<vmem>>, vector<64x1xf32>
      %14 = vector.shape_cast %13 : vector<64x1xf32> to vector<64x1xf32>
      %15 = vector.broadcast %14 : vector<64x1xf32> to vector<64x128xf32>
      %c0_12 = arith.constant 0 : index
      %c0_13 = arith.constant 0 : index
      %16 = vector.load %arg8[%c0_12, %c0_13] : memref<64x128xf32, #tpu.memory_space<vmem>>, vector<64x128xf32>
      tpu.vector_store %arg8[%c0_12, %c0_13], %15 {strides = array<i32>} : memref<64x128xf32, #tpu.memory_space<vmem>>, vector<64x128xf32>,
    } else {
    }
    %c0 = arith.constant 0 : index
    %c0_1 = arith.constant 0 : index
    %3 = vector.load %arg8[%c0, %c0_1] : memref<64x128xf32, #tpu.memory_space<vmem>>, vector<64x128xf32>
    %c0_2 = arith.constant 0 : index
    %c0_3 = arith.constant 0 : index
    %4 = vector.load %arg3[%c0_2, %c0_3] : memref<64x864xf32, #tpu.memory_space<vmem>>, vector<64x864xf32>
    %c0_4 = arith.constant 0 : index
    %c0_5 = arith.constant 0 : index
    %5 = vector.load %arg2[%c0_4, %c0_5] : memref<864x128xbf16, #tpu.memory_space<vmem>>, vector<864x128xbf16>
    %6 = arith.extf %5 : vector<864x128xbf16> to vector<864x128xf32>
    %cst = arith.constant dense<0.000000e+00> : vector<64x128xf32>
    %7 = tpu.matmul %4, %6, %cst {dimension_numbers = #tpu.dot_dimension_numbers<[1], [0], [0], [1], [0, 0, 1, 1], [], []>} : vector<64x864xf32>, vector<864x128xf32>, vector<64x128xf32> -> vector<64x128xf32>
    %8 = arith.addf %3, %7 : vector<64x128xf32>
    %c0_6 = arith.constant 0 : index
    %c0_7 = arith.constant 0 : index
    %9 = vector.load %arg8[%c0_6, %c0_7] : memref<64x128xf32, #tpu.memory_space<vmem>>, vector<64x128xf32>
    tpu.vector_store %arg8[%c0_6, %c0_7], %8 {strides = array<i32>} : memref<64x128xf32, #tpu.memory_space<vmem>>, vector<64x128xf32>,
    %c0_i32_8 = arith.constant 0 : i32
    %10 = arith.cmpi eq, %arg1, %c0_i32_8 : i32
    %11 = arith.extui %10 : i1 to i32
    %c0_i32_9 = arith.constant 0 : i32
    %12 = arith.cmpi ne, %11, %c0_i32_9 : i32
    scf.if %12 {
      %c0_10 = arith.constant 0 : index
      %c0_11 = arith.constant 0 : index
      %13 = vector.load %arg8[%c0_10, %c0_11] : memref<64x128xf32, #tpu.memory_space<vmem>>, vector<64x128xf32>
      %cst_12 = arith.constant 0.000000e+00 : f32
      %14 = vector.broadcast %cst_12 : f32 to vector<64x128xf32>
      %15 = arith.cmpf oge, %13, %14 : vector<64x128xf32>
      %cst_13 = arith.constant 2.000000e-02 : f32
      %16 = vector.broadcast %cst_13 : f32 to vector<64x128xf32>
      %17 = arith.mulf %16, %13 : vector<64x128xf32>
      %18 = arith.select %15, %13, %17 : vector<64x128xi1>, vector<64x128xf32>
      %c0_14 = arith.constant 0 : index
      %c0_15 = arith.constant 0 : index
      %19 = vector.load %arg5[%c0_14, %c0_15] : memref<8x64xf32, #tpu.memory_space<vmem>>, vector<8x64xf32>
      %cst_16 = arith.constant dense<0.000000e+00> : vector<8x128xf32>
      %20 = tpu.matmul %19, %18, %cst_16 {dimension_numbers = #tpu.dot_dimension_numbers<[1], [0], [0], [1], [0, 0, 1, 1], [], []>} : vector<8x64xf32>, vector<64x128xf32>, vector<8x128xf32> -> vector<8x128xf32>
      %c0_17 = arith.constant 0 : index
      %c0_18 = arith.constant 0 : index
      %21 = vector.load %arg6[%c0_17, %c0_18] : memref<8x1xf32, #tpu.memory_space<vmem>>, vector<8x1xf32>
      %22 = vector.broadcast %21 : vector<8x1xf32> to vector<8x128xf32>
      %23 = arith.addf %20, %22 : vector<8x128xf32>
      %24 = math.absf %23 : vector<8x128xf32>
      %cst_19 = arith.constant 0.000000e+00 : f32
      %25 = vector.broadcast %cst_19 : f32 to vector<8x128xf32>
      %26 = arith.subf %25, %24 : vector<8x128xf32>
      %27 = math.exp %26 : vector<8x128xf32>
      %cst_20 = arith.constant 1.000000e+00 : f32
      %28 = vector.broadcast %cst_20 : f32 to vector<8x128xf32>
      %29 = arith.addf %28, %27 : vector<8x128xf32>
      %cst_21 = arith.constant 1.000000e+00 : f32
      %30 = vector.broadcast %cst_21 : f32 to vector<8x128xf32>
      %31 = arith.divf %30, %29 : vector<8x128xf32>
      %cst_22 = arith.constant 0.000000e+00 : f32
      %32 = vector.broadcast %cst_22 : f32 to vector<8x128xf32>
      %33 = arith.cmpf oge, %23, %32 : vector<8x128xf32>
      %34 = arith.mulf %27, %31 : vector<8x128xf32>
      %35 = arith.select %33, %31, %34 : vector<8x128xi1>, vector<8x128xf32>
      %c0_23 = arith.constant 0 : index
      %c0_24 = arith.constant 0 : index
      %36 = vector.load %arg7[%c0_23, %c0_24] : memref<8x128xf32, #tpu.memory_space<vmem>>, vector<8x128xf32>
      tpu.vector_store %arg7[%c0_23, %c0_24], %35 {strides = array<i32>} : memref<8x128xf32, #tpu.memory_space<vmem>>, vector<8x128xf32>,
    } else {
    }
    return
  }
  func.func @transform_0(%arg0: i32, %arg1: i32) -> (i32, i32) {
    %c0_i32 = arith.constant 0 : i32
    return %arg1, %arg0 : i32, i32
  }
  func.func @transform_1(%arg0: i32, %arg1: i32) -> (i32, i32) {
    %c0_i32 = arith.constant 0 : i32
    %c0_i32_0 = arith.constant 0 : i32
    return %c0_i32, %arg1 : i32, i32
  }
  func.func @transform_2(%arg0: i32, %arg1: i32) -> (i32, i32) {
    %c0_i32 = arith.constant 0 : i32
    %c0_i32_0 = arith.constant 0 : i32
    %c0_i32_1 = arith.constant 0 : i32
    return %c0_i32, %c0_i32_0 : i32, i32
  }
  func.func @transform_3(%arg0: i32, %arg1: i32) -> (i32, i32) {
    %c0_i32 = arith.constant 0 : i32
    %c0_i32_0 = arith.constant 0 : i32
    %c0_i32_1 = arith.constant 0 : i32
    return %c0_i32, %c0_i32_0 : i32, i32
  }
  func.func @transform_4(%arg0: i32, %arg1: i32) -> (i32, i32) {
    %c0_i32 = arith.constant 0 : i32
    %c0_i32_0 = arith.constant 0 : i32
    %c0_i32_1 = arith.constant 0 : i32
    return %c0_i32, %c0_i32_0 : i32, i32
  }
  func.func @transform_5(%arg0: i32, %arg1: i32) -> (i32, i32) {
    %c0_i32 = arith.constant 0 : i32
    %c0_i32_0 = arith.constant 0 : i32
    return %c0_i32, %arg0 : i32, i32
  }
}

</mosaic_0001>

<bundles_post_ra>
// kernel: discriminator_forward.5
= control target key start
LH: loop header
LB: loop body
LE: loop exit
PB: predicated region body
PF: predicated region fallthrough
CT: control target
= control target key end

     0   :  { %s1251_s12 = smov 0   ;;  %s1253_s13 = smov 0   ;;  %s1582_s0 = inlined_call_operand.vmem [shape: bf16[64,8192], index: 0, kind: input, shape index: {}]   ;;  %s1583_s1 = inlined_call_operand.vmem [shape: f32[8,64], index: 1, kind: input, shape index: {}]   ;;  %s1584_s2 = inlined_call_operand.vmem [shape: f32[8,1], index: 2, kind: input, shape index: {}]   ;;  %s1585_s3 = inlined_call_operand.vmem [shape: bf16[8,8192], index: 3, kind: output, shape index: {}]  }
   0x1   :  { %s1255_s14 = smov 0   ;;  %s1257_s15 = smov 0  }
   0x2   :  { %s1259_s16 = smov 0  }
   0x3 LB: > { %s25_s17 = sadd.s32 1, %s1224_s15  ;;  %p41_p1 = scmp.ne.s32.totalorder %s1216_s13, %s1212_s12  ;;  %s1228_s16 = sphi %s1259_s16, %s13_s16   ;;  %s1224_s15 = sphi %s1257_s15, %s1589_s15   ;;  %s1220_s14 = sphi %s1255_s14, %s1588_s14   ;;  %s1216_s13 = sphi %s1253_s13, %s1587_s13   ;;  %s1212_s12 = sphi %s1251_s12, %s1586_s12  }
   0x4   : > { %p27_p0 = scmp.ge.s32.totalorder %s25_s17, 4  ;;  %p42_p2 = scmp.eq.s32.totalorder %s1228_s16, 0 }
   0x5   : > { %s34_s19 = sadd.s32 1, %s1216_s13  ;;  %p1121_p5 = scmp.ge.s32.totalorder %s1228_s16, 4 }
   0x6   : > { %s1591_s17 = smov (%p27_p0, %s25_s17), 0  ;;  %p43_p3 = por %p42_p2, %p41_p1 }
   0x7   : > { %s30_s18 = ssub.s32 %s1224_s15, %s1591_s17  ;;  %150 = sbr.rel (%p1121_p5) target bundleno = 80 (0x50), region = 24 }
   0x8   : > { %p32_p4 = scmp.eq.s32.totalorder %s30_s18, 0 }
   0xa   : > { %s1286_s20 = scalar_select %p32_p4, %s1216_s13, %s34_s19  }
   0xc   : > { %153 = sbr.rel (!%p43_p3) target bundleno = 80 (0x50), region = 28  ;;  %s155_s21 = sand.u32 (%p43_p3), 1, %s1216_s13  }
   0xd   : > { %s1147_s22 = sshll.u32 (%p43_p3), %s1224_s15, 6  ;;  %s1122_s23 = sshll.u32 (%p43_p3), %s155_s21, 9 }
   0xe   : > { %s1294_s26 = scalar_lea.vmem (%p43_p3), %s1582_s0, %s1147_s22  ;;  %s1299_s27 = scalar_lea.vmem (%p43_p3), [#allocation3], %s1122_s23 }
   0xf   : > { %v176_v0 = vld [vmem:[%s1294_s26] sm:$0xff] (%p43_p3)  ;;  %v178_v1 = vld [vmem:[%s1294_s26 + $0x8] sm:$0xff] (%p43_p3)  ;;  %v180_v2 = vld [vmem:[%s1294_s26 + $0x10] sm:$0xff] (%p43_p3) }
  0x10   : > { %177 = vst [vmem:[%s1299_s27] sm:$0xff] (%p43_p3), %v176_v0  ;;  %v182_v3 = vld [vmem:[%s1294_s26 + $0x18] sm:$0xff] (%p43_p3)  ;;  %v184_v4 = vld [vmem:[%s1294_s26 + $0x20] sm:$0xff] (%p43_p3)  ;;  %v186_v5 = vld [vmem:[%s1294_s26 + $0x28] sm:$0xff] (%p43_p3) }
  0x11   : > { %179 = vst [vmem:[%s1299_s27 + $0x8] sm:$0xff] %v178_v1  ;;  %v188_v6 = vld [vmem:[%s1294_s26 + $0x30] sm:$0xff]  ;;  %v190_v7 = vld [vmem:[%s1294_s26 + $0x38] sm:$0xff]  ;;  %v192_v8 = vld [vmem:[%s1294_s26 + $0x100] sm:$0xff] }
  0x12   : > { %181 = vst [vmem:[%s1299_s27 + $0x10] sm:$0xff] %v180_v2  ;;  %v194_v9 = vld [vmem:[%s1294_s26 + $0x108] sm:$0xff]  ;;  %v196_v10 = vld [vmem:[%s1294_s26 + $0x110] sm:$0xff]  ;;  %v198_v11 = vld [vmem:[%s1294_s26 + $0x118] sm:$0xff] }
  0x13   : > { %183 = vst [vmem:[%s1299_s27 + $0x18] sm:$0xff] %v182_v3  ;;  %v200_v12 = vld [vmem:[%s1294_s26 + $0x120] sm:$0xff]  ;;  %v202_v13 = vld [vmem:[%s1294_s26 + $0x128] sm:$0xff]  ;;  %v204_v14 = vld [vmem:[%s1294_s26 + $0x130] sm:$0xff] }
  0x14   : > { %185 = vst [vmem:[%s1299_s27 + $0x20] sm:$0xff] %v184_v4  ;;  %v206_v15 = vld [vmem:[%s1294_s26 + $0x138] sm:$0xff]  ;;  %v208_v16 = vld [vmem:[%s1294_s26 + $0x200] sm:$0xff]  ;;  %v210_v17 = vld [vmem:[%s1294_s26 + $0x208] sm:$0xff] }
  0x15   : > { %187 = vst [vmem:[%s1299_s27 + $0x28] sm:$0xff] %v186_v5  ;;  %v212_v18 = vld [vmem:[%s1294_s26 + $0x210] sm:$0xff]  ;;  %v214_v19 = vld [vmem:[%s1294_s26 + $0x218] sm:$0xff]  ;;  %v216_v20 = vld [vmem:[%s1294_s26 + $0x220] sm:$0xff] }
  0x16   : > { %189 = vst [vmem:[%s1299_s27 + $0x30] sm:$0xff] %v188_v6  ;;  %v218_v21 = vld [vmem:[%s1294_s26 + $0x228] sm:$0xff]  ;;  %v220_v22 = vld [vmem:[%s1294_s26 + $0x230] sm:$0xff]  ;;  %v222_v23 = vld [vmem:[%s1294_s26 + $0x238] sm:$0xff] }
  0x17   : > { %191 = vst [vmem:[%s1299_s27 + $0x38] sm:$0xff] %v190_v7  ;;  %v224_v24 = vld [vmem:[%s1294_s26 + $0x300] sm:$0xff]  ;;  %v226_v25 = vld [vmem:[%s1294_s26 + $0x308] sm:$0xff]  ;;  %v228_v26 = vld [vmem:[%s1294_s26 + $0x310] sm:$0xff] }
  0x18   : > { %193 = vst [vmem:[%s1299_s27 + $0x40] sm:$0xff] %v192_v8  ;;  %v230_v27 = vld [vmem:[%s1294_s26 + $0x318] sm:$0xff]  ;;  %v232_v28 = vld [vmem:[%s1294_s26 + $0x320] sm:$0xff]  ;;  %v234_v29 = vld [vmem:[%s1294_s26 + $0x328] sm:$0xff] }
  0x19   : > { %195 = vst [vmem:[%s1299_s27 + $0x48] sm:$0xff] %v194_v9  ;;  %v236_v30 = vld [vmem:[%s1294_s26 + $0x330] sm:$0xff]  ;;  %v238_v31 = vld [vmem:[%s1294_s26 + $0x338] sm:$0xff]  ;;  %v240_v32 = vld [vmem:[%s1294_s26 + $0x400] sm:$0xff] }
  0x1a   : > { %197 = vst [vmem:[%s1299_s27 + $0x50] sm:$0xff] %v196_v10  ;;  %v242_v33 = vld [vmem:[%s1294_s26 + $0x408] sm:$0xff]  ;;  %v244_v34 = vld [vmem:[%s1294_s26 + $0x410] sm:$0xff]  ;;  %v246_v35 = vld [vmem:[%s1294_s26 + $0x418] sm:$0xff] }
  0x1b   : > { %199 = vst [vmem:[%s1299_s27 + $0x58] sm:$0xff] %v198_v11  ;;  %v248_v36 = vld [vmem:[%s1294_s26 + $0x420] sm:$0xff]  ;;  %v250_v37 = vld [vmem:[%s1294_s26 + $0x428] sm:$0xff]  ;;  %v252_v38 = vld [vmem:[%s1294_s26 + $0x430] sm:$0xff] }
  0x1c   : > { %201 = vst [vmem:[%s1299_s27 + $0x60] sm:$0xff] %v200_v12  ;;  %v254_v39 = vld [vmem:[%s1294_s26 + $0x438] sm:$0xff]  ;;  %v256_v40 = vld [vmem:[%s1294_s26 + $0x500] sm:$0xff]  ;;  %v258_v41 = vld [vmem:[%s1294_s26 + $0x508] sm:$0xff] }
  0x1d   : > { %203 = vst [vmem:[%s1299_s27 + $0x68] sm:$0xff] %v202_v13  ;;  %v260_v42 = vld [vmem:[%s1294_s26 + $0x510] sm:$0xff]  ;;  %v262_v43 = vld [vmem:[%s1294_s26 + $0x518] sm:$0xff]  ;;  %v264_v44 = vld [vmem:[%s1294_s26 + $0x520] sm:$0xff] }
  0x1e   : > { %205 = vst [vmem:[%s1299_s27 + $0x70] sm:$0xff] %v204_v14  ;;  %v266_v45 = vld [vmem:[%s1294_s26 + $0x528] sm:$0xff]  ;;  %v268_v46 = vld [vmem:[%s1294_s26 + $0x530] sm:$0xff]  ;;  %v270_v47 = vld [vmem:[%s1294_s26 + $0x538] sm:$0xff] }
  0x1f   : > { %207 = vst [vmem:[%s1299_s27 + $0x78] sm:$0xff] %v206_v15  ;;  %v272_v48 = vld [vmem:[%s1294_s26 + $0x600] sm:$0xff]  ;;  %v274_v49 = vld [vmem:[%s1294_s26 + $0x608] sm:$0xff]  ;;  %v276_v50 = vld [vmem:[%s1294_s26 + $0x610] sm:$0xff] }
  0x20   : > { %209 = vst [vmem:[%s1299_s27 + $0x80] sm:$0xff] %v208_v16  ;;  %v278_v51 = vld [vmem:[%s1294_s26 + $0x618] sm:$0xff]  ;;  %v280_v52 = vld [vmem:[%s1294_s26 + $0x620] sm:$0xff]  ;;  %v282_v53 = vld [vmem:[%s1294_s26 + $0x628] sm:$0xff] }
  0x21   : > { %211 = vst [vmem:[%s1299_s27 + $0x88] sm:$0xff] %v210_v17  ;;  %v284_v54 = vld [vmem:[%s1294_s26 + $0x630] sm:$0xff]  ;;  %v286_v55 = vld [vmem:[%s1294_s26 + $0x638] sm:$0xff]  ;;  %v288_v56 = vld [vmem:[%s1294_s26 + $0x700] sm:$0xff] }
  0x22   : > { %213 = vst [vmem:[%s1299_s27 + $0x90] sm:$0xff] %v212_v18  ;;  %v290_v57 = vld [vmem:[%s1294_s26 + $0x708] sm:$0xff]  ;;  %v292_v58 = vld [vmem:[%s1294_s26 + $0x710] sm:$0xff]  ;;  %v294_v59 = vld [vmem:[%s1294_s26 + $0x718] sm:$0xff] }
  0x23   : > { %215 = vst [vmem:[%s1299_s27 + $0x98] sm:$0xff] %v214_v19  ;;  %v296_v60 = vld [vmem:[%s1294_s26 + $0x720] sm:$0xff]  ;;  %v298_v61 = vld [vmem:[%s1294_s26 + $0x728] sm:$0xff]  ;;  %v300_v62 = vld [vmem:[%s1294_s26 + $0x730] sm:$0xff] }
  0x24   : > { %217 = vst [vmem:[%s1299_s27 + $0xa0] sm:$0xff] %v216_v20  ;;  %v302_v63 = vld [vmem:[%s1294_s26 + $0x738] sm:$0xff] }
  0x25   : > { %219 = vst [vmem:[%s1299_s27 + $0xa8] sm:$0xff] %v218_v21 }
  0x26   : > { %221 = vst [vmem:[%s1299_s27 + $0xb0] sm:$0xff] %v220_v22 }
  0x27   : > { %223 = vst [vmem:[%s1299_s27 + $0xb8] sm:$0xff] %v222_v23 }
  0x28   : > { %225 = vst [vmem:[%s1299_s27 + $0xc0] sm:$0xff] %v224_v24 }
  0x29   : > { %227 = vst [vmem:[%s1299_s27 + $0xc8] sm:$0xff] %v226_v25 }
  0x2a   : > { %229 = vst [vmem:[%s1299_s27 + $0xd0] sm:$0xff] %v228_v26 }
  0x2b   : > { %231 = vst [vmem:[%s1299_s27 + $0xd8] sm:$0xff] %v230_v27 }
  0x2c   : > { %233 = vst [vmem:[%s1299_s27 + $0xe0] sm:$0xff] %v232_v28 }
  0x2d   : > { %235 = vst [vmem:[%s1299_s27 + $0xe8] sm:$0xff] %v234_v29 }
  0x2e   : > { %237 = vst [vmem:[%s1299_s27 + $0xf0] sm:$0xff] %v236_v30 }
  0x2f   : > { %239 = vst [vmem:[%s1299_s27 + $0xf8] sm:$0xff] %v238_v31 }
  0x30   : > { %241 = vst [vmem:[%s1299_s27 + $0x100] sm:$0xff] %v240_v32 }
  0x31   : > { %243 = vst [vmem:[%s1299_s27 + $0x108] sm:$0xff] %v242_v33 }
  0x32   : > { %245 = vst [vmem:[%s1299_s27 + $0x110] sm:$0xff] %v244_v34 }
  0x33   : > { %247 = vst [vmem:[%s1299_s27 + $0x118] sm:$0xff] %v246_v35 }
  0x34   : > { %249 = vst [vmem:[%s1299_s27 + $0x120] sm:$0xff] %v248_v36 }
  0x35   : > { %251 = vst [vmem:[%s1299_s27 + $0x128] sm:$0xff] %v250_v37 }
  0x36   : > { %253 = vst [vmem:[%s1299_s27 + $0x130] sm:$0xff] %v252_v38 }
  0x37   : > { %255 = vst [vmem:[%s1299_s27 + $0x138] sm:$0xff] %v254_v39 }
  0x38   : > { %257 = vst [vmem:[%s1299_s27 + $0x140] sm:$0xff] %v256_v40 }
  0x39   : > { %259 = vst [vmem:[%s1299_s27 + $0x148] sm:$0xff] %v258_v41 }
  0x3a   : > { %261 = vst [vmem:[%s1299_s27 + $0x150] sm:$0xff] %v260_v42 }
  0x3b   : > { %263 = vst [vmem:[%s1299_s27 + $0x158] sm:$0xff] %v262_v43 }
  0x3c   : > { %265 = vst [vmem:[%s1299_s27 + $0x160] sm:$0xff] %v264_v44 }
  0x3d   : > { %267 = vst [vmem:[%s1299_s27 + $0x168] sm:$0xff] %v266_v45 }
  0x3e   : > { %269 = vst [vmem:[%s1299_s27 + $0x170] sm:$0xff] %v268_v46 }
  0x3f   : > { %271 = vst [vmem:[%s1299_s27 + $0x178] sm:$0xff] %v270_v47 }
  0x40   : > { %273 = vst [vmem:[%s1299_s27 + $0x180] sm:$0xff] %v272_v48 }
  0x41   : > { %275 = vst [vmem:[%s1299_s27 + $0x188] sm:$0xff] %v274_v49 }
  0x42   : > { %277 = vst [vmem:[%s1299_s27 + $0x190] sm:$0xff] %v276_v50 }
  0x43   : > { %279 = vst [vmem:[%s1299_s27 + $0x198] sm:$0xff] %v278_v51 }
  0x44   : > { %281 = vst [vmem:[%s1299_s27 + $0x1a0] sm:$0xff] %v280_v52 }
  0x45   : > { %283 = vst [vmem:[%s1299_s27 + $0x1a8] sm:$0xff] %v282_v53 }
  0x46   : > { %285 = vst [vmem:[%s1299_s27 + $0x1b0] sm:$0xff] %v284_v54 }
  0x47   : > { %287 = vst [vmem:[%s1299_s27 + $0x1b8] sm:$0xff] %v286_v55 }
  0x48   : > { %289 = vst [vmem:[%s1299_s27 + $0x1c0] sm:$0xff] %v288_v56 }
  0x49   : > { %291 = vst [vmem:[%s1299_s27 + $0x1c8] sm:$0xff] %v290_v57 }
  0x4a   : > { %293 = vst [vmem:[%s1299_s27 + $0x1d0] sm:$0xff] %v292_v58 }
  0x4b   : > { %295 = vst [vmem:[%s1299_s27 + $0x1d8] sm:$0xff] %v294_v59 }
  0x4c   : > { %297 = vst [vmem:[%s1299_s27 + $0x1e0] sm:$0xff] %v296_v60 }
  0x4d   : > { %299 = vst [vmem:[%s1299_s27 + $0x1e8] sm:$0xff] %v298_v61 }
  0x4e   : > { %301 = vst [vmem:[%s1299_s27 + $0x1f0] sm:$0xff] %v300_v62 }
  0x4f   : > { %303 = vst [vmem:[%s1299_s27 + $0x1f8] sm:$0xff] %v302_v63 }
  0x50 PF: > { %p1125_p6 = scmp.ge.s32.totalorder %s1228_s16, 1  ;;  %p308_p7 = scmp.lt.s32.totalorder %s1228_s16, 5 }
  0x52   : > { %p309_p8 = pnand %p1125_p6, %p308_p7 }
  0x53   : > { %s315_s28 = sand.u32 (!%p309_p8), 1, %s1212_s12   ;;  %s1127_s8 = sshll.u32 (!%p309_p8), %s1220_s14, 4 }
  0x54   : > { %312 = sbr.rel (%p309_p8) target bundleno = 303 (0x12f), region = 51  ;;  %s1126_s29 = sshll.u32 (!%p309_p8), %s315_s28, 9 }
  0x55   : > { %s1429_s30 = scalar_lea.vmem (!%p309_p8), [#allocation3], %s1126_s29  ;;  %p349_p9 = scmp.lt.s32.totalorder (!%p309_p8), %s1127_s8, 63 }
  0x59   : > { %v454_v0 = vld [vmem:[%s1429_s30 + $0x1c8] sm:$0xff]  ;;  %v453_v2 = vld [vmem:[%s1429_s30 + $0x1c0] sm:$0xff]  ;;  %v456_v41 = vld [vmem:[%s1429_s30 + $0x1d8] sm:$0xff]  ;;  %vm589_vm0 = vcmask 523264   ;;  %s1593_s8 = smov (!%p349_p9, %s1127_s8), 63 }
  0x5a   : > { %v446_v1 = vld [vmem:[%s1429_s30 + $0x188] sm:$0xff]  ;;  %v575_v3 = vunpack.c.l.bf16 %v454_v0  ;;  %v576_v4 = vunpack.c.h.bf16 %v454_v0  ;;  %v445_v8 = vld [vmem:[%s1429_s30 + $0x180] sm:$0xff]  ;;  %v573_v9 = vunpack.c.l.bf16 %v453_v2  ;;  %v574_v10 = vunpack.c.h.bf16 %v453_v2  ;;  %v448_v47 = vld [vmem:[%s1429_s30 + $0x198] sm:$0xff]  ;;  %s1128_s9 = sshll.u32 %s1593_s8, 2 }
  0x5b   : > { %v559_v5 = vunpack.c.l.bf16 %v446_v1  ;;  %v560_v6 = vunpack.c.h.bf16 %v446_v1  ;;  %v438_v7 = vld [vmem:[%s1429_s30 + $0x148] sm:$0xff]  ;;  %v437_v12 = vld [vmem:[%s1429_s30 + $0x140] sm:$0xff]  ;;  %v557_v15 = vunpack.c.l.bf16 %v445_v8  ;;  %v558_v16 = vunpack.c.h.bf16 %v445_v8  ;;  %v455_v50 = vld [vmem:[%s1429_s30 + $0x1d0] sm:$0xff]  ;;  %s1545_s12 = scalar_lea.vmem %s1585_s3, %s1128_s9 }
  0x5c   : > { %v430_v11 = vld [vmem:[%s1429_s30 + $0x108] sm:$0xff]  ;;  %641 = vmatpush.msra.mxu2 %v575_v3  ;;  %661 = vmatpush.msra.mxu3 %v576_v4  ;;  %v543_v13 = vunpack.c.l.bf16 %v438_v7  ;;  %v544_v14 = vunpack.c.h.bf16 %v438_v7  ;;  %v429_v17 = vld [vmem:[%s1429_s30 + $0x100] sm:$0xff]  ;;  %v541_v18 = vunpack.c.l.bf16 %v437_v12  ;;  %v542_v19 = vunpack.c.h.bf16 %v437_v12  ;;  %v440_v53 = vld [vmem:[%s1429_s30 + $0x158] sm:$0xff] }
  0x5d   : > { %601 = vmatpush.msra.mxu0 %v573_v9  ;;  %621 = vmatpush.msra.mxu1 %v574_v10  ;;  %v422_v20 = vld [vmem:[%s1429_s30 + $0xc8] sm:$0xff]  ;;  %v527_v21 = vunpack.c.l.bf16 %v430_v11  ;;  %v528_v22 = vunpack.c.h.bf16 %v430_v11  ;;  %v421_v23 = vld [vmem:[%s1429_s30 + $0xc0] sm:$0xff]  ;;  %v525_v24 = vunpack.c.l.bf16 %v429_v17  ;;  %v526_v25 = vunpack.c.h.bf16 %v429_v17  ;;  %v447_v56 = vld [vmem:[%s1429_s30 + $0x190] sm:$0xff] }
  0x5e   : > { %642 = vmatpush.msra.mxu2 %v559_v5  ;;  %662 = vmatpush.msra.mxu3 %v560_v6  ;;  %v414_v26 = vld [vmem:[%s1429_s30 + $0x88] sm:$0xff]  ;;  %v511_v27 = vunpack.c.l.bf16 %v422_v20  ;;  %v512_v28 = vunpack.c.h.bf16 %v422_v20  ;;  %v413_v29 = vld [vmem:[%s1429_s30 + $0x80] sm:$0xff]  ;;  %v509_v30 = vunpack.c.l.bf16 %v421_v23  ;;  %v510_v31 = vunpack.c.h.bf16 %v421_v23  ;;  %v432_v59 = vld [vmem:[%s1429_s30 + $0x118] sm:$0xff] }
  0x5f   : > { %602 = vmatpush.msra.mxu0 %v557_v15  ;;  %622 = vmatpush.msra.mxu1 %v558_v16  ;;  %v406_v32 = vld [vmem:[%s1429_s30 + $0x48] sm:$0xff]  ;;  %v495_v33 = vunpack.c.l.bf16 %v414_v26  ;;  %v496_v34 = vunpack.c.h.bf16 %v414_v26  ;;  %v405_v35 = vld [vmem:[%s1429_s30 + $0x40] sm:$0xff]  ;;  %v493_v36 = vunpack.c.l.bf16 %v413_v29  ;;  %v494_v37 = vunpack.c.h.bf16 %v413_v29  ;;  %v439_v62 = vld [vmem:[%s1429_s30 + $0x150] sm:$0xff] }
  0x60   : > { %643 = vmatpush.msra.mxu2 %v543_v13  ;;  %663 = vmatpush.msra.mxu3 %v544_v14  ;;  %v398_v38 = vld [vmem:[%s1429_s30 + $0x8] sm:$0xff]  ;;  %v479_v39 = vunpack.c.l.bf16 %v406_v32  ;;  %v480_v40 = vunpack.c.h.bf16 %v406_v32  ;;  %v477_v42 = vunpack.c.l.bf16 %v405_v35  ;;  %v478_v43 = vunpack.c.h.bf16 %v405_v35  ;;  %v397_v44 = vld [vmem:[%s1429_s30] sm:$0xff]  ;;  %v424_v1 = vld [vmem:[%s1429_s30 + $0xd8] sm:$0xff] }
  0x61   : > { %603 = vmatpush.msra.mxu0 %v541_v18  ;;  %623 = vmatpush.msra.mxu1 %v542_v19  ;;  %v463_v45 = vunpack.c.l.bf16 %v398_v38  ;;  %v464_v46 = vunpack.c.h.bf16 %v398_v38  ;;  %v579_v48 = vunpack.c.l.bf16 %v456_v41  ;;  %v580_v49 = vunpack.c.h.bf16 %v456_v41  ;;  %v431_v4 = vld [vmem:[%s1429_s30 + $0x110] sm:$0xff]  ;;  %v416_v7 = vld [vmem:[%s1429_s30 + $0x98] sm:$0xff]  ;;  %v1465_v23 = vld [vmem:[%s1583_s1] sm:$0xff] }
  0x62   : > { %644 = vmatpush.msra.mxu2 %v527_v21  ;;  %664 = vmatpush.msra.mxu3 %v528_v22  ;;  %v461_v51 = vunpack.c.l.bf16 %v397_v44  ;;  %v462_v52 = vunpack.c.h.bf16 %v397_v44  ;;  %v563_v54 = vunpack.c.l.bf16 %v448_v47  ;;  %v564_v55 = vunpack.c.h.bf16 %v448_v47  ;;  %v423_v10 = vld [vmem:[%s1429_s30 + $0xd0] sm:$0xff]  ;;  %v408_v13 = vld [vmem:[%s1429_s30 + $0x58] sm:$0xff]  ;;  %v458_v22 = vld [vmem:[%s1429_s30 + $0x1e8] sm:$0xff] }
  0x63   : > { %604 = vmatpush.msra.mxu0 %v525_v24  ;;  %624 = vmatpush.msra.mxu1 %v526_v25  ;;  %v577_v57 = vunpack.c.l.bf16 %v455_v50  ;;  %v578_v58 = vunpack.c.h.bf16 %v455_v50  ;;  %v547_v60 = vunpack.c.l.bf16 %v440_v53  ;;  %v548_v61 = vunpack.c.h.bf16 %v440_v53  ;;  %v415_v18 = vld [vmem:[%s1429_s30 + $0x90] sm:$0xff]  ;;  %v400_v21 = vld [vmem:[%s1429_s30 + $0x18] sm:$0xff]  ;;  %v450_v29 = vld [vmem:[%s1429_s30 + $0x1a8] sm:$0xff] }
  0x64   : > { %645 = vmatpush.msra.mxu2 %v511_v27  ;;  %665 = vmatpush.msra.mxu3 %v512_v28  ;;  %v561_v63 = vunpack.c.l.bf16 %v447_v56  ;;  %v562_v0 = vunpack.c.h.bf16 %v447_v56  ;;  %v531_v2 = vunpack.c.l.bf16 %v432_v59  ;;  %v532_v3 = vunpack.c.h.bf16 %v432_v59  ;;  %v407_v26 = vld [vmem:[%s1429_s30 + $0x50] sm:$0xff]  ;;  %v449_v41 = vld [vmem:[%s1429_s30 + $0x1a0] sm:$0xff]  ;;  %v434_v44 = vld [vmem:[%s1429_s30 + $0x128] sm:$0xff] }
  0x65   : > { %605 = vmatpush.msra.mxu0 %v509_v30  ;;  %625 = vmatpush.msra.mxu1 %v510_v31  ;;  %v545_v5 = vunpack.c.l.bf16 %v439_v62  ;;  %v546_v6 = vunpack.c.h.bf16 %v439_v62  ;;  %v515_v8 = vunpack.c.l.bf16 %v424_v1  ;;  %v516_v9 = vunpack.c.h.bf16 %v424_v1  ;;  %v399_v32 = vld [vmem:[%s1429_s30 + $0x10] sm:$0xff]  ;;  %v441_v47 = vld [vmem:[%s1429_s30 + $0x160] sm:$0xff]  ;;  %v426_v50 = vld [vmem:[%s1429_s30 + $0xe8] sm:$0xff] }
  0x66   : > { %646 = vmatpush.msra.mxu2 %v495_v33  ;;  %666 = vmatpush.msra.mxu3 %v496_v34  ;;  %v529_v11 = vunpack.c.l.bf16 %v431_v4  ;;  %v530_v12 = vunpack.c.h.bf16 %v431_v4  ;;  %v499_v14 = vunpack.c.l.bf16 %v416_v7  ;;  %v500_v15 = vunpack.c.h.bf16 %v416_v7  ;;  %v433_v53 = vld [vmem:[%s1429_s30 + $0x120] sm:$0xff]  ;;  %v418_v56 = vld [vmem:[%s1429_s30 + $0xa8] sm:$0xff] }
  0x67   : > { %606 = vmatpush.msra.mxu0 %v493_v36  ;;  %626 = vmatpush.msra.mxu1 %v494_v37  ;;  %v513_v16 = vunpack.c.l.bf16 %v423_v10  ;;  %v514_v17 = vunpack.c.h.bf16 %v423_v10  ;;  %v483_v19 = vunpack.c.l.bf16 %v408_v13  ;;  %v484_v20 = vunpack.c.h.bf16 %v408_v13  ;;  %v457_v37 = vld [vmem:[%s1429_s30 + $0x1e0] sm:$0xff]  ;;  %v402_v4 = vld [vmem:[%s1429_s30 + $0x28] sm:$0xff]  ;;  %v452_v13 = vld [vmem:[%s1429_s30 + $0x1b8] sm:$0xff] }
  0x68   : > { %647 = vmatpush.msra.mxu2 %v479_v39  ;;  %667 = vmatpush.msra.mxu3 %v480_v40  ;;  %v497_v24 = vunpack.c.l.bf16 %v415_v18  ;;  %v498_v25 = vunpack.c.h.bf16 %v415_v18  ;;  %v467_v27 = vunpack.c.l.bf16 %v400_v21  ;;  %v468_v28 = vunpack.c.h.bf16 %v400_v21  ;;  %v442_v40 = vld [vmem:[%s1429_s30 + $0x168] sm:$0xff]  ;;  %v417_v1 = vld [vmem:[%s1429_s30 + $0xa0] sm:$0xff] }
  0x69   : > { %607 = vmatpush.msra.mxu0 %v477_v42  ;;  %627 = vmatpush.msra.mxu1 %v478_v43  ;;  %v583_v30 = vunpack.c.l.bf16 %v458_v22  ;;  %v584_v31 = vunpack.c.h.bf16 %v458_v22  ;;  %v481_v33 = vunpack.c.l.bf16 %v407_v26  ;;  %v482_v34 = vunpack.c.h.bf16 %v407_v26 }
  0x6a   : > { %648 = vmatpush.msra.mxu2 %v463_v45  ;;  %668 = vmatpush.msra.mxu3 %v464_v46  ;;  %v567_v35 = vunpack.c.l.bf16 %v450_v29  ;;  %v568_v36 = vunpack.c.h.bf16 %v450_v29  ;;  %v465_v38 = vunpack.c.l.bf16 %v399_v32  ;;  %v466_v39 = vunpack.c.h.bf16 %v399_v32 }
  0x6b   : > { %608 = vmatpush.msra.mxu0 %v461_v51  ;;  %628 = vmatpush.msra.mxu1 %v462_v52  ;;  %v581_v42 = vunpack.c.l.bf16 %v457_v37  ;;  %v582_v43 = vunpack.c.h.bf16 %v457_v37  ;;  %v551_v45 = vunpack.c.l.bf16 %v442_v40  ;;  %v552_v46 = vunpack.c.h.bf16 %v442_v40  ;;  %v428_v37 = vld [vmem:[%s1429_s30 + $0xf8] sm:$0xff]  ;;  %v435_v40 = vld [vmem:[%s1429_s30 + $0x130] sm:$0xff] }
  0x6c   : > { %721 = vmatpush.msrb.mxu2 %v579_v48  ;;  %741 = vmatpush.msrb.mxu3 %v580_v49  ;;  %v565_v48 = vunpack.c.l.bf16 %v449_v41  ;;  %v566_v49 = vunpack.c.h.bf16 %v449_v41  ;;  %v535_v51 = vunpack.c.l.bf16 %v434_v44  ;;  %v536_v52 = vunpack.c.h.bf16 %v434_v44 }
  0x6d   : > { %681 = vmatpush.msrb.mxu0 %v577_v57  ;;  %701 = vmatpush.msrb.mxu1 %v578_v58  ;;  %v519_v57 = vunpack.c.l.bf16 %v426_v50  ;;  %v520_v58 = vunpack.c.h.bf16 %v426_v50  ;;  %v533_v59 = vunpack.c.l.bf16 %v433_v53  ;;  %v503_v62 = vunpack.c.l.bf16 %v418_v56 }
  0x6e   : > { %722 = vmatpush.msrb.mxu2 %v563_v54  ;;  %742 = vmatpush.msrb.mxu3 %v564_v55  ;;  %v549_v54 = vunpack.c.l.bf16 %v441_v47  ;;  %v550_v55 = vunpack.c.h.bf16 %v441_v47  ;;  %v501_v7 = vunpack.c.l.bf16 %v417_v1  ;;  %v471_v10 = vunpack.c.l.bf16 %v402_v4 }
  0x6f   : > { %682 = vmatpush.msrb.mxu0 %v561_v63  ;;  %702 = vmatpush.msrb.mxu1 %v562_v0  ;;  %v504_v63 = vunpack.c.h.bf16 %v418_v56  ;;  %v410_v0 = vld [vmem:[%s1429_s30 + $0x68] sm:$0xff]  ;;  %v571_v21 = vunpack.c.l.bf16 %v452_v13  ;;  %v572_v22 = vunpack.c.h.bf16 %v452_v13  ;;  %v523_v44 = vunpack.c.l.bf16 %v428_v37 }
  0x70   : > { %723 = vmatpush.msrb.mxu2 %v547_v60  ;;  %743 = vmatpush.msrb.mxu3 %v548_v61  ;;  %v534_v60 = vunpack.c.h.bf16 %v433_v53  ;;  %v425_v61 = vld [vmem:[%s1429_s30 + $0xe0] sm:$0xff]  ;;  %v538_v47 = vunpack.c.h.bf16 %v435_v40 }
  0x71   : > { %683 = vmatpush.msrb.mxu0 %v545_v5  ;;  %703 = vmatpush.msrb.mxu1 %v546_v6  ;;  %v487_v5 = vunpack.c.l.bf16 %v410_v0  ;;  %v488_v6 = vunpack.c.h.bf16 %v410_v0 }
  0x72   : > { %724 = vmatpush.msrb.mxu2 %v531_v2  ;;  %744 = vmatpush.msrb.mxu3 %v532_v3  ;;  %v517_v2 = vunpack.c.l.bf16 %v425_v61  ;;  %v518_v3 = vunpack.c.h.bf16 %v425_v61 }
  0x73   : > { %684 = vmatpush.msrb.mxu0 %v529_v11  ;;  %704 = vmatpush.msrb.mxu1 %v530_v12  ;;  %v409_v11 = vld [vmem:[%s1429_s30 + $0x60] sm:$0xff]  ;;  %v472_v12 = vunpack.c.h.bf16 %v402_v4 }
  0x74   : > { %725 = vmatpush.msrb.mxu2 %v515_v8  ;;  %745 = vmatpush.msrb.mxu3 %v516_v9  ;;  %v460_v8 = vld [vmem:[%s1429_s30 + $0x1f8] sm:$0xff]  ;;  %v502_v9 = vunpack.c.h.bf16 %v417_v1  ;;  %v485_v18 = vunpack.c.l.bf16 %v409_v11 }
  0x75   : > { %685 = vmatpush.msrb.mxu0 %v513_v16  ;;  %705 = vmatpush.msrb.mxu1 %v514_v17  ;;  %v588_v16 = vunpack.c.h.bf16 %v460_v8  ;;  %v1230_v17 = vmov 0  }
  0x76   : > { %726 = vmatpush.msrb.mxu2 %v499_v14  ;;  %746 = vmatpush.msrb.mxu3 %v500_v15  ;;  %v358_v14 = vld [vmem:[%s1584_s2] sm:$0xff]  ;;  %v587_v15 = vunpack.c.l.bf16 %v460_v8 }
  0x77   : > { %1131 = vmatmul.msk.f32.vlgmr.msra.gmra.mxu2 %vm589_vm0, %v1465_v23  ;;  %1132 = vmatmul.msk.f32.vlgmr.msra.gmra.mxu3 %vm589_vm0, %v1465_v23 }
  0x78   : > { %727 = vmatpush.msrb.mxu2 %v483_v19  ;;  %747 = vmatpush.msrb.mxu3 %v484_v20  ;;  %v486_v19 = vunpack.c.h.bf16 %v409_v11  ;;  %v401_v20 = vld [vmem:[%s1429_s30 + $0x20] sm:$0xff] }
  0x79   : > { %686 = vmatpush.msrb.mxu0 %v497_v24  ;;  %706 = vmatpush.msrb.mxu1 %v498_v25  ;;  %v459_v24 = vld [vmem:[%s1429_s30 + $0x1f0] sm:$0xff]  ;;  %v444_v25 = vld [vmem:[%s1429_s30 + $0x178] sm:$0xff]  ;;  %v469_v26 = vunpack.c.l.bf16 %v401_v20 }
  0x7a   : > { %728 = vmatpush.msrb.mxu2 %v467_v27  ;;  %748 = vmatpush.msrb.mxu3 %v468_v28  ;;  %v470_v27 = vunpack.c.h.bf16 %v401_v20  ;;  %v585_v28 = vunpack.c.l.bf16 %v459_v24  ;;  %v586_v29 = vunpack.c.h.bf16 %v459_v24  ;;  %v556_v32 = vunpack.c.h.bf16 %v444_v25 }
  0x7b   : > { %687 = vmatpush.msrb.mxu0 %v481_v33  ;;  %707 = vmatpush.msrb.mxu1 %v482_v34  ;;  %v436_v33 = vld [vmem:[%s1429_s30 + $0x138] sm:$0xff]  ;;  %v443_v34 = vld [vmem:[%s1429_s30 + $0x170] sm:$0xff] }
  0x7c   : > { %801 = vmatpush.msra.mxu2 %v583_v30  ;;  %821 = vmatpush.msra.mxu3 %v584_v31  ;;  %v451_v30 = vld [vmem:[%s1429_s30 + $0x1b0] sm:$0xff]  ;;  %v555_v31 = vunpack.c.l.bf16 %v444_v25  ;;  %v553_v41 = vunpack.c.l.bf16 %v443_v34 }
  0x7d   : > { %688 = vmatpush.msrb.mxu0 %v465_v38  ;;  %708 = vmatpush.msrb.mxu1 %v466_v39  ;;  %v539_v38 = vunpack.c.l.bf16 %v436_v33  ;;  %v540_v39 = vunpack.c.h.bf16 %v436_v33 }
  0x7e   : > { %802 = vmatpush.msra.mxu2 %v567_v35  ;;  %822 = vmatpush.msra.mxu3 %v568_v36  ;;  %v569_v35 = vunpack.c.l.bf16 %v451_v30  ;;  %v570_v36 = vunpack.c.h.bf16 %v451_v30 }
  0x7f   : > { %1129 = vmatmul.msk.f32.vlgmr.msra.gmra.mxu0 %vm589_vm0, %v1465_v23  ;;  %1130 = vmatmul.msk.f32.vlgmr.msra.gmra.mxu1 %vm589_vm0, %v1465_v23 }
  0x80   : > { %761 = vmatpush.msra.mxu0 %v581_v42  ;;  %781 = vmatpush.msra.mxu1 %v582_v43  ;;  %v554_v42 = vunpack.c.h.bf16 %v443_v34  ;;  %v420_v43 = vld [vmem:[%s1429_s30 + $0xb8] sm:$0xff] }
  0x81   : > { %803 = vmatpush.msra.mxu2 %v551_v45  ;;  %823 = vmatpush.msra.mxu3 %v552_v46  ;;  %v524_v45 = vunpack.c.h.bf16 %v428_v37  ;;  %v537_v46 = vunpack.c.l.bf16 %v435_v40  ;;  %v508_v50 = vunpack.c.h.bf16 %v420_v43 }
  0x82   : > { %762 = vmatpush.msra.mxu0 %v565_v48  ;;  %782 = vmatpush.msra.mxu1 %v566_v49  ;;  %v427_v48 = vld [vmem:[%s1429_s30 + $0xf0] sm:$0xff]  ;;  %v507_v49 = vunpack.c.l.bf16 %v420_v43 }
  0x83   : > { %804 = vmatpush.msra.mxu2 %v535_v51  ;;  %824 = vmatpush.msra.mxu3 %v536_v52  ;;  %v412_v51 = vld [vmem:[%s1429_s30 + $0x78] sm:$0xff]  ;;  %v419_v52 = vld [vmem:[%s1429_s30 + $0xb0] sm:$0xff]  ;;  %v521_v53 = vunpack.c.l.bf16 %v427_v48 }
  0x84   : > { %763 = vmatpush.msra.mxu0 %v549_v54  ;;  %783 = vmatpush.msra.mxu1 %v550_v55  ;;  %v522_v54 = vunpack.c.h.bf16 %v427_v48  ;;  %v404_v55 = vld [vmem:[%s1429_s30 + $0x38] sm:$0xff]  ;;  %v491_v56 = vunpack.c.l.bf16 %v412_v51 }
  0x85   : > { %805 = vmatpush.msra.mxu2 %v519_v57  ;;  %825 = vmatpush.msra.mxu3 %v520_v58  ;;  %v492_v57 = vunpack.c.h.bf16 %v412_v51  ;;  %v505_v58 = vunpack.c.l.bf16 %v419_v52  ;;  %v475_v61 = vunpack.c.l.bf16 %v404_v55 }
  0x86   : > { %764 = vmatpush.msra.mxu0 %v533_v59  ;;  %784 = vmatpush.msra.mxu1 %v534_v60  ;;  %v506_v59 = vunpack.c.h.bf16 %v419_v52  ;;  %v411_v60 = vld [vmem:[%s1429_s30 + $0x70] sm:$0xff] }
  0x87   : > { %806 = vmatpush.msra.mxu2 %v503_v62  ;;  %826 = vmatpush.msra.mxu3 %v504_v63  ;;  %v476_v62 = vunpack.c.h.bf16 %v404_v55  ;;  %v403_v63 = vld [vmem:[%s1429_s30 + $0x30] sm:$0xff]  ;;  %v489_v0 = vunpack.c.l.bf16 %v411_v60  ;;  %v490_v1 = vunpack.c.h.bf16 %v411_v60 }
  0x88   : > { %1135 = vmatmul.msk.f32.vlgmr.msrb.gmra.mxu2 %vm589_vm0, %v1465_v23  ;;  %1136 = vmatmul.msk.f32.vlgmr.msrb.gmra.mxu3 %vm589_vm0, %v1465_v23 }
  0x89   : > { %765 = vmatpush.msra.mxu0 %v517_v2  ;;  %785 = vmatpush.msra.mxu1 %v518_v3  ;;  %v473_v2 = vunpack.c.l.bf16 %v403_v63  ;;  %v474_v3 = vunpack.c.h.bf16 %v403_v63 }
  0x8a   : > { %807 = vmatpush.msra.mxu2 %v487_v5  ;;  %827 = vmatpush.msra.mxu3 %v488_v6 }
  0x8b   : > { %1189 = vset.pattern.permute.xlu0 %v1230_v17  ;;  %766 = vmatpush.msra.mxu0 %v501_v7 }
  0x8c   : > { %786 = vmatpush.msra.mxu1 %v502_v9  ;;  %808 = vmatpush.msra.mxu2 %v471_v10 }
  0x8d   : > { %828 = vmatpush.msra.mxu3 %v472_v12  ;;  %361 = vperm.xlu0 %1189, %v358_v14  }
  0x8e   : > { %881 = vmatpush.msrb.mxu2 %v587_v15  ;;  %767 = vmatpush.msra.mxu0 %v485_v18 }
  0x8f   : > { %901 = vmatpush.msrb.mxu3 %v588_v16  ;;  %787 = vmatpush.msra.mxu1 %v486_v19 }
  0x90   : > { %882 = vmatpush.msrb.mxu2 %v571_v21  ;;  %1133 = vmatmul.msk.f32.vlgmr.msrb.gmra.mxu0 %vm589_vm0, %v1465_v23 }
  0x91   : > { %902 = vmatpush.msrb.mxu3 %v572_v22  ;;  %1134 = vmatmul.msk.f32.vlgmr.msrb.gmra.mxu1 %vm589_vm0, %v1465_v23 }
  0x92   : > { %768 = vmatpush.msra.mxu0 %v469_v26  ;;  %788 = vmatpush.msra.mxu1 %v470_v27 }
  0x93   : > { %883 = vmatpush.msrb.mxu2 %v555_v31  ;;  %903 = vmatpush.msrb.mxu3 %v556_v32 }
  0x94   : > { %841 = vmatpush.msrb.mxu0 %v585_v28  ;;  %861 = vmatpush.msrb.mxu1 %v586_v29 }
  0x95   : > { %1139 = vmatmul.msk.f32.vlgmr.msra.gmra.mxu2 %vm589_vm0, %v1465_v23  ;;  %1140 = vmatmul.msk.f32.vlgmr.msra.gmra.mxu3 %vm589_vm0, %v1465_v23 }
  0x96   : > { %842 = vmatpush.msrb.mxu0 %v569_v35  ;;  %862 = vmatpush.msrb.mxu1 %v570_v36 }
  0x97   : > { %884 = vmatpush.msrb.mxu2 %v539_v38  ;;  %904 = vmatpush.msrb.mxu3 %v540_v39 }
  0x98   : > { %843 = vmatpush.msrb.mxu0 %v553_v41  ;;  %863 = vmatpush.msrb.mxu1 %v554_v42 }
  0x99   : > { %885 = vmatpush.msrb.mxu2 %v523_v44  ;;  %905 = vmatpush.msrb.mxu3 %v524_v45 }
  0x9a   : > { %844 = vmatpush.msrb.mxu0 %v537_v46  ;;  %864 = vmatpush.msrb.mxu1 %v538_v47 }
  0x9b   : > { %886 = vmatpush.msrb.mxu2 %v507_v49  ;;  %906 = vmatpush.msrb.mxu3 %v508_v50 }
  0x9c   : > { %1137 = vmatmul.msk.f32.vlgmr.msra.gmra.mxu0 %vm589_vm0, %v1465_v23  ;;  %1138 = vmatmul.msk.f32.vlgmr.msra.gmra.mxu1 %vm589_vm0, %v1465_v23 }
  0x9d   : > { %845 = vmatpush.msrb.mxu0 %v521_v53  ;;  %865 = vmatpush.msrb.mxu1 %v522_v54 }
  0x9e   : > { %887 = vmatpush.msrb.mxu2 %v491_v56  ;;  %907 = vmatpush.msrb.mxu3 %v492_v57 }
  0x9f   : > { %846 = vmatpush.msrb.mxu0 %v505_v58  ;;  %866 = vmatpush.msrb.mxu1 %v506_v59 }
  0xa0   : > { %888 = vmatpush.msrb.mxu2 %v475_v61  ;;  %908 = vmatpush.msrb.mxu3 %v476_v62 }
  0xa1   : > { %1143 = vmatmul.msk.f32.vlgmr.msrb.gmra.mxu2 %vm589_vm0, %v1465_v23  ;;  %1144 = vmatmul.msk.f32.vlgmr.msrb.gmra.mxu3 %vm589_vm0, %v1465_v23 }
  0xa2   : > { %847 = vmatpush.msrb.mxu0 %v489_v0  ;;  %867 = vmatpush.msrb.mxu1 %v490_v1 }
  0xa4   : > { %848 = vmatpush.msrb.mxu0 %v473_v2  ;;  %868 = vmatpush.msrb.mxu1 %v474_v3 }
  0xa5   : > { %1141 = vmatmul.msk.f32.vlgmr.msrb.gmra.mxu0 %vm589_vm0, %v1465_v23  ;;  %1142 = vmatmul.msk.f32.vlgmr.msrb.gmra.mxu1 %vm589_vm0, %v1465_v23 }
  0xfa   : > { %v650_v4 = vpop.f32.mrf.mxu2  ;;  %v670_v5 = vpop.f32.mrf.mxu3 }
  0xfc   : > { %v610_v6 = vpop.f32.mrf.mxu0  ;;  %v630_v7 = vpop.f32.mrf.mxu1 }
  0xff   : > { %v1536_v8 = vpop.permute.xlu0 %361 }
 0x100   : > { %v913_v9 = vadd.f32 %v610_v6, %v1536_v8  ;;  %v914_v10 = vadd.f32 %v630_v7, %v1536_v8  ;;  %v915_v11 = vadd.f32 %v650_v4, %v1536_v8  ;;  %v916_v12 = vadd.f32 %v670_v5, %v1536_v8 }
 0x102   : > { %vm964_vm1 = vcmp.ge.f32.partialorder %v913_v9, 0.0  ;;  %v980_v23 = vmul.f32 0.02, %v913_v9  ;;  %vm965_vm2 = vcmp.ge.f32.partialorder %v914_v10, 0.0  ;;  %v981_v13 = vmul.f32 0.02, %v914_v10 }
 0x103   : > { %vm966_vm3 = vcmp.ge.f32.partialorder %v915_v11, 0.0  ;;  %v982_v14 = vmul.f32 0.02, %v915_v11  ;;  %vm967_vm4 = vcmp.ge.f32.partialorder %v916_v12, 0.0  ;;  %v983_v15 = vmul.f32 0.02, %v916_v12 }
 0x104   : > { %v996_v16 = vsel %vm964_vm1, %v913_v9, %v980_v23  ;;  %v997_v17 = vsel %vm965_vm2, %v914_v10, %v981_v13 }
 0x105   : > { %v1012_v18 = vpack.c.bf16 %v997_v17, %v996_v16  ;;  %v998_v19 = vsel %vm966_vm3, %v915_v11, %v982_v14  ;;  %v999_v20 = vsel %vm967_vm4, %v916_v12, %v983_v15 }
 0x106   : > { %v1013_v21 = vpack.c.bf16 %v999_v20, %v998_v19 }
 0x107   : > { %1020 = vst [vmem:[%s1545_s12] sm:$0xff] %v1012_v18 }
 0x108   : > { %1021 = vst [vmem:[%s1545_s12 + $0x8] sm:$0xff] %v1013_v21 }
 0x10b   : > { %v730_v22 = vpop.f32.mrf.mxu2  ;;  %v750_v24 = vpop.f32.mrf.mxu3 }
 0x10c   : > { %v919_v25 = vadd.f32 %v730_v22, %v1536_v8  ;;  %v920_v26 = vadd.f32 %v750_v24, %v1536_v8 }
 0x10d   : > { %v690_v27 = vpop.f32.mrf.mxu0 }
 0x10e   : > { %v710_v28 = vpop.f32.mrf.mxu1  ;;  %vm970_vm5 = vcmp.ge.f32.partialorder %v919_v25, 0.0  ;;  %v986_v29 = vmul.f32 0.02, %v919_v25  ;;  %vm971_vm6 = vcmp.ge.f32.partialorder %v920_v26, 0.0  ;;  %v987_v30 = vmul.f32 0.02, %v920_v26 }
 0x10f   : > { %v917_v31 = vadd.f32 %v690_v27, %v1536_v8  ;;  %v918_v32 = vadd.f32 %v710_v28, %v1536_v8 }
 0x110   : > { %v1002_v33 = vsel %vm970_vm5, %v919_v25, %v986_v29  ;;  %v1003_v34 = vsel %vm971_vm6, %v920_v26, %v987_v30 }
 0x111   : > { %vm968_vm7 = vcmp.ge.f32.partialorder %v917_v31, 0.0  ;;  %v984_v35 = vmul.f32 0.02, %v917_v31  ;;  %vm969_vm8 = vcmp.ge.f32.partialorder %v918_v32, 0.0  ;;  %v985_v36 = vmul.f32 0.02, %v918_v32 }
 0x112   : > { %v1015_v37 = vpack.c.bf16 %v1003_v34, %v1002_v33 }
 0x113   : > { %v1000_v38 = vsel %vm968_vm7, %v917_v31, %v984_v35  ;;  %v1001_v39 = vsel %vm969_vm8, %v918_v32, %v985_v36 }
 0x114   : > { %v1014_v40 = vpack.c.bf16 %v1001_v39, %v1000_v38  ;;  %1023 = vst [vmem:[%s1545_s12 + $0x18] sm:$0xff] %v1015_v37 }
 0x116   : > { %1022 = vst [vmem:[%s1545_s12 + $0x10] sm:$0xff] %v1014_v40 }
 0x118   : > { %v810_v41 = vpop.f32.mrf.mxu2  ;;  %v830_v42 = vpop.f32.mrf.mxu3 }
 0x119   : > { %v770_v43 = vpop.f32.mrf.mxu0  ;;  %v790_v44 = vpop.f32.mrf.mxu1  ;;  %v923_v45 = vadd.f32 %v810_v41, %v1536_v8  ;;  %v924_v46 = vadd.f32 %v830_v42, %v1536_v8 }
 0x11a   : > { %v921_v47 = vadd.f32 %v770_v43, %v1536_v8  ;;  %v922_v48 = vadd.f32 %v790_v44, %v1536_v8 }
 0x11b   : > { %vm974_vm9 = vcmp.ge.f32.partialorder %v923_v45, 0.0  ;;  %v990_v49 = vmul.f32 0.02, %v923_v45  ;;  %vm975_vm10 = vcmp.ge.f32.partialorder %v924_v46, 0.0  ;;  %v991_v50 = vmul.f32 0.02, %v924_v46 }
 0x11c   : > { %vm972_vm11 = vcmp.ge.f32.partialorder %v921_v47, 0.0  ;;  %v988_v51 = vmul.f32 0.02, %v921_v47  ;;  %vm973_vm12 = vcmp.ge.f32.partialorder %v922_v48, 0.0  ;;  %v989_v52 = vmul.f32 0.02, %v922_v48 }
 0x11d   : > { %v1006_v53 = vsel %vm974_vm9, %v923_v45, %v990_v49  ;;  %v1007_v54 = vsel %vm975_vm10, %v924_v46, %v991_v50 }
 0x11e   : > { %v1004_v55 = vsel %vm972_vm11, %v921_v47, %v988_v51  ;;  %v1005_v56 = vsel %vm973_vm12, %v922_v48, %v989_v52  ;;  %v1017_v57 = vpack.c.bf16 %v1007_v54, %v1006_v53 }
 0x11f   : > { %v1016_v58 = vpack.c.bf16 %v1005_v56, %v1004_v55 }
 0x120   : > { %1025 = vst [vmem:[%s1545_s12 + $0x28] sm:$0xff] %v1017_v57 }
 0x121   : > { %1024 = vst [vmem:[%s1545_s12 + $0x20] sm:$0xff] %v1016_v58 }
 0x122   : > { %v850_v59 = vpop.f32.mrf.mxu0  ;;  %v870_v60 = vpop.f32.mrf.mxu1 }
 0x123   : > { %v925_v61 = vadd.f32 %v850_v59, %v1536_v8  ;;  %v926_v62 = vadd.f32 %v870_v60, %v1536_v8 }
 0x124   : > { %v890_v63 = vpop.f32.mrf.mxu2  ;;  %v910_v0 = vpop.f32.mrf.mxu3 }
 0x125   : > { %vm976_vm13 = vcmp.ge.f32.partialorder %v925_v61, 0.0  ;;  %v992_v1 = vmul.f32 0.02, %v925_v61  ;;  %vm977_vm14 = vcmp.ge.f32.partialorder %v926_v62, 0.0  ;;  %v993_v2 = vmul.f32 0.02, %v926_v62 }
 0x126   : > { %v927_v3 = vadd.f32 %v890_v63, %v1536_v8  ;;  %v928_v4 = vadd.f32 %v910_v0, %v1536_v8 }
 0x127   : > { %v1008_v5 = vsel %vm976_vm13, %v925_v61, %v992_v1  ;;  %v1009_v6 = vsel %vm977_vm14, %v926_v62, %v993_v2 }
 0x128   : > { %v1018_v7 = vpack.c.bf16 %v1009_v6, %v1008_v5  ;;  %vm978_vm15 = vcmp.ge.f32.partialorder %v927_v3, 0.0  ;;  %v994_v9 = vmul.f32 0.02, %v927_v3  ;;  %vm979_vm0 = vcmp.ge.f32.partialorder %v928_v4, 0.0 }
 0x129   : > { %v995_v10 = vmul.f32 0.02, %v928_v4 }
 0x12a   : > { %1026 = vst [vmem:[%s1545_s12 + $0x30] sm:$0xff] %v1018_v7  ;;  %v1010_v11 = vsel %vm978_vm15, %v927_v3, %v994_v9 }
 0x12b   : > { %v1011_v12 = vsel %vm979_vm0, %v928_v4, %v995_v10 }
 0x12c   : > { %v1019_v23 = vpack.c.bf16 %v1011_v12, %v1010_v11 }
 0x12e   : > { %1027 = vst [vmem:[%s1545_s12 + $0x38] sm:$0xff] %v1019_v23 }
 0x12f PF: > { %s13_s16 = sadd.s32 1, %s1228_s16   ;;  %s1586_s12 = smov %s1216_s13 }
 0x130   : > { %p10_p10 = scmp.ge.s32.totalorder %s13_s16, 6   ;;  %s1587_s13 = smov %s1286_s20 }
 0x131   : > { %s1588_s14 = smov %s1224_s15  ;;  %s1589_s15 = smov %s1591_s17 }
 0x132   :  { %12 = sbr.rel (!%p10_p10) target bundleno = 3 (0x3), region = 101 }

// kernel: discriminator_forward.6
= control target key start
LH: loop header
LB: loop body
LE: loop exit
PB: predicated region body
PF: predicated region fallthrough
CT: control target
= control target key end

     0   :  { %s708_s12 = smov 0   ;;  %s710_s13 = smov 0   ;;  %s869_s0 = inlined_call_operand.vmem [shape: bf16[112,768], index: 0, kind: input, shape index: {}]   ;;  %s870_s1 = inlined_call_operand.vmem [shape: f32[8,112], index: 1, kind: input, shape index: {}]   ;;  %s871_s2 = inlined_call_operand.vmem [shape: f32[8,1], index: 2, kind: input, shape index: {}]   ;;  %s872_s3 = inlined_call_operand.vmem [shape: bf16[8,768], index: 3, kind: output, shape index: {}]  }
   0x1   :  { %s712_s14 = smov 0   ;;  %s714_s15 = smov 0  }
   0x2   :  { %s716_s16 = smov 0  }
   0x3 LB: > { %s25_s17 = sadd.s32 1, %s681_s15  ;;  %p41_p1 = scmp.ne.s32.totalorder %s673_s13, %s669_s12  ;;  %s685_s16 = sphi %s716_s16, %s13_s16   ;;  %s681_s15 = sphi %s714_s15, %s876_s15   ;;  %s677_s14 = sphi %s712_s14, %s875_s14   ;;  %s673_s13 = sphi %s710_s13, %s874_s13   ;;  %s669_s12 = sphi %s708_s12, %s873_s12  }
   0x4   : > { %p27_p0 = scmp.ge.s32.totalorder %s25_s17, 2  ;;  %p42_p2 = scmp.eq.s32.totalorder %s685_s16, 0 }
   0x5   : > { %s34_s19 = sadd.s32 1, %s673_s13  ;;  %p565_p5 = scmp.ge.s32.totalorder %s685_s16, 2 }
   0x6   : > { %s878_s17 = smov (%p27_p0, %s25_s17), 0  ;;  %p43_p3 = por %p42_p2, %p41_p1 }
   0x7   : > { %s30_s18 = ssub.s32 %s681_s15, %s878_s17  ;;  %150 = sbr.rel (%p565_p5) target bundleno = 45 (0x2d), region = 24 }
   0x8   : > { %p32_p4 = scmp.eq.s32.totalorder %s30_s18, 0 }
   0xa   : > { %s743_s20 = scalar_select %p32_p4, %s673_s13, %s34_s19  }
   0xc   : > { %153 = sbr.rel (!%p43_p3) target bundleno = 45 (0x2d), region = 28  ;;  %s155_s21 = sand.u32 (%p43_p3), 1, %s673_s13  }
   0xd   : > { %s602_s22 = smul.u32 (%p43_p3), 12, %s681_s15 }
   0xe   : > { %s603_s23 = smul.u32 (%p43_p3), 168, %s155_s21 }
   0xf   : > { %s751_s26 = scalar_lea.vmem (%p43_p3), %s869_s0, %s602_s22 }
  0x10   : > { %v178_v0 = vld [vmem:[%s751_s26] sm:$0xff] (%p43_p3)  ;;  %v180_v1 = vld [vmem:[%s751_s26 + $0x18] sm:$0xff] (%p43_p3)  ;;  %v182_v2 = vld [vmem:[%s751_s26 + $0x30] sm:$0xff] (%p43_p3)  ;;  %s756_s27 = scalar_lea.vmem (%p43_p3), [#allocation3], %s603_s23 }
  0x11   : > { %179 = vst [vmem:[%s756_s27] sm:$0xff] %v178_v0  ;;  %v184_v3 = vld [vmem:[%s751_s26 + $0x48] sm:$0xff]  ;;  %v186_v4 = vld [vmem:[%s751_s26 + $0x60] sm:$0xff]  ;;  %v188_v5 = vld [vmem:[%s751_s26 + $0x78] sm:$0xff] }
  0x12   : > { %181 = vst [vmem:[%s756_s27 + $0xc] sm:$0xff] %v180_v1  ;;  %v190_v6 = vld [vmem:[%s751_s26 + $0x90] sm:$0xff]  ;;  %v192_v7 = vld [vmem:[%s751_s26 + $0xa8] sm:$0xff]  ;;  %v194_v8 = vld [vmem:[%s751_s26 + $0xc0] sm:$0xff] }
  0x13   : > { %183 = vst [vmem:[%s756_s27 + $0x18] sm:$0xff] %v182_v2  ;;  %v196_v9 = vld [vmem:[%s751_s26 + $0xd8] sm:$0xff]  ;;  %v198_v10 = vld [vmem:[%s751_s26 + $0xf0] sm:$0xff]  ;;  %v200_v11 = vld [vmem:[%s751_s26 + $0x108] sm:$0xff] }
  0x14   : > { %185 = vst [vmem:[%s756_s27 + $0x24] sm:$0xff] %v184_v3  ;;  %v202_v12 = vld [vmem:[%s751_s26 + $0x120] sm:$0xff]  ;;  %v204_v13 = vld [vmem:[%s751_s26 + $0x138] sm:$0xff]  ;;  %v567_v14 = vld [vmem:[%s751_s26 + $0x8] sm:$0xf] }
  0x15   : > { %187 = vst [vmem:[%s756_s27 + $0x30] sm:$0xff] %v186_v4  ;;  %v569_v15 = vld [vmem:[%s751_s26 + $0x20] sm:$0xf]  ;;  %v571_v16 = vld [vmem:[%s751_s26 + $0x38] sm:$0xf] }
  0x16   : > { %189 = vst [vmem:[%s756_s27 + $0x3c] sm:$0xff] %v188_v5  ;;  %v573_v17 = vld [vmem:[%s751_s26 + $0x50] sm:$0xf]  ;;  %v575_v18 = vld [vmem:[%s751_s26 + $0x68] sm:$0xf] }
  0x17   : > { %191 = vst [vmem:[%s756_s27 + $0x48] sm:$0xff] %v190_v6  ;;  %v577_v19 = vld [vmem:[%s751_s26 + $0x80] sm:$0xf]  ;;  %v579_v20 = vld [vmem:[%s751_s26 + $0x98] sm:$0xf] }
  0x18   : > { %193 = vst [vmem:[%s756_s27 + $0x54] sm:$0xff] %v192_v7  ;;  %v581_v21 = vld [vmem:[%s751_s26 + $0xb0] sm:$0xf]  ;;  %v583_v22 = vld [vmem:[%s751_s26 + $0xc8] sm:$0xf] }
  0x19   : > { %195 = vst [vmem:[%s756_s27 + $0x60] sm:$0xff] %v194_v8  ;;  %v585_v23 = vld [vmem:[%s751_s26 + $0xe0] sm:$0xf]  ;;  %v587_v24 = vld [vmem:[%s751_s26 + $0xf8] sm:$0xf] }
  0x1a   : > { %197 = vst [vmem:[%s756_s27 + $0x6c] sm:$0xff] %v196_v9  ;;  %v589_v25 = vld [vmem:[%s751_s26 + $0x110] sm:$0xf]  ;;  %v591_v26 = vld [vmem:[%s751_s26 + $0x128] sm:$0xf] }
  0x1b   : > { %199 = vst [vmem:[%s756_s27 + $0x78] sm:$0xff] %v198_v10  ;;  %v593_v27 = vld [vmem:[%s751_s26 + $0x140] sm:$0xf] }
  0x1c   : > { %201 = vst [vmem:[%s756_s27 + $0x84] sm:$0xff] %v200_v11 }
  0x1d   : > { %203 = vst [vmem:[%s756_s27 + $0x90] sm:$0xff] %v202_v12 }
  0x1e   : > { %205 = vst [vmem:[%s756_s27 + $0x9c] sm:$0xff] %v204_v13 }
  0x1f   : > { %568 = vst [vmem:[%s756_s27 + $0x8] sm:$0xf] %v567_v14 }
  0x20   : > { %570 = vst [vmem:[%s756_s27 + $0x14] sm:$0xf] %v569_v15 }
  0x21   : > { %572 = vst [vmem:[%s756_s27 + $0x20] sm:$0xf] %v571_v16 }
  0x22   : > { %574 = vst [vmem:[%s756_s27 + $0x2c] sm:$0xf] %v573_v17 }
  0x23   : > { %576 = vst [vmem:[%s756_s27 + $0x38] sm:$0xf] %v575_v18 }
  0x24   : > { %578 = vst [vmem:[%s756_s27 + $0x44] sm:$0xf] %v577_v19 }
  0x25   : > { %580 = vst [vmem:[%s756_s27 + $0x50] sm:$0xf] %v579_v20 }
  0x26   : > { %582 = vst [vmem:[%s756_s27 + $0x5c] sm:$0xf] %v581_v21 }
  0x27   : > { %584 = vst [vmem:[%s756_s27 + $0x68] sm:$0xf] %v583_v22 }
  0x28   : > { %586 = vst [vmem:[%s756_s27 + $0x74] sm:$0xf] %v585_v23 }
  0x29   : > { %588 = vst [vmem:[%s756_s27 + $0x80] sm:$0xf] %v587_v24 }
  0x2a   : > { %590 = vst [vmem:[%s756_s27 + $0x8c] sm:$0xf] %v589_v25 }
  0x2b   : > { %592 = vst [vmem:[%s756_s27 + $0x98] sm:$0xf] %v591_v26 }
  0x2c   : > { %594 = vst [vmem:[%s756_s27 + $0xa4] sm:$0xf] %v593_v27 }
  0x2d PF: > { %p595_p6 = scmp.ge.s32.totalorder %s685_s16, 1  ;;  %p246_p7 = scmp.lt.s32.totalorder %s685_s16, 3 }
  0x2f   : > { %p247_p8 = pnand %p595_p6, %p246_p7 }
  0x30   : > { %s253_s28 = sand.u32 (!%p247_p8), 1, %s669_s12   ;;  %s286_s8 = smul.u32 (!%p247_p8), 3, %s677_s14 }
  0x31   : > { %250 = sbr.rel (%p247_p8) target bundleno = 225 (0xe1), region = 54 }
  0x32   : > { %s604_s29 = smul.u32 (!%p247_p8), 168, %s253_s28  ;;  %p287_p9 = scmp.lt.s32.totalorder (!%p247_p8), %s286_s8, 5 }
  0x34   : > { %s817_s5 = scalar_lea.vmem (!%p247_p8), [#allocation3], %s604_s29 }
  0x36   : > { %v296_v28 = vld [vmem:[%s871_s2] sm:$0xff]  ;;  %v687_v32 = vmov 0   ;;  %v332_v37 = vld [vmem:[%s817_s5 + $0x8c] sm:$0xf]  ;;  %v333_v38 = vld [vmem:[%s817_s5 + $0x90] sm:$0xff]  ;;  %vm379_vm0 = vcmask 916480  }
  0x37   : > { %v336_v29 = vld [vmem:[%s817_s5 + $0xa4] sm:$0xf]  ;;  %v334_v30 = vld [vmem:[%s817_s5 + $0x98] sm:$0xf]  ;;  %v335_v31 = vld [vmem:[%s817_s5 + $0x9c] sm:$0xff]  ;;  %646 = vset.pattern.permute.xlu0 %v687_v32  ;;  %v373_v39 = vunpack.c.l.bf16 %v333_v38  ;;  %v374_v40 = vunpack.c.h.bf16 %v333_v38  ;;  %v372_v44 = vunpack.c.l.bf16 %v332_v37  ;;  %s880_s8 = smov (!%p287_p9, %s286_s8), 5 }
  0x38   : > { %v378_v33 = vunpack.c.l.bf16 %v336_v29  ;;  %v375_v34 = vunpack.c.l.bf16 %v334_v30  ;;  %v376_v35 = vunpack.c.l.bf16 %v335_v31  ;;  %v377_v36 = vunpack.c.h.bf16 %v335_v31  ;;  %299 = vperm.xlu0 %646, %v296_v28   ;;  %v330_v41 = vld [vmem:[%s817_s5 + $0x80] sm:$0xf]  ;;  %v331_v42 = vld [vmem:[%s817_s5 + $0x84] sm:$0xff]  ;;  %v329_v43 = vld [vmem:[%s817_s5 + $0x78] sm:$0xff]  ;;  %s596_s9 = sshll.u32 %s880_s8, 2 }
  0x39   : > { %v370_v45 = vunpack.c.l.bf16 %v331_v42  ;;  %v371_v46 = vunpack.c.h.bf16 %v331_v42  ;;  %v328_v47 = vld [vmem:[%s817_s5 + $0x74] sm:$0xf]  ;;  %v327_v48 = vld [vmem:[%s817_s5 + $0x6c] sm:$0xff]  ;;  %v369_v49 = vunpack.c.l.bf16 %v330_v41  ;;  %v367_v50 = vunpack.c.l.bf16 %v329_v43  ;;  %v326_v52 = vld [vmem:[%s817_s5 + $0x68] sm:$0xf]  ;;  %s290_s12 = scalar_lea.vmem %s872_s3, %s596_s9 }
  0x3a   : > { %425 = vmatpush.msra.mxu2 %v378_v33  ;;  %385 = vmatpush.msra.mxu0 %v376_v35  ;;  %v368_v51 = vunpack.c.h.bf16 %v329_v43  ;;  %v325_v53 = vld [vmem:[%s817_s5 + $0x60] sm:$0xff]  ;;  %v366_v54 = vunpack.c.l.bf16 %v328_v47  ;;  %v364_v55 = vunpack.c.l.bf16 %v327_v48  ;;  %v365_v56 = vunpack.c.h.bf16 %v327_v48  ;;  %v324_v57 = vld [vmem:[%s817_s5 + $0x5c] sm:$0xf]  ;;  %v323_v58 = vld [vmem:[%s817_s5 + $0x54] sm:$0xff] }
  0x3b   : > { %405 = vmatpush.msra.mxu1 %v377_v36  ;;  %v363_v59 = vunpack.c.l.bf16 %v326_v52  ;;  %v361_v60 = vunpack.c.l.bf16 %v325_v53  ;;  %v362_v61 = vunpack.c.h.bf16 %v325_v53  ;;  %v322_v62 = vld [vmem:[%s817_s5 + $0x50] sm:$0xf]  ;;  %v321_v63 = vld [vmem:[%s817_s5 + $0x48] sm:$0xff]  ;;  %v360_v0 = vunpack.c.l.bf16 %v324_v57  ;;  %v320_v3 = vld [vmem:[%s817_s5 + $0x44] sm:$0xf] }
  0x3c   : > { %426 = vmatpush.msra.mxu2 %v375_v34  ;;  %386 = vmatpush.msra.mxu0 %v373_v39  ;;  %v358_v1 = vunpack.c.l.bf16 %v323_v58  ;;  %v359_v2 = vunpack.c.h.bf16 %v323_v58  ;;  %v319_v4 = vld [vmem:[%s817_s5 + $0x3c] sm:$0xff]  ;;  %v357_v5 = vunpack.c.l.bf16 %v322_v62  ;;  %v355_v6 = vunpack.c.l.bf16 %v321_v63  ;;  %v318_v8 = vld [vmem:[%s817_s5 + $0x38] sm:$0xf]  ;;  %v317_v9 = vld [vmem:[%s817_s5 + $0x30] sm:$0xff] }
  0x3d   : > { %406 = vmatpush.msra.mxu1 %v374_v40  ;;  %v356_v7 = vunpack.c.h.bf16 %v321_v63  ;;  %v354_v10 = vunpack.c.l.bf16 %v320_v3  ;;  %v352_v11 = vunpack.c.l.bf16 %v319_v4  ;;  %v353_v12 = vunpack.c.h.bf16 %v319_v4  ;;  %v316_v13 = vld [vmem:[%s817_s5 + $0x2c] sm:$0xf]  ;;  %v315_v14 = vld [vmem:[%s817_s5 + $0x24] sm:$0xff]  ;;  %v314_v18 = vld [vmem:[%s817_s5 + $0x20] sm:$0xf] }
  0x3e   : > { %427 = vmatpush.msra.mxu2 %v372_v44  ;;  %387 = vmatpush.msra.mxu0 %v370_v45  ;;  %v351_v15 = vunpack.c.l.bf16 %v318_v8  ;;  %v349_v16 = vunpack.c.l.bf16 %v317_v9  ;;  %v350_v17 = vunpack.c.h.bf16 %v317_v9  ;;  %v313_v19 = vld [vmem:[%s817_s5 + $0x18] sm:$0xff]  ;;  %v348_v20 = vunpack.c.l.bf16 %v316_v13  ;;  %v312_v23 = vld [vmem:[%s817_s5 + $0x14] sm:$0xf]  ;;  %v311_v24 = vld [vmem:[%s817_s5 + $0xc] sm:$0xff] }
  0x3f   : > { %407 = vmatpush.msra.mxu1 %v371_v46  ;;  %v346_v21 = vunpack.c.l.bf16 %v315_v14  ;;  %v347_v22 = vunpack.c.h.bf16 %v315_v14  ;;  %v345_v25 = vunpack.c.l.bf16 %v314_v18  ;;  %v343_v26 = vunpack.c.l.bf16 %v313_v19  ;;  %v310_v28 = vld [vmem:[%s817_s5 + $0x8] sm:$0xf]  ;;  %v309_v29 = vld [vmem:[%s817_s5] sm:$0xff] }
  0x40   : > { %428 = vmatpush.msra.mxu2 %v369_v49  ;;  %388 = vmatpush.msra.mxu0 %v367_v50  ;;  %v344_v27 = vunpack.c.h.bf16 %v313_v19  ;;  %v342_v30 = vunpack.c.l.bf16 %v312_v23  ;;  %v340_v31 = vunpack.c.l.bf16 %v311_v24  ;;  %v341_v32 = vunpack.c.h.bf16 %v311_v24  ;;  %v308_v36 = vld [vmem:[%s870_s1] sm:$0xff] }
  0x41   : > { %408 = vmatpush.msra.mxu1 %v368_v51  ;;  %v339_v33 = vunpack.c.l.bf16 %v310_v28  ;;  %v337_v34 = vunpack.c.l.bf16 %v309_v29  ;;  %v338_v35 = vunpack.c.h.bf16 %v309_v29 }
  0x42   : > { %429 = vmatpush.msra.mxu2 %v366_v54  ;;  %389 = vmatpush.msra.mxu0 %v364_v55 }
  0x43   : > { %409 = vmatpush.msra.mxu1 %v365_v56 }
  0x44   : > { %430 = vmatpush.msra.mxu2 %v363_v59  ;;  %390 = vmatpush.msra.mxu0 %v361_v60 }
  0x45   : > { %410 = vmatpush.msra.mxu1 %v362_v61 }
  0x46   : > { %431 = vmatpush.msra.mxu2 %v360_v0  ;;  %391 = vmatpush.msra.mxu0 %v358_v1 }
  0x47   : > { %411 = vmatpush.msra.mxu1 %v359_v2 }
  0x48   : > { %432 = vmatpush.msra.mxu2 %v357_v5  ;;  %392 = vmatpush.msra.mxu0 %v355_v6 }
  0x49   : > { %412 = vmatpush.msra.mxu1 %v356_v7 }
  0x4a   : > { %433 = vmatpush.msra.mxu2 %v354_v10  ;;  %393 = vmatpush.msra.mxu0 %v352_v11 }
  0x4b   : > { %413 = vmatpush.msra.mxu1 %v353_v12 }
  0x4c   : > { %434 = vmatpush.msra.mxu2 %v351_v15  ;;  %394 = vmatpush.msra.mxu0 %v349_v16 }
  0x4d   : > { %414 = vmatpush.msra.mxu1 %v350_v17 }
  0x4e   : > { %435 = vmatpush.msra.mxu2 %v348_v20  ;;  %395 = vmatpush.msra.mxu0 %v346_v21 }
  0x4f   : > { %415 = vmatpush.msra.mxu1 %v347_v22 }
  0x50   : > { %436 = vmatpush.msra.mxu2 %v345_v25  ;;  %396 = vmatpush.msra.mxu0 %v343_v26 }
  0x51   : > { %416 = vmatpush.msra.mxu1 %v344_v27 }
  0x52   : > { %437 = vmatpush.msra.mxu2 %v342_v30  ;;  %397 = vmatpush.msra.mxu0 %v340_v31 }
  0x53   : > { %417 = vmatpush.msra.mxu1 %v341_v32 }
  0x54   : > { %438 = vmatpush.msra.mxu2 %v339_v33  ;;  %398 = vmatpush.msra.mxu0 %v337_v34 }
  0x55   : > { %599 = vmatmul.msk.f32.vlgmr.msra.gmra.mxu2 %vm379_vm0, %v308_v36  ;;  %418 = vmatpush.msra.mxu1 %v338_v35 }
  0x56   : > { %597 = vmatmul.msk.f32.vlgmr.msra.gmra.mxu0 %vm379_vm0, %v308_v36  ;;  %598 = vmatmul.msk.f32.vlgmr.msra.gmra.mxu1 %vm379_vm0, %v308_v36 }
  0xaa   : > { %v300_v37 = vpop.permute.xlu0 %299 }
  0xd3   : > { %v400_v38 = vpop.f32.mrf.mxu0  ;;  %v420_v39 = vpop.f32.mrf.mxu1 }
  0xd4   : > { %v443_v40 = vadd.f32 %v400_v38, %v300_v37  ;;  %v444_v41 = vadd.f32 %v420_v39, %v300_v37 }
  0xd6   : > { %vm455_vm1 = vcmp.ge.f32.partialorder %v443_v40, 0.0  ;;  %v458_v42 = vmul.f32 0.02, %v443_v40  ;;  %vm456_vm2 = vcmp.ge.f32.partialorder %v444_v41, 0.0  ;;  %v459_v43 = vmul.f32 0.02, %v444_v41 }
  0xd8   : > { %v461_v44 = vsel %vm455_vm1, %v443_v40, %v458_v42  ;;  %v462_v45 = vsel %vm456_vm2, %v444_v41, %v459_v43  ;;  %v440_v46 = vpop.f32.mrf.mxu2 }
  0xd9   : > { %v464_v47 = vpack.c.bf16 %v462_v45, %v461_v44  ;;  %v445_v48 = vadd.f32 %v440_v46, %v300_v37 }
  0xdb   : > { %466 = vst [vmem:[%s290_s12] sm:$0xff] %v464_v47  ;;  %vm457_vm3 = vcmp.ge.f32.partialorder %v445_v48, 0.0  ;;  %v460_v49 = vmul.f32 0.02, %v445_v48 }
  0xdd   : > { %v463_v50 = vsel %vm457_vm3, %v445_v48, %v460_v49 }
  0xde   : > { %v465_v51 = vpack.c.bf16 %v463_v50, %v463_v50 }
  0xe0   : > { %467 = vst [vmem:[%s290_s12 + $0x8] sm:$0xf] %v465_v51 }
  0xe1 PF: > { %s13_s16 = sadd.s32 1, %s685_s16   ;;  %s873_s12 = smov %s673_s13 }
  0xe2   : > { %p10_p10 = scmp.ge.s32.totalorder %s13_s16, 4   ;;  %s874_s13 = smov %s743_s20 }
  0xe3   : > { %s875_s14 = smov %s681_s15  ;;  %s876_s15 = smov %s878_s17 }
  0xe4   :  { %12 = sbr.rel (!%p10_p10) target bundleno = 3 (0x3), region = 110 }

// kernel: discriminator_forward.7
= control target key start
LH: loop header
LB: loop body
LE: loop exit
PB: predicated region body
PF: predicated region fallthrough
CT: control target
= control target key end

     0   :  { %s842_s12 = smov 0   ;;  %s844_s13 = smov 0   ;;  %s1012_s0 = inlined_call_operand.vmem [shape: bf16[216,256], index: 0, kind: input, shape index: {}]   ;;  %s1013_s1 = inlined_call_operand.vmem [shape: f32[16,216], index: 1, kind: input, shape index: {}]   ;;  %s1014_s2 = inlined_call_operand.vmem [shape: f32[16,1], index: 2, kind: input, shape index: {}]   ;;  %s1015_s3 = inlined_call_operand.vmem [shape: bf16[16,256], index: 3, kind: output, shape index: {}]  }
   0x1   :  { %s846_s14 = smov 0   ;;  %s848_s15 = smov 0  }
   0x2   :  { %s850_s16 = smov 0  }
   0x3 LB: > { %s25_s17 = sadd.s32 1, %s815_s15  ;;  %s638_s18 = sadd.s32 4294967295, %s819_s16   ;;  %s819_s16 = sphi %s850_s16, %s13_s16   ;;  %s815_s15 = sphi %s848_s15, %s1020_s15   ;;  %s811_s14 = sphi %s846_s14, %s1019_s14   ;;  %s807_s13 = sphi %s844_s13, %s1018_s13   ;;  %s803_s12 = sphi %s842_s12, %s1017_s12  }
   0x4   : > { %p27_p0 = scmp.ge.s32.totalorder %s25_s17, 2  ;;  %p41_p1 = scmp.ne.s32.totalorder %s807_s13, %s803_s12 }
   0x5   : > { %p42_p2 = scmp.eq.s32.totalorder %s819_s16, 0  ;;  %p118_p4 = scmp.eq.s32.totalorder %s638_s18, 1 }
   0x6   : > { %s1022_s17 = smov (%p27_p0, %s25_s17), 0  ;;  %s34_s20 = sadd.s32 1, %s807_s13 }
   0x7   : > { %p43_p3 = por %p42_p2, %p41_p1  ;;  %s30_s19 = ssub.s32 %s815_s15, %s1022_s17 }
   0x8   : > { %p32_p5 = scmp.eq.s32.totalorder %s30_s19, 0  ;;  %p877_p6 = por %p118_p4, %p41_p1 }
   0x9   : > { %p642_p7 = scmp.ge.s32.totalorder %s819_s16, 2 }
   0xa   : > { %s882_s22 = scalar_select %p32_p5, %s807_s13, %s34_s20  }
   0xb   : > { %152 = sbr.rel (%p642_p7) target bundleno = 48 (0x30), region = 24 }
  0x10   : > { %155 = sbr.rel (!%p43_p3) target bundleno = 48 (0x30), region = 28  ;;  %s157_s23 = sand.u32 (%p43_p3), 1, %s807_s13  }
  0x11   : > { %s643_s24 = sshll.u32 (%p43_p3), %s815_s15, 2  ;;  %s737_s25 = smul.u32 (%p43_p3), 108, %s157_s23 }
  0x12   : > { %s890_s28 = scalar_lea.vmem (%p43_p3), %s1012_s0, %s643_s24 }
  0x13   : > { %v181_v0 = vld [vmem:[%s890_s28] sm:$0xf] (%p43_p3)  ;;  %v183_v1 = vld [vmem:[%s890_s28 + $0x8] sm:$0xf] (%p43_p3)  ;;  %v185_v2 = vld [vmem:[%s890_s28 + $0x10] sm:$0xf] (%p43_p3) }
  0x14   : > { %s895_s29 = scalar_lea.vmem (%p43_p3), [#allocation3], %s737_s25  ;;  %v187_v3 = vld [vmem:[%s890_s28 + $0x18] sm:$0xf] (%p43_p3)  ;;  %v189_v4 = vld [vmem:[%s890_s28 + $0x20] sm:$0xf] (%p43_p3) }
  0x15   : > { %182 = vst [vmem:[%s895_s29] sm:$0xf] %v181_v0  ;;  %v191_v5 = vld [vmem:[%s890_s28 + $0x28] sm:$0xf]  ;;  %v193_v6 = vld [vmem:[%s890_s28 + $0x30] sm:$0xf] }
  0x16   : > { %184 = vst [vmem:[%s895_s29 + $0x4] sm:$0xf] %v183_v1  ;;  %v195_v7 = vld [vmem:[%s890_s28 + $0x38] sm:$0xf]  ;;  %v197_v8 = vld [vmem:[%s890_s28 + $0x40] sm:$0xf] }
  0x17   : > { %186 = vst [vmem:[%s895_s29 + $0x8] sm:$0xf] %v185_v2  ;;  %v199_v9 = vld [vmem:[%s890_s28 + $0x48] sm:$0xf]  ;;  %v201_v10 = vld [vmem:[%s890_s28 + $0x50] sm:$0xf] }
  0x18   : > { %188 = vst [vmem:[%s895_s29 + $0xc] sm:$0xf] %v187_v3  ;;  %v203_v11 = vld [vmem:[%s890_s28 + $0x58] sm:$0xf]  ;;  %v205_v12 = vld [vmem:[%s890_s28 + $0x60] sm:$0xf] }
  0x19   : > { %190 = vst [vmem:[%s895_s29 + $0x10] sm:$0xf] %v189_v4  ;;  %v207_v13 = vld [vmem:[%s890_s28 + $0x68] sm:$0xf]  ;;  %v209_v14 = vld [vmem:[%s890_s28 + $0x70] sm:$0xf] }
  0x1a   : > { %192 = vst [vmem:[%s895_s29 + $0x14] sm:$0xf] %v191_v5  ;;  %v211_v15 = vld [vmem:[%s890_s28 + $0x78] sm:$0xf]  ;;  %v213_v16 = vld [vmem:[%s890_s28 + $0x80] sm:$0xf] }
  0x1b   : > { %194 = vst [vmem:[%s895_s29 + $0x18] sm:$0xf] %v193_v6  ;;  %v215_v17 = vld [vmem:[%s890_s28 + $0x88] sm:$0xf]  ;;  %v217_v18 = vld [vmem:[%s890_s28 + $0x90] sm:$0xf] }
  0x1c   : > { %196 = vst [vmem:[%s895_s29 + $0x1c] sm:$0xf] %v195_v7  ;;  %v219_v19 = vld [vmem:[%s890_s28 + $0x98] sm:$0xf]  ;;  %v221_v20 = vld [vmem:[%s890_s28 + $0xa0] sm:$0xf] }
  0x1d   : > { %198 = vst [vmem:[%s895_s29 + $0x20] sm:$0xf] %v197_v8  ;;  %v223_v21 = vld [vmem:[%s890_s28 + $0xa8] sm:$0xf]  ;;  %v225_v22 = vld [vmem:[%s890_s28 + $0xb0] sm:$0xf] }
  0x1e   : > { %200 = vst [vmem:[%s895_s29 + $0x24] sm:$0xf] %v199_v9  ;;  %v227_v23 = vld [vmem:[%s890_s28 + $0xb8] sm:$0xf]  ;;  %v229_v24 = vld [vmem:[%s890_s28 + $0xc0] sm:$0xf] }
  0x1f   : > { %202 = vst [vmem:[%s895_s29 + $0x28] sm:$0xf] %v201_v10  ;;  %v231_v25 = vld [vmem:[%s890_s28 + $0xc8] sm:$0xf]  ;;  %v233_v26 = vld [vmem:[%s890_s28 + $0xd0] sm:$0xf] }
  0x20   : > { %204 = vst [vmem:[%s895_s29 + $0x2c] sm:$0xf] %v203_v11 }
  0x21   : > { %206 = vst [vmem:[%s895_s29 + $0x30] sm:$0xf] %v205_v12 }
  0x22   : > { %208 = vst [vmem:[%s895_s29 + $0x34] sm:$0xf] %v207_v13 }
  0x23   : > { %210 = vst [vmem:[%s895_s29 + $0x38] sm:$0xf] %v209_v14 }
  0x24   : > { %212 = vst [vmem:[%s895_s29 + $0x3c] sm:$0xf] %v211_v15 }
  0x25   : > { %214 = vst [vmem:[%s895_s29 + $0x40] sm:$0xf] %v213_v16 }
  0x26   : > { %216 = vst [vmem:[%s895_s29 + $0x44] sm:$0xf] %v215_v17 }
  0x27   : > { %218 = vst [vmem:[%s895_s29 + $0x48] sm:$0xf] %v217_v18 }
  0x28   : > { %220 = vst [vmem:[%s895_s29 + $0x4c] sm:$0xf] %v219_v19 }
  0x29   : > { %222 = vst [vmem:[%s895_s29 + $0x50] sm:$0xf] %v221_v20 }
  0x2a   : > { %224 = vst [vmem:[%s895_s29 + $0x54] sm:$0xf] %v223_v21 }
  0x2b   : > { %226 = vst [vmem:[%s895_s29 + $0x58] sm:$0xf] %v225_v22 }
  0x2c   : > { %228 = vst [vmem:[%s895_s29 + $0x5c] sm:$0xf] %v227_v23 }
  0x2d   : > { %230 = vst [vmem:[%s895_s29 + $0x60] sm:$0xf] %v229_v24 }
  0x2e   : > { %232 = vst [vmem:[%s895_s29 + $0x64] sm:$0xf] %v231_v25 }
  0x2f   : > { %234 = vst [vmem:[%s895_s29 + $0x68] sm:$0xf] %v233_v26 }
  0x30 PF: > { %p644_p8 = scmp.ge.s32.totalorder %s819_s16, 1  ;;  %p311_p9 = scmp.lt.s32.totalorder %s819_s16, 3 }
  0x32   : > { %p312_p10 = pnand %p644_p8, %p311_p9 }
  0x33   : > { %s318_s30 = sand.u32 (!%p312_p10), 1, %s803_s12  }
  0x34   : > { %315 = sbr.rel (%p312_p10) target bundleno = 242 (0xf2), region = 69  ;;  %s645_s26 = sshll.u32 (!%p312_p10), %s318_s30, 3 }
  0x35   : > { %s738_s4 = smul.u32 (!%p312_p10), 108, %s318_s30  ;;  %s344_s27 = scalar_lea.vmem (!%p312_p10), [#allocation4], %s645_s26 }
  0x37   : > { %s953_s5 = scalar_lea.vmem (!%p312_p10), [#allocation3], %s738_s4 }
  0x39   : > { %v715_v27 = vld [vmem:[%s953_s5 + $0x38] sm:$0xff]   ;;  %v714_v28 = vld [vmem:[%s953_s5 + $0x30] sm:$0xff]   ;;  %v402_v31 = vld [vmem:[%s953_s5 + $0x68] sm:$0xf]  ;;  %v821_v46 = vmov 0   ;;  %vm430_vm0 = vcmask 719872  }
  0x3a   : > { %v683_v29 = vunpack.c.h.bf16 %v715_v27  ;;  %v682_v30 = vunpack.c.l.bf16 %v715_v27  ;;  %v720_v32 = vld [vmem:[%s953_s5 + $0x60] sm:$0xff]   ;;  %v429_v33 = vunpack.c.l.bf16 %v402_v31  ;;  %v679_v35 = vunpack.c.h.bf16 %v714_v28  ;;  %v719_v36 = vld [vmem:[%s953_s5 + $0x58] sm:$0xff]   ;;  %v713_v37 = vld [vmem:[%s953_s5 + $0x28] sm:$0xff]   ;;  %780 = vset.pattern.permute.xlu0 %v821_v46  ;;  %s649_s28 = sshll.u32 (%p877_p6), %s811_s14, 2 }
  0x3b   : > { %v703_v34 = vunpack.c.h.bf16 %v720_v32  ;;  %v702_v38 = vunpack.c.l.bf16 %v720_v32  ;;  %v678_v39 = vunpack.c.l.bf16 %v714_v28  ;;  %v699_v40 = vunpack.c.h.bf16 %v719_v36  ;;  %v718_v42 = vld [vmem:[%s953_s5 + $0x50] sm:$0xff]   ;;  %v712_v44 = vld [vmem:[%s953_s5 + $0x20] sm:$0xff]   ;;  %v717_v50 = vld [vmem:[%s953_s5 + $0x48] sm:$0xff]  }
  0x3c   : > { %437 = vmatpush.msra.mxu0 %v683_v29  ;;  %721 = vmatpush.msra.mxu2 %v683_v29  ;;  %v675_v41 = vunpack.c.h.bf16 %v713_v37  ;;  %v356_v43 = vld [vmem:[%s1014_s2] sm:$0xff]  ;;  %v698_v45 = vunpack.c.l.bf16 %v719_v36  ;;  %v674_v47 = vunpack.c.l.bf16 %v713_v37  ;;  %v695_v48 = vunpack.c.h.bf16 %v718_v42  ;;  %v357_v57 = vld [vmem:[%s1014_s2 + $0x8] sm:$0xff]  ;;  %v374_v9 = vld [vmem:[%s1013_s1 + $0x10] sm:$0xff] }
  0x3d   : > { %465 = vmatpush.msra.mxu1 %v429_v33  ;;  %360 = vperm.xlu0 %780, %v356_v43   ;;  %v671_v49 = vunpack.c.h.bf16 %v712_v44  ;;  %v711_v51 = vld [vmem:[%s953_s5 + $0x18] sm:$0xff]   ;;  %v694_v52 = vunpack.c.l.bf16 %v718_v42  ;;  %v670_v53 = vunpack.c.l.bf16 %v712_v44  ;;  %v691_v54 = vunpack.c.h.bf16 %v717_v50  ;;  %v716_v56 = vld [vmem:[%s953_s5 + $0x40] sm:$0xff]   ;;  %v710_v58 = vld [vmem:[%s953_s5 + $0x10] sm:$0xff]  }
  0x3e   : > { %438 = vmatpush.msra.mxu0 %v682_v30  ;;  %722 = vmatpush.msra.mxu2 %v682_v30  ;;  %v667_v55 = vunpack.c.h.bf16 %v711_v51  ;;  %v690_v59 = vunpack.c.l.bf16 %v717_v50  ;;  %v666_v60 = vunpack.c.l.bf16 %v711_v51  ;;  %v687_v61 = vunpack.c.h.bf16 %v716_v56  ;;  %v709_v63 = vld [vmem:[%s953_s5 + $0x8] sm:$0xff]   ;;  %v653_v4 = vld [vmem:[%s953_s5] sm:$0xff]   ;;  %s510_s5 = scalar_lea.vmem (%p877_p6), %s1015_s3, %s649_s28 }
  0x3f   : > { %466 = vmatpush.msra.mxu1 %v703_v34  ;;  %v663_v62 = vunpack.c.h.bf16 %v710_v58  ;;  %v686_v0 = vunpack.c.l.bf16 %v716_v56  ;;  %v662_v1 = vunpack.c.l.bf16 %v710_v58  ;;  %v659_v2 = vunpack.c.h.bf16 %v709_v63  ;;  %v373_v3 = vld [vmem:[%s1013_s1 + $0x8] sm:$0xff]  ;;  %v372_v8 = vld [vmem:[%s1013_s1] sm:$0xff]  ;;  %v375_v10 = vld [vmem:[%s1013_s1 + $0x18] sm:$0xff] }
  0x40   : > { %439 = vmatpush.msra.mxu0 %v679_v35  ;;  %723 = vmatpush.msra.mxu2 %v679_v35  ;;  %v658_v5 = vunpack.c.l.bf16 %v709_v63  ;;  %v655_v6 = vunpack.c.h.bf16 %v653_v4  ;;  %v654_v7 = vunpack.c.l.bf16 %v653_v4 }
  0x41   : > { %467 = vmatpush.msra.mxu1 %v702_v38 }
  0x42   : > { %440 = vmatpush.msra.mxu0 %v678_v39  ;;  %724 = vmatpush.msra.mxu2 %v678_v39 }
  0x43   : > { %468 = vmatpush.msra.mxu1 %v699_v40 }
  0x44   : > { %441 = vmatpush.msra.mxu0 %v675_v41  ;;  %725 = vmatpush.msra.mxu2 %v675_v41 }
  0x45   : > { %469 = vmatpush.msra.mxu1 %v698_v45  ;;  %365 = vperm.xlu0 %780, %v357_v57  }
  0x46   : > { %442 = vmatpush.msra.mxu0 %v674_v47  ;;  %726 = vmatpush.msra.mxu2 %v674_v47 }
  0x47   : > { %470 = vmatpush.msra.mxu1 %v695_v48 }
  0x48   : > { %443 = vmatpush.msra.mxu0 %v671_v49  ;;  %727 = vmatpush.msra.mxu2 %v671_v49 }
  0x49   : > { %471 = vmatpush.msra.mxu1 %v694_v52 }
  0x4a   : > { %444 = vmatpush.msra.mxu0 %v670_v53  ;;  %728 = vmatpush.msra.mxu2 %v670_v53 }
  0x4b   : > { %472 = vmatpush.msra.mxu1 %v691_v54 }
  0x4c   : > { %445 = vmatpush.msra.mxu0 %v667_v55  ;;  %729 = vmatpush.msra.mxu2 %v667_v55 }
  0x4d   : > { %473 = vmatpush.msra.mxu1 %v690_v59 }
  0x4e   : > { %446 = vmatpush.msra.mxu0 %v666_v60  ;;  %730 = vmatpush.msra.mxu2 %v666_v60 }
  0x4f   : > { %474 = vmatpush.msra.mxu1 %v687_v61 }
  0x50   : > { %447 = vmatpush.msra.mxu0 %v663_v62  ;;  %731 = vmatpush.msra.mxu2 %v663_v62 }
  0x51   : > { %475 = vmatpush.msra.mxu1 %v686_v0 }
  0x52   : > { %448 = vmatpush.msra.mxu0 %v662_v1  ;;  %732 = vmatpush.msra.mxu2 %v662_v1 }
  0x53   : > { %646 = vmatmul.msk.f32.vlgmr.msra.gmra.mxu1 %vm430_vm0, %v373_v3 }
  0x54   : > { %449 = vmatpush.msra.mxu0 %v659_v2  ;;  %733 = vmatpush.msra.mxu2 %v659_v2 }
  0x56   : > { %450 = vmatpush.msra.mxu0 %v658_v5  ;;  %734 = vmatpush.msra.mxu2 %v658_v5 }
  0x58   : > { %451 = vmatpush.msra.mxu0 %v655_v6  ;;  %735 = vmatpush.msra.mxu2 %v655_v6 }
  0x5a   : > { %452 = vmatpush.msra.mxu0 %v654_v7  ;;  %736 = vmatpush.msra.mxu2 %v654_v7 }
  0x5b   : > { %453 = vmatmul.f32.vlgmr.msra.gmra.mxu0 %v372_v8  ;;  %456 = vmatmul.f32.vlgmr.msra.gmra.mxu2 %v374_v9 }
  0x5c   : > { %647 = vmatmul.msk.f32.gmra.mxu1 %vm430_vm0, %v375_v10 }
  0xaf   : > { %v361_v12 = vpop.permute.xlu0 %360 }
  0xb7   : > { %v366_v19 = vpop.permute.xlu0 %365 }
  0xd0   : > { %v477_v11 = vpop.f32.mrf.mxu1 }
  0xd8   : > { %v454_v13 = vpop.f32.mrf.mxu0 }
  0xd9   : > { %v478_v14 = vadd.f32 %v477_v11, %v454_v13  ;;  %v480_v15 = vpop.f32.mrf.mxu1 }
  0xdb   : > { %v483_v16 = vadd.f32 %v478_v14, %v361_v12 }
  0xdd   : > { %v494_v20 = vmul.f32 0.02, %v483_v16  ;;  %vm492_vm1 = vcmp.ge.f32.partialorder %v483_v16, 0.0 }
  0xde   : > { %v457_v17 = vpop.f32.mrf.mxu2 }
  0xdf   : > { %v481_v18 = vadd.f32 %v480_v15, %v457_v17  ;;  %v496_v23 = vsel %vm492_vm1, %v483_v16, %v494_v20 }
  0xe1   : > { %v484_v21 = vadd.f32 %v481_v18, %v366_v19 }
  0xe3   : > { %vm493_vm2 = vcmp.ge.f32.partialorder %v484_v21, 0.0  ;;  %v495_v22 = vmul.f32 0.02, %v484_v21 }
  0xe4   : > { %508 = sbr.rel (!%p877_p6) target bundleno = 242 (0xf2), region = 85 }
  0xe5   : > { %v497_v24 = vsel %vm493_vm2, %v484_v21, %v495_v22 }
  0xe6   : > { %v707_v25 = vpack.c.bf16 %v497_v24, %v496_v23 }
  0xe8   : > { %708 = vst [vmem:[%s344_s27] sm:$0xff] %v707_v25  }
  0xef   : > { %v527_v26 = vld [vmem:[%s344_s27] sm:$0xf]  ;;  %v529_v27 = vld [vmem:[%s344_s27 + $0x4] sm:$0xf] }
  0xf0   : > { %528 = vst [vmem:[%s510_s5] sm:$0xf] %v527_v26 }
  0xf1   : > { %530 = vst [vmem:[%s510_s5 + $0x8] sm:$0xf] %v529_v27 }
  0xf2 PF: > { %s13_s16 = sadd.s32 1, %s819_s16   ;;  %s1017_s12 = smov %s807_s13 }
  0xf3   : > { %p10_p11 = scmp.ge.s32.totalorder %s13_s16, 4   ;;  %s1018_s13 = smov %s882_s22 }
  0xf4   : > { %s1019_s14 = smov %s815_s15  ;;  %s1020_s15 = smov %s1022_s17 }
  0xf5   :  { %12 = sbr.rel (!%p10_p11) target bundleno = 3 (0x3), region = 160 }

// kernel: discriminator_forward.8
= control target key start
LH: loop header
LB: loop body
LE: loop exit
PB: predicated region body
PF: predicated region fallthrough
CT: control target
= control target key end

     0   :  { %vm174_vm0 = vcmask 392192   ;;  %s666_s0 = inlined_call_operand.vmem [shape: bf16[432,128], index: 0, kind: input, shape index: {}]   ;;  %s667_s1 = inlined_call_operand.vmem [shape: f32[32,432], index: 1, kind: input, shape index: {}]   ;;  %s668_s2 = inlined_call_operand.vmem [shape: f32[32,1], index: 2, kind: input, shape index: {}]   ;;  %s669_s3 = inlined_call_operand.vmem [shape: bf16[32,128], index: 3, kind: output, shape index: {}]  }
   0x1   :  { %v486_v0 = vld [vmem:[%s666_s0 + $0xb8] sm:$0xff]   ;;  %v485_v7 = vld [vmem:[%s666_s0 + $0xb0] sm:$0xff]   ;;  %v484_v15 = vld [vmem:[%s666_s0 + $0xa8] sm:$0xff]  }
   0x2   :  { %v470_v1 = vld [vmem:[%s666_s0 + $0x38] sm:$0xff]   ;;  %v441_v3 = vunpack.c.h.bf16 %v486_v0  ;;  %v440_v4 = vunpack.c.l.bf16 %v486_v0  ;;  %v469_v8 = vld [vmem:[%s666_s0 + $0x30] sm:$0xff]   ;;  %v437_v12 = vunpack.c.h.bf16 %v485_v7  ;;  %v468_v16 = vld [vmem:[%s666_s0 + $0x28] sm:$0xff]   ;;  %v436_v17 = vunpack.c.l.bf16 %v485_v7 }
   0x3   :  { %v478_v2 = vld [vmem:[%s666_s0 + $0x78] sm:$0xff]   ;;  %v377_v5 = vunpack.c.h.bf16 %v470_v1  ;;  %v477_v9 = vld [vmem:[%s666_s0 + $0x70] sm:$0xff]   ;;  %v376_v10 = vunpack.c.l.bf16 %v470_v1  ;;  %v373_v13 = vunpack.c.h.bf16 %v469_v8  ;;  %v372_v18 = vunpack.c.l.bf16 %v469_v8  ;;  %v476_v19 = vld [vmem:[%s666_s0 + $0x68] sm:$0xff]  }
   0x4   :  { %v409_v6 = vunpack.c.h.bf16 %v478_v2  ;;  %v408_v11 = vunpack.c.l.bf16 %v478_v2  ;;  %245 = vmatpush.msra.mxu2 %v441_v3  ;;  %v405_v14 = vunpack.c.h.bf16 %v477_v9  ;;  %v404_v20 = vunpack.c.l.bf16 %v477_v9  ;;  %v489_v21 = vld [vmem:[%s666_s0 + $0xd0] sm:$0xff]   ;;  %v483_v25 = vld [vmem:[%s666_s0 + $0xa0] sm:$0xff]   ;;  %v488_v31 = vld [vmem:[%s666_s0 + $0xc8] sm:$0xff]  }
   0x5   :  { %187 = vmatpush.msra.mxu0 %v377_v5  ;;  %v433_v22 = vunpack.c.h.bf16 %v484_v15  ;;  %v369_v23 = vunpack.c.h.bf16 %v468_v16  ;;  %v401_v24 = vunpack.c.h.bf16 %v476_v19  ;;  %v467_v26 = vld [vmem:[%s666_s0 + $0x20] sm:$0xff]   ;;  %v432_v27 = vunpack.c.l.bf16 %v484_v15  ;;  %v482_v37 = vld [vmem:[%s666_s0 + $0x98] sm:$0xff]   ;;  %v481_v49 = vld [vmem:[%s666_s0 + $0x90] sm:$0xff]  }
   0x6   :  { %216 = vmatpush.msra.mxu1 %v409_v6  ;;  %246 = vmatpush.msra.mxu2 %v440_v4  ;;  %v368_v28 = vunpack.c.l.bf16 %v468_v16  ;;  %v475_v29 = vld [vmem:[%s666_s0 + $0x60] sm:$0xff]   ;;  %v453_v30 = vunpack.c.h.bf16 %v489_v21  ;;  %v400_v32 = vunpack.c.l.bf16 %v476_v19  ;;  %v452_v33 = vunpack.c.l.bf16 %v489_v21  ;;  %v466_v38 = vld [vmem:[%s666_s0 + $0x18] sm:$0xff]   ;;  %v465_v50 = vld [vmem:[%s666_s0 + $0x10] sm:$0xff]  }
   0x7   :  { %188 = vmatpush.msra.mxu0 %v376_v10  ;;  %v429_v34 = vunpack.c.h.bf16 %v483_v25  ;;  %v365_v35 = vunpack.c.h.bf16 %v467_v26  ;;  %v397_v36 = vunpack.c.h.bf16 %v475_v29  ;;  %v449_v39 = vunpack.c.h.bf16 %v488_v31  ;;  %v474_v42 = vld [vmem:[%s666_s0 + $0x58] sm:$0xff]   ;;  %v487_v43 = vld [vmem:[%s666_s0 + $0xc0] sm:$0xff]   ;;  %v473_v54 = vld [vmem:[%s666_s0 + $0x50] sm:$0xff]  }
   0x8   :  { %217 = vmatpush.msra.mxu1 %v408_v11  ;;  %247 = vmatpush.msra.mxu2 %v437_v12  ;;  %v428_v40 = vunpack.c.l.bf16 %v483_v25  ;;  %v364_v41 = vunpack.c.l.bf16 %v467_v26  ;;  %v396_v44 = vunpack.c.l.bf16 %v475_v29  ;;  %v448_v45 = vunpack.c.l.bf16 %v488_v31  ;;  %v480_v60 = vld [vmem:[%s666_s0 + $0x88] sm:$0xff]   ;;  %v53_v1 = vld [vmem:[%s667_s1 + $0x18] sm:$0xff]  ;;  %v479_v6 = vld [vmem:[%s666_s0 + $0x80] sm:$0xff]  }
   0x9   :  { %189 = vmatpush.msra.mxu0 %v373_v13  ;;  %284 = vmatpush.msra.mxu3 %v453_v30  ;;  %v425_v46 = vunpack.c.h.bf16 %v482_v37  ;;  %v361_v47 = vunpack.c.h.bf16 %v466_v38  ;;  %v393_v48 = vunpack.c.h.bf16 %v474_v42  ;;  %v445_v51 = vunpack.c.h.bf16 %v487_v43  ;;  %v464_v61 = vld [vmem:[%s666_s0 + $0x8] sm:$0xff]   ;;  %v347_v7 = vld [vmem:[%s666_s0] sm:$0xff]   ;;  %v57_v19 = vld [vmem:[%s667_s1 + $0x38] sm:$0xff] }
   0xa   :  { %218 = vmatpush.msra.mxu1 %v405_v14  ;;  %248 = vmatpush.msra.mxu2 %v436_v17  ;;  %v424_v52 = vunpack.c.l.bf16 %v482_v37  ;;  %v360_v53 = vunpack.c.l.bf16 %v466_v38  ;;  %v392_v55 = vunpack.c.l.bf16 %v474_v42  ;;  %v444_v56 = vunpack.c.l.bf16 %v487_v43  ;;  %v472_v0 = vld [vmem:[%s666_s0 + $0x48] sm:$0xff]   ;;  %v471_v10 = vld [vmem:[%s666_s0 + $0x40] sm:$0xff]   ;;  %v52_v21 = vld [vmem:[%s667_s1 + $0x10] sm:$0xff] }
   0xb   :  { %190 = vmatpush.msra.mxu0 %v372_v18  ;;  %285 = vmatpush.msra.mxu3 %v452_v33  ;;  %v421_v57 = vunpack.c.h.bf16 %v481_v49  ;;  %v357_v58 = vunpack.c.h.bf16 %v465_v50  ;;  %v389_v59 = vunpack.c.h.bf16 %v473_v54  ;;  %v420_v62 = vunpack.c.l.bf16 %v481_v49  ;;  %v18_v11 = vld [vmem:[%s668_s2] sm:$0xff]  ;;  %v19_v25 = vld [vmem:[%s668_s2 + $0x8] sm:$0xff]  ;;  %v61_v26 = vld [vmem:[%s667_s1 + $0x58] sm:$0xff] }
   0xc   :  { %219 = vmatpush.msra.mxu1 %v404_v20  ;;  %249 = vmatpush.msra.mxu2 %v433_v22  ;;  %v356_v63 = vunpack.c.l.bf16 %v465_v50  ;;  %v388_v2 = vunpack.c.l.bf16 %v473_v54  ;;  %v417_v3 = vunpack.c.h.bf16 %v480_v60  ;;  %v353_v4 = vunpack.c.h.bf16 %v464_v61  ;;  %v50_v22 = vld [vmem:[%s667_s1] sm:$0xff]  ;;  %v55_v29 = vld [vmem:[%s667_s1 + $0x28] sm:$0xff]  ;;  %v21_v30 = vld [vmem:[%s668_s2 + $0x18] sm:$0xff] }
   0xd   :  { %191 = vmatpush.msra.mxu0 %v369_v23  ;;  %286 = vmatpush.msra.mxu3 %v449_v39  ;;  %v385_v5 = vunpack.c.h.bf16 %v472_v0  ;;  %v416_v8 = vunpack.c.l.bf16 %v480_v60  ;;  %v352_v9 = vunpack.c.l.bf16 %v464_v61  ;;  %v384_v12 = vunpack.c.l.bf16 %v472_v0  ;;  %v51_v23 = vld [vmem:[%s667_s1 + $0x8] sm:$0xff]  ;;  %v65_v31 = vld [vmem:[%s667_s1 + $0x78] sm:$0xff]  ;;  %v58_v33 = vld [vmem:[%s667_s1 + $0x40] sm:$0xff] }
   0xe   :  { %220 = vmatpush.msra.mxu1 %v401_v24  ;;  %250 = vmatpush.msra.mxu2 %v432_v27  ;;  %v494_v13 = vmov 0   ;;  %v413_v14 = vunpack.c.h.bf16 %v479_v6  ;;  %v349_v15 = vunpack.c.h.bf16 %v347_v7  ;;  %v381_v16 = vunpack.c.h.bf16 %v471_v10  ;;  %v20_v24 = vld [vmem:[%s668_s2 + $0x10] sm:$0xff]  ;;  %v63_v37 = vld [vmem:[%s667_s1 + $0x68] sm:$0xff] }
   0xf   :  { %192 = vmatpush.msra.mxu0 %v368_v28  ;;  %287 = vmatpush.msra.mxu3 %v448_v45  ;;  %v412_v17 = vunpack.c.l.bf16 %v479_v6  ;;  %v348_v18 = vunpack.c.l.bf16 %v347_v7  ;;  %v380_v20 = vunpack.c.l.bf16 %v471_v10  ;;  %v56_v27 = vld [vmem:[%s667_s1 + $0x30] sm:$0xff]  ;;  %v54_v28 = vld [vmem:[%s667_s1 + $0x20] sm:$0xff] }
  0x10   :  { %221 = vmatpush.msra.mxu1 %v400_v32  ;;  %251 = vmatpush.msra.mxu2 %v429_v34  ;;  %v60_v32 = vld [vmem:[%s667_s1 + $0x50] sm:$0xff]  ;;  %v59_v34 = vld [vmem:[%s667_s1 + $0x48] sm:$0xff] }
  0x11   :  { %193 = vmatpush.msra.mxu0 %v365_v35  ;;  %288 = vmatpush.msra.mxu3 %v445_v51  ;;  %v64_v35 = vld [vmem:[%s667_s1 + $0x70] sm:$0xff] }
  0x12   :  { %222 = vmatpush.msra.mxu1 %v397_v36  ;;  %252 = vmatpush.msra.mxu2 %v428_v40  ;;  %v62_v36 = vld [vmem:[%s667_s1 + $0x60] sm:$0xff] }
  0x13   :  { %194 = vmatpush.msra.mxu0 %v364_v41  ;;  %289 = vmatpush.msra.mxu3 %v444_v56 }
  0x14   :  { %223 = vmatpush.msra.mxu1 %v396_v44  ;;  %253 = vmatpush.msra.mxu2 %v425_v46 }
  0x15   :  { %195 = vmatpush.msra.mxu0 %v361_v47  ;;  %342 = vmatmul.msk.f32.vlgmr.msra.gmra.mxu3 %vm174_vm0, %v53_v1 }
  0x16   :  { %224 = vmatpush.msra.mxu1 %v393_v48  ;;  %254 = vmatpush.msra.mxu2 %v424_v52 }
  0x17   :  { %196 = vmatpush.msra.mxu0 %v360_v53  ;;  %492 = vset.pattern.permute.xlu0 %v494_v13 }
  0x18   :  { %225 = vmatpush.msra.mxu1 %v392_v55  ;;  %255 = vmatpush.msra.mxu2 %v421_v57 }
  0x19   :  { %197 = vmatpush.msra.mxu0 %v357_v58  ;;  %24 = vperm.xlu0 %492, %v18_v11  }
  0x1a   :  { %226 = vmatpush.msra.mxu1 %v389_v59  ;;  %256 = vmatpush.msra.mxu2 %v420_v62 }
  0x1b   :  { %198 = vmatpush.msra.mxu0 %v356_v63  ;;  %493 = vset.pattern.permute.xlu1 %v494_v13 }
  0x1c   :  { %227 = vmatpush.msra.mxu1 %v388_v2  ;;  %257 = vmatpush.msra.mxu2 %v417_v3 }
  0x1d   :  { %199 = vmatpush.msra.mxu0 %v353_v4  ;;  %343 = vmatmul.msk.f32.gmra.mxu3 %vm174_vm0, %v57_v19 }
  0x1e   :  { %228 = vmatpush.msra.mxu1 %v385_v5  ;;  %258 = vmatpush.msra.mxu2 %v416_v8 }
  0x1f   :  { %200 = vmatpush.msra.mxu0 %v352_v9  ;;  %34 = vperm.xlu1 %493, %v20_v24  }
  0x20   :  { %229 = vmatpush.msra.mxu1 %v384_v12  ;;  %259 = vmatpush.msra.mxu2 %v413_v14 }
  0x21   :  { %201 = vmatpush.msra.mxu0 %v349_v15  ;;  %29 = vperm.xlu0 %492, %v19_v25  }
  0x22   :  { %230 = vmatpush.msra.mxu1 %v381_v16  ;;  %260 = vmatpush.msra.mxu2 %v412_v17 }
  0x23   :  { %202 = vmatpush.msra.mxu0 %v348_v18  ;;  %261 = vmatmul.f32.vlgmr.msra.gmra.mxu2 %v52_v21 }
  0x24   :  { %231 = vmatpush.msra.mxu1 %v380_v20  ;;  %203 = vmatmul.f32.vlgmr.msra.gmra.mxu0 %v50_v22 }
  0x25   :  { %232 = vmatmul.f32.vlgmr.msra.gmra.mxu1 %v51_v23  ;;  %344 = vmatmul.msk.f32.gmra.mxu3 %vm174_vm0, %v61_v26 }
  0x27   :  { %39 = vperm.xlu1 %493, %v21_v30  }
  0x2b   :  { %264 = vmatmul.f32.gmra.mxu2 %v56_v27 }
  0x2c   :  { %206 = vmatmul.f32.gmra.mxu0 %v54_v28 }
  0x2d   :  { %235 = vmatmul.f32.gmra.mxu1 %v55_v29  ;;  %345 = vmatmul.msk.f32.gmra.mxu3 %vm174_vm0, %v65_v31 }
  0x33   :  { %267 = vmatmul.f32.gmra.mxu2 %v60_v32 }
  0x34   :  { %209 = vmatmul.f32.gmra.mxu0 %v58_v33 }
  0x35   :  { %238 = vmatmul.f32.gmra.mxu1 %v59_v34 }
  0x3b   :  { %270 = vmatmul.f32.gmra.mxu2 %v64_v35 }
  0x3c   :  { %212 = vmatmul.f32.gmra.mxu0 %v62_v36 }
  0x3d   :  { %241 = vmatmul.f32.gmra.mxu1 %v63_v37 }
  0x8b   :  { %v25_v43 = vpop.permute.xlu0 %24 }
  0x91   :  { %v35_v2 = vpop.permute.xlu1 %34 }
  0x93   :  { %v30_v53 = vpop.permute.xlu0 %29 }
  0x98   :  { %v291_v38 = vpop.f32.mrf.mxu3 }
  0x99   :  { %v40_v13 = vpop.permute.xlu1 %39 }
  0xa0   :  { %v294_v47 = vpop.f32.mrf.mxu3 }
  0xa1   :  { %v204_v39 = vpop.f32.mrf.mxu0 }
  0xa2   :  { %v233_v40 = vpop.f32.mrf.mxu1 }
  0xa3   :  { %v234_v41 = vadd.f32 %v233_v40, %v204_v39 }
  0xa6   :  { %v262_v42 = vpop.f32.mrf.mxu2 }
  0xa7   :  { %v263_v44 = vadd.f32 %v262_v42, %v234_v41 }
  0xa8   :  { %v297_v60 = vpop.f32.mrf.mxu3 }
  0xa9   :  { %v207_v45 = vpop.f32.mrf.mxu0  ;;  %v292_v48 = vadd.f32 %v291_v38, %v263_v44 }
  0xaa   :  { %v236_v46 = vpop.f32.mrf.mxu1 }
  0xab   :  { %v237_v49 = vadd.f32 %v236_v46, %v207_v45  ;;  %v303_v51 = vadd.f32 %v292_v48, %v25_v43 }
  0xad   :  { %v322_v57 = vmul.f32 0.02, %v303_v51  ;;  %vm318_vm1 = vcmp.ge.f32.partialorder %v303_v51, 0.0 }
  0xae   :  { %v265_v50 = vpop.f32.mrf.mxu2 }
  0xaf   :  { %v266_v52 = vadd.f32 %v265_v50, %v237_v49  ;;  %v326_v63 = vsel %vm318_vm1, %v303_v51, %v322_v57 }
  0xb0   :  { %v300_v9 = vpop.f32.mrf.mxu3 }
  0xb1   :  { %v295_v54 = vadd.f32 %v294_v47, %v266_v52  ;;  %v210_v55 = vpop.f32.mrf.mxu0 }
  0xb2   :  { %v239_v56 = vpop.f32.mrf.mxu1 }
  0xb3   :  { %v304_v58 = vadd.f32 %v295_v54, %v30_v53  ;;  %v240_v59 = vadd.f32 %v239_v56, %v210_v55 }
  0xb5   :  { %vm319_vm2 = vcmp.ge.f32.partialorder %v304_v58, 0.0  ;;  %v323_v61 = vmul.f32 0.02, %v304_v58 }
  0xb6   :  { %v268_v62 = vpop.f32.mrf.mxu2 }
  0xb7   :  { %v327_v0 = vsel %vm319_vm2, %v304_v58, %v323_v61  ;;  %v269_v1 = vadd.f32 %v268_v62, %v240_v59 }
  0xb8   :  { %v457_v3 = vpack.c.bf16 %v327_v0, %v326_v63 }
  0xb9   :  { %v213_v4 = vpop.f32.mrf.mxu0  ;;  %v298_v6 = vadd.f32 %v297_v60, %v269_v1 }
  0xba   :  { %v242_v5 = vpop.f32.mrf.mxu1  ;;  %458 = vst [vmem:[%s669_s3] sm:$0xff] %v457_v3  }
  0xbb   :  { %v243_v7 = vadd.f32 %v242_v5, %v213_v4  ;;  %v305_v10 = vadd.f32 %v298_v6, %v35_v2 }
  0xbd   :  { %v324_v14 = vmul.f32 0.02, %v305_v10  ;;  %vm320_vm3 = vcmp.ge.f32.partialorder %v305_v10, 0.0 }
  0xbe   :  { %v271_v8 = vpop.f32.mrf.mxu2 }
  0xbf   :  { %v272_v11 = vadd.f32 %v271_v8, %v243_v7  ;;  %v328_v17 = vsel %vm320_vm3, %v305_v10, %v324_v14 }
  0xc1   :  { %v301_v12 = vadd.f32 %v300_v9, %v272_v11 }
  0xc3   :  { %v306_v15 = vadd.f32 %v301_v12, %v40_v13 }
  0xc5   :  { %vm321_vm4 = vcmp.ge.f32.partialorder %v306_v15, 0.0  ;;  %v325_v16 = vmul.f32 0.02, %v306_v15 }
  0xc7   :  { %v329_v18 = vsel %vm321_vm4, %v306_v15, %v325_v16 }
  0xc8   :  { %v462_v19 = vpack.c.bf16 %v329_v18, %v328_v17 }
  0xca   :  { %490 = vst [vmem:[%s669_s3 + $0x8] sm:$0xff] %v462_v19  }

// kernel: discriminator_forward.9
= control target key start
LH: loop header
LB: loop body
LE: loop exit
PB: predicated region body
PF: predicated region fallthrough
CT: control target
= control target key end

     0   :  { %vm360_vm0 = vcmask 785408   ;;  %vm730_vm9 = vcmask 523264   ;;  %s1608_s0 = inlined_call_operand.vmem [shape: bf16[864,128], index: 0, kind: input, shape index: {}]   ;;  %s1609_s1 = inlined_call_operand.vmem [shape: f32[64,864], index: 1, kind: input, shape index: {}]   ;;  %s1610_s2 = inlined_call_operand.vmem [shape: f32[64,1], index: 2, kind: input, shape index: {}]   ;;  %s1611_s4 = inlined_call_operand.vmem [shape: f32[8,1], index: 4, kind: input, shape index: {}]   ;;  %s1612_s3 = inlined_call_operand.vmem [shape: f32[8,64], index: 3, kind: input, shape index: {}]   ;;  %s1613_s5 = inlined_call_operand.vmem [shape: f32[8,128], index: 5, kind: output, shape index: {}]  }
   0x1   :  { %v1013_v0 = vld [vmem:[%s1608_s0 + $0x38] sm:$0xff]   ;;  %v1012_v7 = vld [vmem:[%s1608_s0 + $0x30] sm:$0xff]   ;;  %v1011_v15 = vld [vmem:[%s1608_s0 + $0x28] sm:$0xff]  }
   0x2   :  { %v1021_v1 = vld [vmem:[%s1608_s0 + $0x78] sm:$0xff]   ;;  %v822_v3 = vunpack.c.h.bf16 %v1013_v0  ;;  %v821_v6 = vunpack.c.l.bf16 %v1013_v0  ;;  %v1020_v8 = vld [vmem:[%s1608_s0 + $0x70] sm:$0xff]   ;;  %v818_v12 = vunpack.c.h.bf16 %v1012_v7  ;;  %v817_v16 = vunpack.c.l.bf16 %v1012_v7  ;;  %v1019_v17 = vld [vmem:[%s1608_s0 + $0x68] sm:$0xff]  }
   0x3   :  { %v1029_v2 = vld [vmem:[%s1608_s0 + $0xb8] sm:$0xff]   ;;  %v854_v4 = vunpack.c.h.bf16 %v1021_v1  ;;  %v1028_v9 = vld [vmem:[%s1608_s0 + $0xb0] sm:$0xff]   ;;  %v853_v10 = vunpack.c.l.bf16 %v1021_v1  ;;  %v850_v13 = vunpack.c.h.bf16 %v1020_v8  ;;  %v1027_v18 = vld [vmem:[%s1608_s0 + $0xa8] sm:$0xff]   ;;  %v849_v19 = vunpack.c.l.bf16 %v1020_v8 }
   0x4   :  { %v886_v5 = vunpack.c.h.bf16 %v1029_v2  ;;  %v885_v11 = vunpack.c.l.bf16 %v1029_v2  ;;  %385 = vmatpush.msra.mxu0 %v822_v3  ;;  %1060 = vmatpush.msra.mxu3 %v822_v3  ;;  %v882_v14 = vunpack.c.h.bf16 %v1028_v9  ;;  %v881_v20 = vunpack.c.l.bf16 %v1028_v9  ;;  %v1010_v24 = vld [vmem:[%s1608_s0 + $0x20] sm:$0xff]   ;;  %v1009_v33 = vld [vmem:[%s1608_s0 + $0x18] sm:$0xff]   ;;  %v1008_v42 = vld [vmem:[%s1608_s0 + $0x10] sm:$0xff]  }
   0x5   :  { %426 = vmatpush.msra.mxu1 %v854_v4  ;;  %v814_v21 = vunpack.c.h.bf16 %v1011_v15  ;;  %v846_v22 = vunpack.c.h.bf16 %v1019_v17  ;;  %v878_v23 = vunpack.c.h.bf16 %v1027_v18  ;;  %v813_v25 = vunpack.c.l.bf16 %v1011_v15  ;;  %v1018_v26 = vld [vmem:[%s1608_s0 + $0x60] sm:$0xff]   ;;  %v1017_v35 = vld [vmem:[%s1608_s0 + $0x58] sm:$0xff]   ;;  %v1016_v44 = vld [vmem:[%s1608_s0 + $0x50] sm:$0xff]  }
   0x6   :  { %467 = vmatpush.msra.mxu2 %v886_v5  ;;  %386 = vmatpush.msra.mxu0 %v821_v6  ;;  %v1026_v27 = vld [vmem:[%s1608_s0 + $0xa0] sm:$0xff]   ;;  %v845_v28 = vunpack.c.l.bf16 %v1019_v17  ;;  %v877_v29 = vunpack.c.l.bf16 %v1027_v18  ;;  %v810_v30 = vunpack.c.h.bf16 %v1010_v24  ;;  %v842_v31 = vunpack.c.h.bf16 %v1018_v26  ;;  %v1025_v36 = vld [vmem:[%s1608_s0 + $0x98] sm:$0xff]   ;;  %v1024_v45 = vld [vmem:[%s1608_s0 + $0x90] sm:$0xff]  }
   0x7   :  { %1061 = vmatpush.msra.mxu3 %v821_v6  ;;  %427 = vmatpush.msra.mxu1 %v853_v10  ;;  %v874_v32 = vunpack.c.h.bf16 %v1026_v27  ;;  %v809_v34 = vunpack.c.l.bf16 %v1010_v24  ;;  %v841_v37 = vunpack.c.l.bf16 %v1018_v26  ;;  %v873_v38 = vunpack.c.l.bf16 %v1026_v27  ;;  %v1007_v51 = vld [vmem:[%s1608_s0 + $0x8] sm:$0xff]   ;;  %v792_v60 = vld [vmem:[%s1608_s0] sm:$0xff]   ;;  %v1037_v8 = vld [vmem:[%s1608_s0 + $0xf8] sm:$0xff]  }
   0x8   :  { %468 = vmatpush.msra.mxu2 %v885_v11  ;;  %387 = vmatpush.msra.mxu0 %v818_v12  ;;  %v806_v39 = vunpack.c.h.bf16 %v1009_v33  ;;  %v838_v40 = vunpack.c.h.bf16 %v1017_v35  ;;  %v870_v41 = vunpack.c.h.bf16 %v1025_v36  ;;  %v805_v43 = vunpack.c.l.bf16 %v1009_v33  ;;  %v1015_v53 = vld [vmem:[%s1608_s0 + $0x48] sm:$0xff]   ;;  %v1014_v62 = vld [vmem:[%s1608_s0 + $0x40] sm:$0xff]   ;;  %v1045_v9 = vld [vmem:[%s1608_s0 + $0x138] sm:$0xff]  }
   0x9   :  { %1062 = vmatpush.msra.mxu3 %v818_v12  ;;  %428 = vmatpush.msra.mxu1 %v850_v13  ;;  %v837_v46 = vunpack.c.l.bf16 %v1017_v35  ;;  %v869_v47 = vunpack.c.l.bf16 %v1025_v36  ;;  %v802_v48 = vunpack.c.h.bf16 %v1008_v42  ;;  %v834_v49 = vunpack.c.h.bf16 %v1016_v44  ;;  %v1023_v54 = vld [vmem:[%s1608_s0 + $0x88] sm:$0xff]   ;;  %v1022_v63 = vld [vmem:[%s1608_s0 + $0x80] sm:$0xff]   ;;  %v90_v13 = vld [vmem:[%s1609_s1 + $0x10] sm:$0xff] }
   0xa   :  { %469 = vmatpush.msra.mxu2 %v882_v14  ;;  %388 = vmatpush.msra.mxu0 %v817_v16  ;;  %v866_v50 = vunpack.c.h.bf16 %v1024_v45  ;;  %v801_v52 = vunpack.c.l.bf16 %v1008_v42  ;;  %v833_v55 = vunpack.c.l.bf16 %v1016_v44  ;;  %v865_v56 = vunpack.c.l.bf16 %v1024_v45  ;;  %v88_v10 = vld [vmem:[%s1609_s1] sm:$0xff]  ;;  %v89_v12 = vld [vmem:[%s1609_s1 + $0x8] sm:$0xff]  ;;  %v1044_v17 = vld [vmem:[%s1608_s0 + $0x130] sm:$0xff]  }
   0xb   :  { %1063 = vmatpush.msra.mxu3 %v817_v16  ;;  %429 = vmatpush.msra.mxu1 %v849_v19  ;;  %v798_v57 = vunpack.c.h.bf16 %v1007_v51  ;;  %v830_v58 = vunpack.c.h.bf16 %v1015_v53  ;;  %v862_v59 = vunpack.c.h.bf16 %v1023_v54  ;;  %v797_v61 = vunpack.c.l.bf16 %v1007_v51  ;;  %v116_v11 = vld [vmem:[%s1609_s1 + $0xe0] sm:$0xff]  ;;  %v1036_v16 = vld [vmem:[%s1608_s0 + $0xf0] sm:$0xff]   ;;  %v1035_v24 = vld [vmem:[%s1608_s0 + $0xe8] sm:$0xff]  }
   0xc   :  { %470 = vmatpush.msra.mxu2 %v881_v20  ;;  %389 = vmatpush.msra.mxu0 %v814_v21  ;;  %v829_v0 = vunpack.c.l.bf16 %v1015_v53  ;;  %v861_v1 = vunpack.c.l.bf16 %v1023_v54  ;;  %v794_v2 = vunpack.c.h.bf16 %v792_v60  ;;  %v826_v3 = vunpack.c.h.bf16 %v1014_v62  ;;  %v1236_v26 = vld [vmem:[%s1608_s0 + $0x178] sm:$0xff]   ;;  %v1034_v35 = vld [vmem:[%s1608_s0 + $0xe0] sm:$0xff]   ;;  %v1283_v51 = vld [vmem:[%s1608_s0 + $0x168] sm:$0xff]  }
   0xd   :  { %1064 = vmatpush.msra.mxu3 %v814_v21  ;;  %430 = vmatpush.msra.mxu1 %v846_v22  ;;  %v858_v4 = vunpack.c.h.bf16 %v1022_v63  ;;  %v793_v5 = vunpack.c.l.bf16 %v792_v60  ;;  %v825_v6 = vunpack.c.l.bf16 %v1014_v62  ;;  %v857_v7 = vunpack.c.l.bf16 %v1022_v63  ;;  %v1042_v36 = vld [vmem:[%s1608_s0 + $0x120] sm:$0xff]   ;;  %v102_v53 = vld [vmem:[%s1609_s1 + $0x70] sm:$0xff] }
   0xe   :  { %471 = vmatpush.msra.mxu2 %v878_v23  ;;  %390 = vmatpush.msra.mxu0 %v813_v25  ;;  %v918_v14 = vunpack.c.h.bf16 %v1037_v8  ;;  %v950_v15 = vunpack.c.h.bf16 %v1045_v9  ;;  %v917_v18 = vunpack.c.l.bf16 %v1037_v8  ;;  %v949_v19 = vunpack.c.l.bf16 %v1045_v9  ;;  %v130_v54 = vld [vmem:[%s1609_s1 + $0x150] sm:$0xff] }
   0xf   :  { %1065 = vmatpush.msra.mxu3 %v813_v25  ;;  %431 = vmatpush.msra.mxu1 %v845_v28  ;;  %v914_v20 = vunpack.c.h.bf16 %v1036_v16  ;;  %v946_v21 = vunpack.c.h.bf16 %v1044_v17  ;;  %v913_v22 = vunpack.c.l.bf16 %v1036_v16  ;;  %v945_v23 = vunpack.c.l.bf16 %v1044_v17  ;;  %v1043_v25 = vld [vmem:[%s1608_s0 + $0x128] sm:$0xff]   ;;  %v95_v28 = vld [vmem:[%s1609_s1 + $0x38] sm:$0xff]  ;;  %v1040_v60 = vld [vmem:[%s1608_s0 + $0x110] sm:$0xff]  }
  0x10   :  { %472 = vmatpush.msra.mxu2 %v877_v29  ;;  %391 = vmatpush.msra.mxu0 %v810_v30  ;;  %v982_v27 = vunpack.c.h.bf16 %v1236_v26  ;;  %v123_v29 = vld [vmem:[%s1609_s1 + $0x118] sm:$0xff]  ;;  %v942_v33 = vunpack.c.h.bf16 %v1043_v25  ;;  %v938_v42 = vunpack.c.h.bf16 %v1042_v36 }
  0x11   :  { %1066 = vmatpush.msra.mxu3 %v810_v30  ;;  %432 = vmatpush.msra.mxu1 %v842_v31  ;;  %v96_v30 = vld [vmem:[%s1609_s1 + $0x40] sm:$0xff]  ;;  %v97_v31 = vld [vmem:[%s1609_s1 + $0x48] sm:$0xff]  ;;  %v111_v16 = vld [vmem:[%s1609_s1 + $0xb8] sm:$0xff] }
  0x12   :  { %473 = vmatpush.msra.mxu2 %v874_v32  ;;  %392 = vmatpush.msra.mxu0 %v809_v34  ;;  %v910_v32 = vunpack.c.h.bf16 %v1035_v24 }
  0x13   :  { %1067 = vmatpush.msra.mxu3 %v809_v34  ;;  %433 = vmatpush.msra.mxu1 %v841_v37  ;;  %v1256_v34 = vld [vmem:[%s1608_s0 + $0x170] sm:$0xff]   ;;  %v981_v37 = vunpack.c.l.bf16 %v1236_v26 }
  0x14   :  { %474 = vmatpush.msra.mxu2 %v873_v38  ;;  %393 = vmatpush.msra.mxu0 %v806_v39  ;;  %v909_v38 = vunpack.c.l.bf16 %v1035_v24  ;;  %v977_v44 = vunpack.c.l.bf16 %v1256_v34 }
  0x15   :  { %1068 = vmatpush.msra.mxu3 %v806_v39  ;;  %434 = vmatpush.msra.mxu1 %v838_v40  ;;  %v941_v39 = vunpack.c.l.bf16 %v1043_v25  ;;  %v978_v40 = vunpack.c.h.bf16 %v1256_v34  ;;  %v105_v34 = vld [vmem:[%s1609_s1 + $0x88] sm:$0xff] }
  0x16   :  { %475 = vmatpush.msra.mxu2 %v870_v41  ;;  %394 = vmatpush.msra.mxu0 %v805_v43  ;;  %v906_v41 = vunpack.c.h.bf16 %v1034_v35 }
  0x17   :  { %1069 = vmatpush.msra.mxu3 %v805_v43  ;;  %435 = vmatpush.msra.mxu1 %v837_v46  ;;  %v1059_v43 = vld [vmem:[%s1608_s0 + $0x1a8] sm:$0xff]   ;;  %v905_v46 = vunpack.c.l.bf16 %v1034_v35 }
  0x18   :  { %476 = vmatpush.msra.mxu2 %v869_v47  ;;  %395 = vmatpush.msra.mxu0 %v802_v48  ;;  %v1006_v45 = vunpack.c.h.bf16 %v1059_v43  ;;  %v937_v47 = vunpack.c.l.bf16 %v1042_v36 }
  0x19   :  { %1070 = vmatpush.msra.mxu3 %v802_v48  ;;  %436 = vmatpush.msra.mxu1 %v834_v49  ;;  %v1033_v48 = vld [vmem:[%s1608_s0 + $0xd8] sm:$0xff]  }
  0x1a   :  { %477 = vmatpush.msra.mxu2 %v866_v50  ;;  %396 = vmatpush.msra.mxu0 %v801_v52  ;;  %v1041_v49 = vld [vmem:[%s1608_s0 + $0x118] sm:$0xff]   ;;  %v1005_v50 = vunpack.c.l.bf16 %v1059_v43  ;;  %v901_v63 = vunpack.c.l.bf16 %v1033_v48  ;;  %v118_v43 = vld [vmem:[%s1609_s1 + $0xf0] sm:$0xff] }
  0x1b   :  { %1071 = vmatpush.msra.mxu3 %v801_v52  ;;  %437 = vmatpush.msra.mxu1 %v833_v55  ;;  %v1058_v52 = vld [vmem:[%s1608_s0 + $0x1a0] sm:$0xff]   ;;  %v103_v55 = vld [vmem:[%s1609_s1 + $0x78] sm:$0xff] }
  0x1c   :  { %478 = vmatpush.msra.mxu2 %v865_v56  ;;  %397 = vmatpush.msra.mxu0 %v798_v57  ;;  %v104_v56 = vld [vmem:[%s1609_s1 + $0x80] sm:$0xff]  ;;  %v1002_v62 = vunpack.c.h.bf16 %v1058_v52 }
  0x1d   :  { %1072 = vmatpush.msra.mxu3 %v798_v57  ;;  %438 = vmatpush.msra.mxu1 %v830_v58  ;;  %v902_v57 = vunpack.c.h.bf16 %v1033_v48  ;;  %v934_v58 = vunpack.c.h.bf16 %v1041_v49 }
  0x1e   :  { %479 = vmatpush.msra.mxu2 %v862_v59  ;;  %398 = vmatpush.msra.mxu0 %v797_v61  ;;  %v1032_v59 = vld [vmem:[%s1608_s0 + $0xd0] sm:$0xff]  }
  0x1f   :  { %1073 = vmatpush.msra.mxu3 %v797_v61  ;;  %439 = vmatpush.msra.mxu1 %v829_v0  ;;  %v974_v61 = vunpack.c.h.bf16 %v1283_v51  ;;  %v933_v0 = vunpack.c.l.bf16 %v1041_v49  ;;  %v897_v9 = vunpack.c.l.bf16 %v1032_v59  ;;  %v1390_v49 = vld [vmem:[%s1608_s0 + $0x148] sm:$0xff]  }
  0x20   :  { %480 = vmatpush.msra.mxu2 %v861_v1  ;;  %399 = vmatpush.msra.mxu0 %v794_v2  ;;  %v1312_v1 = vld [vmem:[%s1608_s0 + $0x160] sm:$0xff]  }
  0x21   :  { %1074 = vmatpush.msra.mxu3 %v794_v2  ;;  %440 = vmatpush.msra.mxu1 %v826_v3  ;;  %v973_v2 = vunpack.c.l.bf16 %v1283_v51  ;;  %v1001_v3 = vunpack.c.l.bf16 %v1058_v52  ;;  %v138_v51 = vld [vmem:[%s1609_s1 + $0x190] sm:$0xff] }
  0x22   :  { %481 = vmatpush.msra.mxu2 %v858_v4  ;;  %400 = vmatpush.msra.mxu0 %v793_v5  ;;  %v1057_v4 = vld [vmem:[%s1608_s0 + $0x198] sm:$0xff]  }
  0x23   :  { %1075 = vmatpush.msra.mxu3 %v793_v5  ;;  %441 = vmatpush.msra.mxu1 %v825_v6  ;;  %v898_v5 = vunpack.c.h.bf16 %v1032_v59  ;;  %v930_v6 = vunpack.c.h.bf16 %v1040_v60  ;;  %v998_v8 = vunpack.c.h.bf16 %v1057_v4  ;;  %v997_v24 = vunpack.c.l.bf16 %v1057_v4  ;;  %v99_v59 = vld [vmem:[%s1609_s1 + $0x58] sm:$0xff]  ;;  %v112_v4 = vld [vmem:[%s1609_s1 + $0xc0] sm:$0xff] }
  0x24   :  { %482 = vmatpush.msra.mxu2 %v857_v7  ;;  %401 = vmatmul.f32.vlgmr.msra.gmra.mxu0 %v88_v10  ;;  %v970_v7 = vunpack.c.h.bf16 %v1312_v1  ;;  %v929_v10 = vunpack.c.l.bf16 %v1040_v60  ;;  %v957_v60 = vunpack.c.l.bf16 %v1390_v49 }
  0x25   :  { %413 = vmatmul.f32.vlgmr.msra.gmra.mxu3 %v116_v11  ;;  %442 = vmatmul.f32.vlgmr.msra.gmra.mxu1 %v89_v12  ;;  %v1031_v11 = vld [vmem:[%s1608_s0 + $0xc8] sm:$0xff]  }
  0x26   :  { %483 = vmatmul.f32.vlgmr.msra.gmra.mxu2 %v90_v13  ;;  %508 = vmatpush.msrb.mxu3 %v918_v14  ;;  %v1039_v12 = vld [vmem:[%s1608_s0 + $0x108] sm:$0xff]   ;;  %v894_v17 = vunpack.c.h.bf16 %v1031_v11  ;;  %v893_v25 = vunpack.c.l.bf16 %v1031_v11  ;;  %v28_v11 = vld [vmem:[%s1610_s2 + $0x20] sm:$0xff] }
  0x27   :  { %549 = vmatpush.msrb.mxu0 %v950_v15  ;;  %1076 = vmatpush.msrb.mxu1 %v982_v27  ;;  %v109_v13 = vld [vmem:[%s1609_s1 + $0xa8] sm:$0xff]  ;;  %v110_v15 = vld [vmem:[%s1609_s1 + $0xb0] sm:$0xff] }
  0x28   :  { %509 = vmatpush.msrb.mxu3 %v917_v18  ;;  %635 = vmatpush.msrb.mxu2 %v1006_v45  ;;  %v137_v14 = vld [vmem:[%s1609_s1 + $0x188] sm:$0xff]  ;;  %v926_v18 = vunpack.c.h.bf16 %v1039_v12  ;;  %v91_v45 = vld [vmem:[%s1609_s1 + $0x18] sm:$0xff] }
  0x29   :  { %550 = vmatpush.msrb.mxu0 %v949_v19  ;;  %1077 = vmatpush.msrb.mxu1 %v981_v37  ;;  %v1346_v19 = vld [vmem:[%s1608_s0 + $0x158] sm:$0xff]  }
  0x2a   :  { %510 = vmatpush.msrb.mxu3 %v914_v20  ;;  %636 = vmatpush.msrb.mxu2 %v1005_v50  ;;  %v1056_v20 = vld [vmem:[%s1608_s0 + $0x190] sm:$0xff]   ;;  %v1054_v50 = vld [vmem:[%s1608_s0 + $0x180] sm:$0xff]  }
  0x2b   :  { %551 = vmatpush.msrb.mxu0 %v946_v21  ;;  %1078 = vmatpush.msrb.mxu1 %v978_v40  ;;  %v1030_v21 = vld [vmem:[%s1608_s0 + $0xc0] sm:$0xff]   ;;  %v993_v35 = vunpack.c.l.bf16 %v1056_v20 }
  0x2c   :  { %511 = vmatpush.msrb.mxu3 %v913_v22  ;;  %404 = vmatmul.f32.gmra.mxu0 %v95_v28  ;;  %v1038_v22 = vld [vmem:[%s1608_s0 + $0x100] sm:$0xff]   ;;  %v925_v28 = vunpack.c.l.bf16 %v1039_v12  ;;  %v889_v36 = vunpack.c.l.bf16 %v1030_v21  ;;  %v107_v12 = vld [vmem:[%s1609_s1 + $0x98] sm:$0xff] }
  0x2d   :  { %552 = vmatpush.msrb.mxu0 %v945_v23  ;;  %416 = vmatmul.f32.gmra.mxu3 %v123_v29  ;;  %v969_v23 = vunpack.c.l.bf16 %v1312_v1  ;;  %v966_v29 = vunpack.c.h.bf16 %v1346_v19  ;;  %v25_v1 = vld [vmem:[%s1610_s2 + $0x8] sm:$0xff] }
  0x2e   :  { %445 = vmatmul.f32.gmra.mxu1 %v96_v30  ;;  %486 = vmatmul.f32.gmra.mxu2 %v97_v31  ;;  %v994_v30 = vunpack.c.h.bf16 %v1056_v20  ;;  %v890_v31 = vunpack.c.h.bf16 %v1030_v21  ;;  %v134_v20 = vld [vmem:[%s1609_s1 + $0x170] sm:$0xff]  ;;  %v27_v21 = vld [vmem:[%s1610_s2 + $0x18] sm:$0xff] }
  0x2f   :  { %512 = vmatpush.msrb.mxu3 %v910_v32  ;;  %553 = vmatpush.msrb.mxu0 %v942_v33  ;;  %v922_v32 = vunpack.c.h.bf16 %v1038_v22  ;;  %v965_v33 = vunpack.c.l.bf16 %v1346_v19  ;;  %v133_v19 = vld [vmem:[%s1609_s1 + $0x168] sm:$0xff] }
  0x30   :  { %1079 = vmatpush.msrb.mxu1 %v977_v44  ;;  %637 = vmatpush.msrb.mxu2 %v1002_v62  ;;  %v985_v62 = vunpack.c.l.bf16 %v1054_v50 }
  0x31   :  { %513 = vmatpush.msrb.mxu3 %v909_v38  ;;  %554 = vmatpush.msrb.mxu0 %v941_v39  ;;  %v921_v38 = vunpack.c.l.bf16 %v1038_v22  ;;  %v1365_v39 = vld [vmem:[%s1608_s0 + $0x150] sm:$0xff]   ;;  %v121_v22 = vld [vmem:[%s1609_s1 + $0x108] sm:$0xff] }
  0x32   :  { %1080 = vmatpush.msrb.mxu1 %v974_v61  ;;  %638 = vmatpush.msrb.mxu2 %v1001_v3  ;;  %v961_v52 = vunpack.c.l.bf16 %v1365_v39  ;;  %v132_v3 = vld [vmem:[%s1609_s1 + $0x160] sm:$0xff] }
  0x33   :  { %514 = vmatpush.msrb.mxu3 %v906_v41  ;;  %555 = vmatpush.msrb.mxu0 %v938_v42  ;;  %v1055_v41 = vld [vmem:[%s1608_s0 + $0x188] sm:$0xff]  }
  0x34   :  { %407 = vmatmul.f32.gmra.mxu0 %v102_v53  ;;  %1081 = vmatpush.msrb.mxu1 %v973_v2  ;;  %v117_v42 = vld [vmem:[%s1609_s1 + $0xe8] sm:$0xff]  ;;  %v990_v48 = vunpack.c.h.bf16 %v1055_v41  ;;  %v989_v53 = vunpack.c.l.bf16 %v1055_v41 }
  0x35   :  { %515 = vmatpush.msrb.mxu3 %v905_v46  ;;  %556 = vmatpush.msrb.mxu0 %v937_v47  ;;  %v92_v46 = vld [vmem:[%s1609_s1 + $0x20] sm:$0xff]  ;;  %v962_v47 = vunpack.c.h.bf16 %v1365_v39 }
  0x36   :  { %419 = vmatmul.f32.gmra.mxu3 %v130_v54  ;;  %448 = vmatmul.f32.gmra.mxu1 %v103_v55  ;;  %v958_v54 = vunpack.c.h.bf16 %v1390_v49  ;;  %v986_v55 = vunpack.c.h.bf16 %v1054_v50  ;;  %v724_v50 = vld [vmem:[%s1611_s4] sm:$0xff] }
  0x37   :  { %489 = vmatmul.f32.gmra.mxu2 %v104_v56  ;;  %516 = vmatpush.msrb.mxu3 %v902_v57  ;;  %v124_v56 = vld [vmem:[%s1609_s1 + $0x120] sm:$0xff]  ;;  %v125_v57 = vld [vmem:[%s1609_s1 + $0x128] sm:$0xff] }
  0x38   :  { %557 = vmatpush.msrb.mxu0 %v934_v58  ;;  %1082 = vmatpush.msrb.mxu1 %v970_v7  ;;  %v1412_v58 = vld [vmem:[%s1608_s0 + $0x140] sm:$0xff]  }
  0x39   :  { %517 = vmatpush.msrb.mxu3 %v901_v63  ;;  %639 = vmatpush.msrb.mxu2 %v998_v8  ;;  %v954_v26 = vunpack.c.h.bf16 %v1412_v58  ;;  %v953_v63 = vunpack.c.l.bf16 %v1412_v58  ;;  %v94_v8 = vld [vmem:[%s1609_s1 + $0x30] sm:$0xff] }
  0x3a   :  { %558 = vmatpush.msrb.mxu0 %v933_v0  ;;  %1083 = vmatpush.msrb.mxu1 %v969_v23  ;;  %v131_v0 = vld [vmem:[%s1609_s1 + $0x158] sm:$0xff] }
  0x3b   :  { %518 = vmatpush.msrb.mxu3 %v898_v5  ;;  %640 = vmatpush.msrb.mxu2 %v997_v24  ;;  %v113_v5 = vld [vmem:[%s1609_s1 + $0xc8] sm:$0xff]  ;;  %v140_v24 = vld [vmem:[%s1609_s1 + $0x1a0] sm:$0xff] }
  0x3c   :  { %559 = vmatpush.msrb.mxu0 %v930_v6  ;;  %1084 = vmatpush.msrb.mxu1 %v966_v29  ;;  %v29_v6 = vld [vmem:[%s1610_s2 + $0x28] sm:$0xff] }
  0x3d   :  { %519 = vmatpush.msrb.mxu3 %v897_v9  ;;  %410 = vmatmul.f32.gmra.mxu0 %v109_v13  ;;  %v119_v9 = vld [vmem:[%s1609_s1 + $0xf8] sm:$0xff]  ;;  %v101_v13 = vld [vmem:[%s1609_s1 + $0x68] sm:$0xff] }
  0x3e   :  { %560 = vmatpush.msrb.mxu0 %v929_v10  ;;  %422 = vmatmul.f32.gmra.mxu3 %v137_v14  ;;  %v120_v10 = vld [vmem:[%s1609_s1 + $0x100] sm:$0xff]  ;;  %v126_v14 = vld [vmem:[%s1609_s1 + $0x130] sm:$0xff] }
  0x3f   :  { %451 = vmatmul.f32.gmra.mxu1 %v110_v15  ;;  %492 = vmatmul.f32.gmra.mxu2 %v111_v16  ;;  %v127_v15 = vld [vmem:[%s1609_s1 + $0x138] sm:$0xff]  ;;  %v24_v16 = vld [vmem:[%s1610_s2] sm:$0xff] }
  0x40   :  { %520 = vmatpush.msrb.mxu3 %v894_v17  ;;  %561 = vmatpush.msrb.mxu0 %v926_v18  ;;  %v114_v17 = vld [vmem:[%s1609_s1 + $0xd0] sm:$0xff]  ;;  %v108_v18 = vld [vmem:[%s1609_s1 + $0xa0] sm:$0xff] }
  0x41   :  { %641 = vmatpush.msrb.mxu2 %v994_v30  ;;  %1085 = vmatpush.msrb.mxu1 %v965_v33  ;;  %v122_v30 = vld [vmem:[%s1609_s1 + $0x110] sm:$0xff] }
  0x42   :  { %521 = vmatpush.msrb.mxu3 %v893_v25  ;;  %562 = vmatpush.msrb.mxu0 %v925_v28  ;;  %v141_v25 = vld [vmem:[%s1609_s1 + $0x1a8] sm:$0xff]  ;;  %v26_v28 = vld [vmem:[%s1610_s2 + $0x10] sm:$0xff] }
  0x43   :  { %642 = vmatpush.msrb.mxu2 %v993_v35  ;;  %1086 = vmatpush.msrb.mxu1 %v962_v47  ;;  %v142_v35 = vld [vmem:[%s1609_s1 + $0x1b0] sm:$0xff] }
  0x44   :  { %522 = vmatpush.msrb.mxu3 %v890_v31  ;;  %563 = vmatpush.msrb.mxu0 %v922_v32  ;;  %v93_v31 = vld [vmem:[%s1609_s1 + $0x28] sm:$0xff]  ;;  %v135_v32 = vld [vmem:[%s1609_s1 + $0x178] sm:$0xff] }
  0x45   :  { %643 = vmatpush.msrb.mxu2 %v990_v48  ;;  %1087 = vmatpush.msrb.mxu1 %v961_v52 }
  0x46   :  { %523 = vmatpush.msrb.mxu3 %v889_v36  ;;  %564 = vmatpush.msrb.mxu0 %v921_v38  ;;  %v136_v36 = vld [vmem:[%s1609_s1 + $0x180] sm:$0xff]  ;;  %v143_v38 = vld [vmem:[%s1609_s1 + $0x1b8] sm:$0xff] }
  0x47   :  { %454 = vmatmul.f32.gmra.mxu1 %v117_v42  ;;  %495 = vmatmul.f32.gmra.mxu2 %v118_v43 }
  0x48   :  { %524 = vmatmul.f32.vlgmr.msrb.gmra.mxu3 %v91_v45  ;;  %565 = vmatmul.f32.vlgmr.msrb.gmra.mxu0 %v92_v46 }
  0x49   :  { %590 = vmatpush.msra.mxu0 %v982_v27  ;;  %644 = vmatpush.msrb.mxu2 %v989_v53  ;;  %v98_v27 = vld [vmem:[%s1609_s1 + $0x50] sm:$0xff] }
  0x4a   :  { %1088 = vmatpush.msrb.mxu1 %v958_v54 }
  0x4b   :  { %591 = vmatpush.msra.mxu0 %v981_v37  ;;  %645 = vmatpush.msrb.mxu2 %v986_v55  ;;  %v31_v37 = vld [vmem:[%s1610_s2 + $0x38] sm:$0xff] }
  0x4c   :  { %1089 = vmatpush.msrb.mxu1 %v957_v60 }
  0x4d   :  { %592 = vmatpush.msra.mxu0 %v978_v40  ;;  %646 = vmatpush.msrb.mxu2 %v985_v62  ;;  %v1100_v40 = vmov 0  }
  0x4e   :  { %1093 = vset.pattern.permute.xlu0 %v1100_v40  ;;  %1090 = vmatpush.msrb.mxu1 %v954_v26 }
  0x4f   :  { %457 = vmatmul.f32.gmra.mxu1 %v124_v56  ;;  %498 = vmatmul.f32.gmra.mxu2 %v125_v57 }
  0x50   :  { %527 = vmatmul.f32.gmra.mxu3 %v98_v27  ;;  %568 = vmatmul.f32.gmra.mxu0 %v99_v59 }
  0x51   :  { %593 = vmatpush.msra.mxu0 %v977_v44  ;;  %69 = vperm.xlu0 %1093, %v31_v37   ;;  %v106_v44 = vld [vmem:[%s1609_s1 + $0x90] sm:$0xff] }
  0x52   :  { %1094 = vset.pattern.permute.xlu1 %v1100_v40  ;;  %1091 = vmatpush.msrb.mxu1 %v953_v63 }
  0x53   :  { %594 = vmatpush.msra.mxu0 %v974_v61  ;;  %1095 = vset.pattern.permute.xlu2 %v1100_v40  ;;  %v30_v61 = vld [vmem:[%s1610_s2 + $0x30] sm:$0xff] }
  0x54   :  { %59 = vperm.xlu1 %1094, %v29_v6   ;;  %49 = vperm.xlu2 %1095, %v27_v21  }
  0x55   :  { %595 = vmatpush.msra.mxu0 %v973_v2  ;;  %v139_v2 = vld [vmem:[%s1609_s1 + $0x198] sm:$0xff] }
  0x57   :  { %460 = vmatmul.f32.gmra.mxu1 %v131_v0  ;;  %501 = vmatmul.f32.gmra.mxu2 %v132_v3 }
  0x58   :  { %530 = vmatmul.f32.gmra.mxu3 %v105_v34  ;;  %571 = vmatmul.f32.gmra.mxu0 %v106_v44 }
  0x59   :  { %596 = vmatpush.msra.mxu0 %v970_v7  ;;  %64 = vperm.xlu0 %1093, %v30_v61   ;;  %v100_v7 = vld [vmem:[%s1609_s1 + $0x60] sm:$0xff] }
  0x5b   :  { %597 = vmatpush.msra.mxu0 %v969_v23  ;;  %v115_v23 = vld [vmem:[%s1609_s1 + $0xd8] sm:$0xff] }
  0x5c   :  { %54 = vperm.xlu1 %1094, %v28_v11   ;;  %44 = vperm.xlu2 %1095, %v26_v28  }
  0x5d   :  { %598 = vmatpush.msra.mxu0 %v966_v29  ;;  %v128_v29 = vld [vmem:[%s1609_s1 + $0x140] sm:$0xff] }
  0x5f   :  { %463 = vmatmul.f32.gmra.mxu1 %v138_v51  ;;  %504 = vmatmul.f32.gmra.mxu2 %v139_v2 }
  0x60   :  { %533 = vmatmul.f32.gmra.mxu3 %v112_v4  ;;  %574 = vmatmul.f32.gmra.mxu0 %v113_v5 }
  0x61   :  { %599 = vmatpush.msra.mxu0 %v965_v33  ;;  %39 = vperm.xlu0 %1093, %v25_v1   ;;  %v129_v33 = vld [vmem:[%s1609_s1 + $0x148] sm:$0xff] }
  0x63   :  { %600 = vmatpush.msra.mxu0 %v962_v47 }
  0x64   :  { %34 = vperm.xlu1 %1094, %v24_v16   ;;  %727 = vperm.xlu2 %1095, %v724_v50  }
  0x65   :  { %601 = vmatpush.msra.mxu0 %v961_v52 }
  0x67   :  { %609 = vmatmul.f32.vlgmr.msrb.gmra.mxu1 %v100_v7  ;;  %782 = vmatmul.msk.f32.vlgmr.msrb.gmra.mxu2 %vm360_vm0, %v94_v8 }
  0x68   :  { %536 = vmatmul.f32.gmra.mxu3 %v119_v9  ;;  %577 = vmatmul.f32.gmra.mxu0 %v120_v10 }
  0x69   :  { %602 = vmatpush.msra.mxu0 %v958_v54 }
  0x6b   :  { %603 = vmatpush.msra.mxu0 %v957_v60 }
  0x6d   :  { %604 = vmatpush.msra.mxu0 %v954_v26 }
  0x6f   :  { %612 = vmatmul.f32.gmra.mxu1 %v107_v12  ;;  %783 = vmatmul.msk.f32.gmra.mxu2 %vm360_vm0, %v101_v13 }
  0x70   :  { %539 = vmatmul.f32.gmra.mxu3 %v126_v14  ;;  %580 = vmatmul.f32.gmra.mxu0 %v127_v15 }
  0x71   :  { %605 = vmatpush.msra.mxu0 %v953_v63 }
  0x77   :  { %615 = vmatmul.f32.gmra.mxu1 %v114_v17  ;;  %784 = vmatmul.msk.f32.gmra.mxu2 %vm360_vm0, %v108_v18 }
  0x78   :  { %542 = vmatmul.f32.gmra.mxu3 %v133_v19  ;;  %583 = vmatmul.f32.gmra.mxu0 %v134_v20 }
  0x7f   :  { %618 = vmatmul.f32.gmra.mxu1 %v121_v22  ;;  %785 = vmatmul.msk.f32.gmra.mxu2 %vm360_vm0, %v115_v23 }
  0x80   :  { %545 = vmatmul.f32.gmra.mxu3 %v140_v24  ;;  %586 = vmatmul.f32.gmra.mxu0 %v141_v25 }
  0x87   :  { %621 = vmatmul.f32.gmra.mxu1 %v128_v29  ;;  %786 = vmatmul.msk.f32.gmra.mxu2 %vm360_vm0, %v122_v30 }
  0x88   :  { %606 = vmatmul.f32.vlgmr.msra.gmra.mxu0 %v93_v31 }
  0x8f   :  { %624 = vmatmul.f32.gmra.mxu1 %v135_v32  ;;  %787 = vmatmul.msk.f32.gmra.mxu2 %vm360_vm0, %v129_v33 }
  0x97   :  { %627 = vmatmul.f32.gmra.mxu1 %v142_v35  ;;  %788 = vmatmul.msk.f32.gmra.mxu2 %vm360_vm0, %v136_v36 }
  0x9f   :  { %789 = vmatmul.msk.f32.gmra.mxu2 %vm360_vm0, %v143_v38 }
  0xa1   :  { %v402_v39 = vpop.f32.mrf.mxu0 }
  0xa2   :  { %v443_v41 = vpop.f32.mrf.mxu1 }
  0xa3   :  { %v444_v42 = vadd.f32 %v443_v41, %v402_v39 }
  0xa8   :  { %v414_v43 = vpop.f32.mrf.mxu3 }
  0xa9   :  { %v484_v45 = vpop.f32.mrf.mxu2  ;;  %v405_v47 = vpop.f32.mrf.mxu0 }
  0xaa   :  { %v485_v46 = vadd.f32 %v484_v45, %v444_v42 }
  0xab   :  { %v446_v48 = vpop.f32.mrf.mxu1 }
  0xac   :  { %v447_v49 = vadd.f32 %v446_v48, %v405_v47 }
  0xb0   :  { %v417_v52 = vpop.f32.mrf.mxu3 }
  0xb1   :  { %v487_v53 = vpop.f32.mrf.mxu2  ;;  %v408_v55 = vpop.f32.mrf.mxu0 }
  0xb2   :  { %v1584_v54 = vadd.f32 %v487_v53, %v447_v49 }
  0xb3   :  { %v449_v56 = vpop.f32.mrf.mxu1 }
  0xb4   :  { %v450_v57 = vadd.f32 %v449_v56, %v408_v55 }
  0xb9   :  { %v420_v58 = vpop.f32.mrf.mxu3 }
  0xba   :  { %v490_v27 = vpop.f32.mrf.mxu2  ;;  %v411_v60 = vpop.f32.mrf.mxu0 }
  0xbb   :  { %v1586_v59 = vadd.f32 %v490_v27, %v450_v57 }
  0xbc   :  { %v452_v62 = vpop.f32.mrf.mxu1 }
  0xbd   :  { %v453_v26 = vadd.f32 %v452_v62, %v411_v60 }
  0xc1   :  { %v423_v37 = vpop.f32.mrf.mxu3 }
  0xc2   :  { %v493_v63 = vpop.f32.mrf.mxu2 }
  0xc3   :  { %v494_v40 = vadd.f32 %v493_v63, %v453_v26  ;;  %v70_v48 = vpop.permute.xlu0 %69 }
  0xc4   :  { %v455_v0 = vpop.f32.mrf.mxu1 }
  0xc5   :  { %v456_v3 = vadd.f32 %v455_v0, %v414_v43  ;;  %v566_v34 = vpop.f32.mrf.mxu0 }
  0xca   :  { %v496_v44 = vpop.f32.mrf.mxu2 }
  0xcb   :  { %v497_v61 = vadd.f32 %v496_v44, %v456_v3  ;;  %v525_v51 = vpop.f32.mrf.mxu3  ;;  %v50_v3 = vpop.permute.xlu2 %49 }
  0xcc   :  { %v526_v2 = vadd.f32 %v525_v51, %v485_v46  ;;  %v458_v4 = vpop.f32.mrf.mxu1 }
  0xcd   :  { %v459_v5 = vadd.f32 %v458_v4, %v417_v52  ;;  %v1588_v1 = vpop.f32.mrf.mxu0  ;;  %v60_v52 = vpop.permute.xlu1 %59 }
  0xce   :  { %v567_v6 = vadd.f32 %v566_v34, %v526_v2 }
  0xd2   :  { %v499_v7 = vpop.f32.mrf.mxu2 }
  0xd3   :  { %v500_v8 = vadd.f32 %v499_v7, %v459_v5  ;;  %v528_v14 = vpop.f32.mrf.mxu3  ;;  %v65_v5 = vpop.permute.xlu0 %64 }
  0xd4   :  { %v461_v9 = vpop.f32.mrf.mxu1  ;;  %v529_v4 = vadd.f32 %v528_v14, %v1584_v54 }
  0xd5   :  { %v572_v10 = vpop.f32.mrf.mxu0  ;;  %v462_v11 = vadd.f32 %v461_v9, %v420_v58 }
  0xda   :  { %v502_v12 = vpop.f32.mrf.mxu2 }
  0xdb   :  { %v503_v13 = vadd.f32 %v502_v12, %v462_v11  ;;  %v531_v20 = vpop.f32.mrf.mxu3  ;;  %v55_v11 = vpop.permute.xlu1 %54 }
  0xdc   :  { %v464_v15 = vpop.f32.mrf.mxu1  ;;  %v532_v0 = vadd.f32 %v531_v20, %v1586_v59 }
  0xdd   :  { %v575_v16 = vpop.f32.mrf.mxu0  ;;  %v465_v49 = vadd.f32 %v464_v15, %v423_v37 }
  0xde   :  { %v573_v9 = vadd.f32 %v572_v10, %v532_v0  ;;  %v45_v10 = vpop.permute.xlu2 %44 }
  0xe2   :  { %v505_v17 = vpop.f32.mrf.mxu2 }
  0xe3   :  { %v534_v24 = vpop.f32.mrf.mxu3  ;;  %v506_v55 = vadd.f32 %v505_v17, %v465_v49  ;;  %v570_v17 = vadd.f32 %v1588_v1, %v529_v4 }
  0xe4   :  { %v1590_v18 = vpop.f32.mrf.mxu1  ;;  %v535_v62 = vadd.f32 %v534_v24, %v494_v40 }
  0xe5   :  { %v578_v19 = vpop.f32.mrf.mxu0  ;;  %v611_v54 = vadd.f32 %v1590_v18, %v570_v17 }
  0xea   :  { %v648_v21 = vpop.f32.mrf.mxu2 }
  0xeb   :  { %v537_v30 = vpop.f32.mrf.mxu3 }
  0xec   :  { %v613_v22 = vpop.f32.mrf.mxu1  ;;  %v538_v58 = vadd.f32 %v537_v30, %v497_v61 }
  0xed   :  { %v581_v23 = vpop.f32.mrf.mxu0 }
  0xee   :  { %v579_v44 = vadd.f32 %v578_v19, %v538_v58  ;;  %v614_v19 = vadd.f32 %v613_v22, %v573_v9 }
  0xf2   :  { %v1592_v25 = vpop.f32.mrf.mxu2 }
  0xf3   :  { %v540_v36 = vpop.f32.mrf.mxu3 }
  0xf4   :  { %v616_v29 = vpop.f32.mrf.mxu1  ;;  %v541_v56 = vadd.f32 %v540_v36, %v500_v8  ;;  %v40_v36 = vpop.permute.xlu0 %39 }
  0xf5   :  { %v584_v28 = vpop.f32.mrf.mxu0 }
  0xf6   :  { %v582_v26 = vadd.f32 %v581_v23, %v541_v56 }
  0xfa   :  { %v654_v31 = vpop.f32.mrf.mxu2 }
  0xfb   :  { %v543_v45 = vpop.f32.mrf.mxu3  ;;  %v655_v14 = vadd.f32 %v654_v31, %v614_v19 }
  0xfc   :  { %v619_v33 = vpop.f32.mrf.mxu1  ;;  %v544_v50 = vadd.f32 %v543_v45, %v503_v13 }
  0xfd   :  { %v587_v32 = vpop.f32.mrf.mxu0  ;;  %v620_v7 = vadd.f32 %v619_v33, %v579_v44  ;;  %v674_v1 = vadd.f32 %v655_v14, %v45_v10 }
  0xfe   :  { %v585_v60 = vadd.f32 %v584_v28, %v544_v50  ;;  %v723_v50 = vld [vmem:[%s1612_s3] sm:$0xff] }
  0xff   :  { %vm701_vm6 = vcmp.ge.f32.partialorder %v674_v1, 0.0 }
 0x102   :  { %v657_v35 = vpop.f32.mrf.mxu2 }
 0x103   :  { %v546_v53 = vpop.f32.mrf.mxu3 }
 0x104   :  { %v622_v42 = vpop.f32.mrf.mxu1  ;;  %v547_v27 = vadd.f32 %v546_v53, %v506_v55 }
 0x105   :  { %v607_v38 = vpop.f32.mrf.mxu0  ;;  %v623_v51 = vadd.f32 %v622_v42, %v582_v26  ;;  %v709_v42 = vmul.f32 0.02, %v674_v1 }
 0x106   :  { %v608_v39 = vadd.f32 %v607_v38, %v567_v6  ;;  %v588_v2 = vadd.f32 %v587_v32, %v547_v27  ;;  %v576_v6 = vadd.f32 %v575_v16, %v535_v62  ;;  %v35_v38 = vpop.permute.xlu1 %34 }
 0x108   :  { %v1594_v41 = vadd.f32 %v648_v21, %v608_v39  ;;  %v617_v12 = vadd.f32 %v616_v29, %v576_v6  ;;  %v652_v29 = vadd.f32 %v1592_v25, %v611_v54 }
 0x10a   :  { %v660_v43 = vpop.f32.mrf.mxu2  ;;  %v658_v20 = vadd.f32 %v657_v35, %v617_v12  ;;  %v673_v18 = vadd.f32 %v652_v29, %v40_v36  ;;  %v672_v25 = vadd.f32 %v1594_v41, %v35_v38  ;;  %v728_v41 = vpop.permute.xlu2 %727 }
 0x10b   :  { %v661_v13 = vadd.f32 %v660_v43, %v620_v7 }
 0x10c   :  { %v625_v47 = vpop.f32.mrf.mxu1  ;;  %v675_v30 = vadd.f32 %v658_v20, %v50_v3  ;;  %v708_v45 = vmul.f32 0.02, %v673_v18  ;;  %vm700_vm7 = vcmp.ge.f32.partialorder %v673_v18, 0.0  ;;  %vm699_vm8 = vcmp.ge.f32.partialorder %v672_v25, 0.0 }
 0x10d   :  { %v626_v63 = vadd.f32 %v625_v47, %v585_v60  ;;  %v676_v16 = vadd.f32 %v661_v13, %v55_v11  ;;  %v707_v47 = vmul.f32 0.02, %v672_v25 }
 0x10e   :  { %v710_v39 = vmul.f32 0.02, %v675_v30  ;;  %vm702_vm5 = vcmp.ge.f32.partialorder %v675_v30, 0.0  ;;  %v716_v49 = vsel %vm700_vm7, %v673_v18, %v708_v45 }
 0x10f   :  { %v711_v35 = vmul.f32 0.02, %v676_v16  ;;  %vm703_vm4 = vcmp.ge.f32.partialorder %v676_v16, 0.0 }
 0x111   :  { %v719_v43 = vsel %vm703_vm4, %v676_v16, %v711_v35 }
 0x112   :  { %v663_v46 = vpop.f32.mrf.mxu2 }
 0x113   :  { %v664_v8 = vadd.f32 %v663_v46, %v623_v51  ;;  %v718_v46 = vsel %vm702_vm5, %v675_v30, %v710_v39 }
 0x114   :  { %v628_v34 = vpop.f32.mrf.mxu1 }
 0x115   :  { %v629_v61 = vadd.f32 %v628_v34, %v588_v2  ;;  %v677_v21 = vadd.f32 %v664_v8, %v60_v52  ;;  %v715_v52 = vsel %vm699_vm8, %v672_v25, %v707_v47 }
 0x117   :  { %v712_v33 = vmul.f32 0.02, %v677_v21  ;;  %vm704_vm3 = vcmp.ge.f32.partialorder %v677_v21, 0.0 }
 0x119   :  { %v720_v31 = vsel %vm704_vm3, %v677_v21, %v712_v33 }
 0x11a   :  { %v666_v57 = vpop.f32.mrf.mxu2 }
 0x11b   :  { %v667_v37 = vadd.f32 %v666_v57, %v626_v63 }
 0x11d   :  { %v678_v15 = vadd.f32 %v667_v37, %v65_v5 }
 0x11f   :  { %v713_v28 = vmul.f32 0.02, %v678_v15  ;;  %vm705_vm2 = vcmp.ge.f32.partialorder %v678_v15, 0.0 }
 0x121   :  { %v721_v22 = vsel %vm705_vm2, %v678_v15, %v713_v28 }
 0x122   :  { %v669_v40 = vpop.f32.mrf.mxu2 }
 0x123   :  { %v670_v59 = vadd.f32 %v669_v40, %v629_v61 }
 0x125   :  { %v679_v23 = vadd.f32 %v670_v59, %v70_v48  ;;  %v717_v48 = vsel %vm701_vm6, %v674_v1, %v709_v42 }
 0x127   :  { %v714_v24 = vmul.f32 0.02, %v679_v23  ;;  %vm706_vm1 = vcmp.ge.f32.partialorder %v679_v23, 0.0 }
 0x129   :  { %v722_v32 = vsel %vm706_vm1, %v679_v23, %v714_v24 }
 0x12a   :  { %742 = vmatpush.msra.mxu3 %v722_v32 }
 0x12c   :  { %743 = vmatpush.msra.mxu3 %v721_v22 }
 0x12e   :  { %744 = vmatpush.msra.mxu3 %v720_v31 }
 0x130   :  { %745 = vmatpush.msra.mxu3 %v719_v43 }
 0x132   :  { %746 = vmatpush.msra.mxu3 %v718_v46 }
 0x134   :  { %747 = vmatpush.msra.mxu3 %v717_v48 }
 0x136   :  { %748 = vmatpush.msra.mxu3 %v716_v49 }
 0x138   :  { %749 = vmatpush.msra.mxu3 %v715_v52 }
 0x139   :  { %790 = vmatmul.msk.f32.vlgmr.msra.gmra.mxu3 %vm730_vm9, %v723_v50 }
 0x1bc   :  { %v751_v53 = vpop.f32.mrf.mxu3 }
 0x1bd   :  { %v752_v55 = vadd.f32 %v751_v53, %v728_v41 }
 0x1bf   :  { %v754_v56 = vand.u32 2147483647, %v752_v55  ;;  %vm774_vm14 = vcmp.ge.f32.partialorder %v752_v55, 0.0 }
 0x1c1   :  { %v755_v57 = vsub.f32 0.0, %v754_v56 }
 0x1c3   :  { %v756_v58 = vmul.f32 1.442695, %v755_v57 }
 0x1c5   :  { %1096 = vpow2.f32 %v756_v58 }
 0x1cb   :  { %v1097_v27 = vpop.eup %1096 }
 0x1cc   :  { %v758_v60 = vadd.f32 1.0, %v1097_v27 }
 0x1ce   :  { %1098 = vrcp.f32 %v758_v60  ;;  %v770_v0 = vand.u32 2147483648, %v758_v60  ;;  %v768_v34 = vand.u32 2147483647, %v758_v60  ;;  %vm764_vm11 = vweird.f32 %v758_v60 }
 0x1d0   :  { %v771_v51 = vor.u32 1.1754944e-38, %v770_v0  ;;  %vm769_vm13 = vcmp.eq.f32.partialorder %v768_v34, 8.507059e+37 }
 0x1d4   :  { %v1099_v62 = vpop.eup %1098 }
 0x1d5   :  { %v760_v26 = vmul.f32 %v1099_v62, %v758_v60  ;;  %vm765_vm10 = vweird.f32 %v1099_v62 }
 0x1d6   :  { %vm766_vm12 = vmor %vm764_vm11, %vm765_vm10 }
 0x1d7   :  { %v761_v63 = vsub.f32 1.0, %v760_v26 }
 0x1d9   :  { %v762_v3 = vmul.f32 %v1099_v62, %v761_v63 }
 0x1db   :  { %v763_v44 = vadd.f32 %v1099_v62, %v762_v3 }
 0x1dd   :  { %v767_v2 = vsel %vm766_vm12, %v1099_v62, %v763_v44 }
 0x1de   :  { %v772_v37 = vsel %vm769_vm13, %v771_v51, %v767_v2 }
 0x1df   :  { %v775_v4 = vmul.f32 %v1097_v27, %v772_v37 }
 0x1e1   :  { %v776_v5 = vsel %vm774_vm14, %v772_v37, %v775_v4 }
 0x1e2   :  { %777 = vst [vmem:[%s1613_s5] sm:$0xff] %v776_v5 }

</bundles_post_ra>
